<compile_context>
chip_gen: v6e
topology: v6e:2x2x1
jax: 0.10.0
libtpu: 0.0.40
codegen_flags: <defaults>
</compile_context>

<pallas_src>
import numpy as np
import jax
import jax.numpy as jnp
from jax import lax
from jax.experimental import pallas as pl
from jax.experimental.pallas import tpu as pltpu

H = 64      # LSTM hidden size (fixed by the module)
F_IN = 7    # LSTM1 input feature size (fixed by the module)


# ----------------------------- Pallas kernel --------------------------------

def _cell(gates_in, h, c, whh_bf16):
    """One LSTM step. gates_in already holds x@W_ih + b_ih + b_hh.

    Gate column order (permuted in the wrapper): i, f, o, g.
    Only the recurrent matmul h @ W_hh remains on the serial critical path,
    done in bf16 with f32 accumulation.
    """
    gates = gates_in + jnp.dot(h.astype(jnp.bfloat16), whh_bf16,
                               preferred_element_type=jnp.float32)
    sig = jax.nn.sigmoid(gates[:, :3 * H])         # i | f | o  in one launch
    i = sig[:, 0 * H:1 * H]
    f = sig[:, 1 * H:2 * H]
    o = sig[:, 2 * H:3 * H]
    g = jnp.tanh(gates[:, 3 * H:4 * H])
    c_new = f * c + i * g
    h_new = o * jnp.tanh(c_new)
    return h_new, c_new


def tclstm_fusion_kernel(x2d_ref, xlast2_ref,
                         wih1_ref, whh1_ref, b1_ref,
                         wih2_ref, whh2_ref, b2_ref,
                         wih3_ref, whh3_ref, b3_ref,
                         fc1_wa_ref, fc1_wb_ref, fc1_b_ref,
                         fc2_w_ref, fc2_b_ref,
                         out_ref, h_ref, c_ref):
    # x2d_ref: (T*Bp, 7), time-major, batch padded to a sublane tile.
    Bp = xlast2_ref.shape[0]
    T = x2d_ref.shape[0] // Bp

    zeros = jnp.zeros((Bp, H), jnp.float32)

    # Hoist loop-invariant recurrent-weight loads (read once, bf16).
    whh1 = whh1_ref[...]
    whh2 = whh2_ref[...]
    whh3 = whh3_ref[...]

    # ----- LSTM 1: batched input projection for all T steps, then recurrence -----
    gin1 = (jnp.dot(x2d_ref[...], wih1_ref[...],
                    preferred_element_type=jnp.float32) + b1_ref[...])   # (T*Bp, 4H)
    h, c = zeros, zeros
    last8 = []
    for t in range(T):                       # fully unrolled, static slices
        h, c = _cell(gin1[t * Bp:(t + 1) * Bp], h, c, whh1)
        if t >= T - 8:
            last8.append(h)

    # ----- LSTM 2 over the last 8 outputs of LSTM 1 -----
    in2 = jnp.concatenate(last8, axis=0)                                 # (8*Bp, H)
    gin2 = (jnp.dot(in2, wih2_ref[...],
                    preferred_element_type=jnp.float32) + b2_ref[...])   # (8*Bp, 4H)
    h, c = zeros, zeros
    last3 = []
    for t in range(8):
        h, c = _cell(gin2[t * Bp:(t + 1) * Bp], h, c, whh2)
        if t >= 5:
            last3.append(h)

    # ----- LSTM 3 over the last 3 outputs of LSTM 2 -----
    in3 = jnp.concatenate(last3, axis=0)                                 # (3*Bp, H)
    gin3 = (jnp.dot(in3, wih3_ref[...],
                    preferred_element_type=jnp.float32) + b3_ref[...])   # (3*Bp, 4H)
    h, c = zeros, zeros
    for t in range(3):
        h, c = _cell(gin3[t * Bp:(t + 1) * Bp], h, c, whh3)

    h_ref[...] = h          # final hidden state of lstm3 (== outputs[:, -1])
    c_ref[...] = c          # final cell state of lstm3

    # ----- fc_2 : Linear(66->64) then Linear(64->2) -----
    # torch.cat((h3, x[:, -1, -2:]), 1) @ W1.T computed as a split matmul
    # (64-col piece + 2-col piece of W1); the (B,2) tail comes pre-sliced.
    y1 = (jnp.dot(h, fc1_wa_ref[...], preferred_element_type=jnp.float32)
          + jnp.dot(xlast2_ref[...], fc1_wb_ref[...],
                    preferred_element_type=jnp.float32)
          + fc1_b_ref[...])                                              # (Bp, 64)
    out_ref[...] = (jnp.dot(y1, fc2_w_ref[...],
                            preferred_element_type=jnp.float32)
                    + fc2_b_ref[...])                                    # (Bp, 2)


# ------------------------------- wrapper -------------------------------------

# Column permutation: PyTorch gate order (i, f, g, o) -> kernel order (i, f, o, g)
_PERM = np.concatenate([np.arange(0, 2 * H),          # i, f
                        np.arange(3 * H, 4 * H),      # o
                        np.arange(2 * H, 3 * H)])     # g


def tclstm_fusion_forward(x, params):
    """x: (B, T, 7), batch_first, like the PyTorch module."""
    B, T, _ = x.shape
    assert T >= 8, "module semantics assume a sequence length of at least 8"

    # Pad batch to a full sublane tile so every per-timestep slice is aligned.
    Bp = max(8, -(-B // 8) * 8)
    x_pad = jnp.pad(x.astype(jnp.float32), ((0, Bp - B), (0, 0), (0, 0)))
    x_tm = jnp.transpose(x_pad, (1, 0, 2))                 # (T, Bp, 7) time-major
    x2d = x_tm.reshape(T * Bp, F_IN)                       # (T*Bp, 7)
    x_last2 = x_pad[:, -1, F_IN - 2:F_IN]                  # (Bp, 2)

    def lstm_kernel_params(p):
        w_ih, w_hh, b_ih, b_hh = p
        # permuted gate columns, transposed weights, summed bias as (1, 4H)
        wih = w_ih[_PERM].T.astype(jnp.float32)            # (in, 4H)  f32
        whh = w_hh[_PERM].T.astype(jnp.bfloat16)           # (H, 4H)   bf16
        b = (b_ih + b_hh)[_PERM][None, :].astype(jnp.float32)
        return wih, whh, b

    wih1, whh1, b1 = lstm_kernel_params(params["lstm1"])
    wih2, whh2, b2 = lstm_kernel_params(params["lstm2"])
    wih3, whh3, b3 = lstm_kernel_params(params["lstm3"])

    fc1_w, fc1_b = params["fc1"]           # (64, 66), (64,)
    fc2_w, fc2_b = params["fc2"]           # (2, 64),  (2,)
    fc1_wa = fc1_w[:, :H].T                # (64, 64) — hidden part
    fc1_wb = fc1_w[:, H:H + 2].T           # (2, 64)  — bbox-tail part
    fc1_bb = fc1_b[None, :]                # (1, 64)
    fc2_wt = fc2_w.T                       # (64, 2)
    fc2_bb = fc2_b[None, :]                # (1, 2)

    vmem = pl.BlockSpec(memory_space=pltpu.MemorySpace.VMEM)
    out, h_n, c_n = pl.pallas_call(
        tclstm_fusion_kernel,
        out_shape=(jax.ShapeDtypeStruct((Bp, 2), jnp.float32),
                   jax.ShapeDtypeStruct((Bp, H), jnp.float32),
                   jax.ShapeDtypeStruct((Bp, H), jnp.float32)),
        in_specs=[vmem] * 16,
        out_specs=(vmem, vmem, vmem),
    )(x2d, x_last2,
      wih1, whh1, b1, wih2, whh2, b2, wih3, whh3, b3,
      fc1_wa, fc1_wb, fc1_bb, fc2_wt, fc2_bb)

    # Drop batch padding; match PyTorch return convention (h_n/c_n: (1, B, H)).
    return out[:B], (h_n[:B][None], c_n[:B][None])


# -------------------------- parameter init (synthetic) -----------------------

def init_params(key):
    ks = jax.random.split(key, 5)

    def lstm_params(k, in_dim):
        k1, k2, k3, k4 = jax.random.split(k, 4)
        s = 1.0 / np.sqrt(H)                 # PyTorch default LSTM init
        return (jax.random.uniform(k1, (4 * H, in_dim), jnp.float32, -s, s),
                jax.random.uniform(k2, (4 * H, H), jnp.float32, -s, s),
                jax.random.uniform(k3, (4 * H,), jnp.float32, -s, s),
                jax.random.uniform(k4, (4 * H,), jnp.float32, -s, s))

    def xavier(k, shape):                    # xavier_uniform_ on fc weights
        fan_out, fan_in = shape
        bound = np.sqrt(6.0 / (fan_in + fan_out))
        return jax.random.uniform(k, shape, jnp.float32, -bound, bound)

    return {
        "lstm1": lstm_params(ks[0], F_IN),
        "lstm2": lstm_params(ks[1], H),
        "lstm3": lstm_params(ks[2], H),
        "fc1": (xavier(ks[3], (H, H + 2)), jnp.zeros((H,), jnp.float32)),
        "fc2": (xavier(ks[4], (2, H)), jnp.zeros((2,), jnp.float32)),
    }


# ----------------------------- pure-JAX reference ----------------------------

def _lstm_ref(x, p):
    w_ih, w_hh, b_ih, b_hh = p
    B = x.shape[0]

    def step(carry, x_t):
        h, c = carry
        gates = x_t @ w_ih.T + b_ih + h @ w_hh.T + b_hh
        i, f, g, o = jnp.split(gates, 4, axis=-1)
        c = jax.nn.sigmoid(f) * c + jax.nn.sigmoid(i) * jnp.tanh(g)
        h = jax.nn.sigmoid(o) * jnp.tanh(c)
        return (h, c), h

    init = (jnp.zeros((B, H), jnp.float32), jnp.zeros((B, H), jnp.float32))
    (h, c), ys = lax.scan(step, init, jnp.swapaxes(x, 0, 1))
    return jnp.swapaxes(ys, 0, 1), (h, c)


def tclstm_fusion_ref(x, params):
    o1, _ = _lstm_ref(x, params["lstm1"])
    o2, _ = _lstm_ref(o1[:, -8:], params["lstm2"])
    o3, (h, c) = _lstm_ref(o2[:, -3:], params["lstm3"])
    fc1_w, fc1_b = params["fc1"]
    fc2_w, fc2_b = params["fc2"]
    inputs2 = jnp.concatenate([o3[:, -1], x[:, -1, -2:]], axis=1)
    y = (inputs2 @ fc1_w.T + fc1_b) @ fc2_w.T + fc2_b
    return y, (h[None], c[None])


# ---------------------------------- main --------------------------------------

if __name__ == "__main__":
    key = jax.random.PRNGKey(0)
    pkey, xkey = jax.random.split(key)
    params = init_params(pkey)

    B, T = 4, 12
    x = jax.random.normal(xkey, (B, T, F_IN), jnp.float32)

    out, (h_n, c_n) = jax.block_until_ready(tclstm_fusion_forward(x, params))

    # sanity-check against a pure-JAX f32 reference of the PyTorch forward.
    # (tolerance accounts for bf16 recurrent-weight matmuls with f32 accumulation)
    ref_out, (ref_h, ref_c) = tclstm_fusion_ref(x, params)
    assert out.shape == (B, 2)
    assert h_n.shape == (1, B, H) and c_n.shape == (1, B, H)
    np.testing.assert_allclose(np.asarray(out), np.asarray(ref_out),
                               rtol=2e-2, atol=2e-2)
    np.testing.assert_allclose(np.asarray(h_n), np.asarray(ref_h),
                               rtol=2e-2, atol=2e-2)
    np.testing.assert_allclose(np.asarray(c_n), np.asarray(ref_c),
                               rtol=2e-2, atol=2e-2)

    print("KERNEL_OK")
</pallas_src>

<mosaic_0001>
module attributes {stable_mosaic.version = 11 : i64} {
  func.func @tclstm_fusion_kernel(%arg0: memref<96x7xf32, #tpu.memory_space<vmem>>, %arg1: memref<8x2xf32, #tpu.memory_space<vmem>>, %arg2: memref<7x256xf32, #tpu.memory_space<vmem>>, %arg3: memref<64x256xbf16, #tpu.memory_space<vmem>>, %arg4: memref<1x256xf32, #tpu.memory_space<vmem>>, %arg5: memref<64x256xf32, #tpu.memory_space<vmem>>, %arg6: memref<64x256xbf16, #tpu.memory_space<vmem>>, %arg7: memref<1x256xf32, #tpu.memory_space<vmem>>, %arg8: memref<64x256xf32, #tpu.memory_space<vmem>>, %arg9: memref<64x256xbf16, #tpu.memory_space<vmem>>, %arg10: memref<1x256xf32, #tpu.memory_space<vmem>>, %arg11: memref<64x64xf32, #tpu.memory_space<vmem>>, %arg12: memref<2x64xf32, #tpu.memory_space<vmem>>, %arg13: memref<1x64xf32, #tpu.memory_space<vmem>>, %arg14: memref<64x2xf32, #tpu.memory_space<vmem>>, %arg15: memref<1x2xf32, #tpu.memory_space<vmem>>, %arg16: memref<8x2xf32, #tpu.memory_space<vmem>>, %arg17: memref<8x64xf32, #tpu.memory_space<vmem>>, %arg18: memref<8x64xf32, #tpu.memory_space<vmem>>) attributes {dimension_semantics = [], scalar_prefetch = 0 : i64, scratch_operands = 0 : i64, tpu.core_type = #tpu.core_type<tc>} {
    %cst = arith.constant 0.000000e+00 : f32
    %0 = vector.broadcast %cst : f32 to vector<8x64xf32>
    %c0 = arith.constant 0 : index
    %c0_0 = arith.constant 0 : index
    %1 = vector.load %arg3[%c0, %c0_0] : memref<64x256xbf16, #tpu.memory_space<vmem>>, vector<64x256xbf16>
    %c0_1 = arith.constant 0 : index
    %c0_2 = arith.constant 0 : index
    %2 = vector.load %arg6[%c0_1, %c0_2] : memref<64x256xbf16, #tpu.memory_space<vmem>>, vector<64x256xbf16>
    %c0_3 = arith.constant 0 : index
    %c0_4 = arith.constant 0 : index
    %3 = vector.load %arg9[%c0_3, %c0_4] : memref<64x256xbf16, #tpu.memory_space<vmem>>, vector<64x256xbf16>
    %c0_5 = arith.constant 0 : index
    %c0_6 = arith.constant 0 : index
    %4 = vector.load %arg0[%c0_5, %c0_6] : memref<96x7xf32, #tpu.memory_space<vmem>>, vector<96x7xf32>
    %c0_7 = arith.constant 0 : index
    %c0_8 = arith.constant 0 : index
    %5 = vector.load %arg2[%c0_7, %c0_8] : memref<7x256xf32, #tpu.memory_space<vmem>>, vector<7x256xf32>
    %cst_9 = arith.constant dense<0.000000e+00> : vector<96x256xf32>
    %6 = tpu.matmul %4, %5, %cst_9 {dimension_numbers = #tpu.dot_dimension_numbers<[1], [0], [0], [1], [0, 0, 1, 1], [], []>} : vector<96x7xf32>, vector<7x256xf32>, vector<96x256xf32> -> vector<96x256xf32>
    %c0_10 = arith.constant 0 : index
    %c0_11 = arith.constant 0 : index
    %7 = vector.load %arg4[%c0_10, %c0_11] : memref<1x256xf32, #tpu.memory_space<vmem>>, vector<1x256xf32>
    %8 = vector.broadcast %7 : vector<1x256xf32> to vector<96x256xf32>
    %9 = arith.addf %6, %8 : vector<96x256xf32>
    %10 = vector.extract_strided_slice %9 {offsets = [0, 0], sizes = [8, 256], strides = [1, 1]} : vector<96x256xf32> to vector<8x256xf32>
    %11 = arith.truncf %0 : vector<8x64xf32> to vector<8x64xbf16>
    %cst_12 = arith.constant dense<0.000000e+00> : vector<8x256xf32>
    %12 = tpu.matmul %11, %1, %cst_12 {dimension_numbers = #tpu.dot_dimension_numbers<[1], [0], [0], [1], [0, 0, 1, 1], [], []>} : vector<8x64xbf16>, vector<64x256xbf16>, vector<8x256xf32> -> vector<8x256xf32>
    %13 = arith.addf %10, %12 : vector<8x256xf32>
    %14 = vector.extract_strided_slice %13 {offsets = [0, 0], sizes = [8, 192], strides = [1, 1]} : vector<8x256xf32> to vector<8x192xf32>
    %15 = arith.negf %14 : vector<8x192xf32>
    %16 = math.exp %15 : vector<8x192xf32>
    %cst_13 = arith.constant 1.000000e+00 : f32
    %17 = vector.broadcast %cst_13 : f32 to vector<8x192xf32>
    %18 = arith.addf %17, %16 : vector<8x192xf32>
    %19 = arith.divf %17, %18 : vector<8x192xf32>
    %20 = vector.extract_strided_slice %19 {offsets = [0, 0], sizes = [8, 64], strides = [1, 1]} : vector<8x192xf32> to vector<8x64xf32>
    %21 = vector.extract_strided_slice %19 {offsets = [0, 64], sizes = [8, 64], strides = [1, 1]} : vector<8x192xf32> to vector<8x64xf32>
    %22 = vector.extract_strided_slice %19 {offsets = [0, 128], sizes = [8, 64], strides = [1, 1]} : vector<8x192xf32> to vector<8x64xf32>
    %23 = vector.extract_strided_slice %13 {offsets = [0, 192], sizes = [8, 64], strides = [1, 1]} : vector<8x256xf32> to vector<8x64xf32>
    %24 = math.tanh %23 : vector<8x64xf32>
    %25 = arith.mulf %21, %0 : vector<8x64xf32>
    %26 = arith.mulf %20, %24 : vector<8x64xf32>
    %27 = arith.addf %25, %26 : vector<8x64xf32>
    %28 = math.tanh %27 : vector<8x64xf32>
    %29 = arith.mulf %22, %28 : vector<8x64xf32>
    %30 = vector.extract_strided_slice %9 {offsets = [8, 0], sizes = [8, 256], strides = [1, 1]} : vector<96x256xf32> to vector<8x256xf32>
    %31 = arith.truncf %29 : vector<8x64xf32> to vector<8x64xbf16>
    %cst_14 = arith.constant dense<0.000000e+00> : vector<8x256xf32>
    %32 = tpu.matmul %31, %1, %cst_14 {dimension_numbers = #tpu.dot_dimension_numbers<[1], [0], [0], [1], [0, 0, 1, 1], [], []>} : vector<8x64xbf16>, vector<64x256xbf16>, vector<8x256xf32> -> vector<8x256xf32>
    %33 = arith.addf %30, %32 : vector<8x256xf32>
    %34 = vector.extract_strided_slice %33 {offsets = [0, 0], sizes = [8, 192], strides = [1, 1]} : vector<8x256xf32> to vector<8x192xf32>
    %35 = arith.negf %34 : vector<8x192xf32>
    %36 = math.exp %35 : vector<8x192xf32>
    %cst_15 = arith.constant 1.000000e+00 : f32
    %37 = vector.broadcast %cst_15 : f32 to vector<8x192xf32>
    %38 = arith.addf %37, %36 : vector<8x192xf32>
    %39 = arith.divf %37, %38 : vector<8x192xf32>
    %40 = vector.extract_strided_slice %39 {offsets = [0, 0], sizes = [8, 64], strides = [1, 1]} : vector<8x192xf32> to vector<8x64xf32>
    %41 = vector.extract_strided_slice %39 {offsets = [0, 64], sizes = [8, 64], strides = [1, 1]} : vector<8x192xf32> to vector<8x64xf32>
    %42 = vector.extract_strided_slice %39 {offsets = [0, 128], sizes = [8, 64], strides = [1, 1]} : vector<8x192xf32> to vector<8x64xf32>
    %43 = vector.extract_strided_slice %33 {offsets = [0, 192], sizes = [8, 64], strides = [1, 1]} : vector<8x256xf32> to vector<8x64xf32>
    %44 = math.tanh %43 : vector<8x64xf32>
    %45 = arith.mulf %41, %27 : vector<8x64xf32>
    %46 = arith.mulf %40, %44 : vector<8x64xf32>
    %47 = arith.addf %45, %46 : vector<8x64xf32>
    %48 = math.tanh %47 : vector<8x64xf32>
    %49 = arith.mulf %42, %48 : vector<8x64xf32>
    %50 = vector.extract_strided_slice %9 {offsets = [16, 0], sizes = [8, 256], strides = [1, 1]} : vector<96x256xf32> to vector<8x256xf32>
    %51 = arith.truncf %49 : vector<8x64xf32> to vector<8x64xbf16>
    %cst_16 = arith.constant dense<0.000000e+00> : vector<8x256xf32>
    %52 = tpu.matmul %51, %1, %cst_16 {dimension_numbers = #tpu.dot_dimension_numbers<[1], [0], [0], [1], [0, 0, 1, 1], [], []>} : vector<8x64xbf16>, vector<64x256xbf16>, vector<8x256xf32> -> vector<8x256xf32>
    %53 = arith.addf %50, %52 : vector<8x256xf32>
    %54 = vector.extract_strided_slice %53 {offsets = [0, 0], sizes = [8, 192], strides = [1, 1]} : vector<8x256xf32> to vector<8x192xf32>
    %55 = arith.negf %54 : vector<8x192xf32>
    %56 = math.exp %55 : vector<8x192xf32>
    %cst_17 = arith.constant 1.000000e+00 : f32
    %57 = vector.broadcast %cst_17 : f32 to vector<8x192xf32>
    %58 = arith.addf %57, %56 : vector<8x192xf32>
    %59 = arith.divf %57, %58 : vector<8x192xf32>
    %60 = vector.extract_strided_slice %59 {offsets = [0, 0], sizes = [8, 64], strides = [1, 1]} : vector<8x192xf32> to vector<8x64xf32>
    %61 = vector.extract_strided_slice %59 {offsets = [0, 64], sizes = [8, 64], strides = [1, 1]} : vector<8x192xf32> to vector<8x64xf32>
    %62 = vector.extract_strided_slice %59 {offsets = [0, 128], sizes = [8, 64], strides = [1, 1]} : vector<8x192xf32> to vector<8x64xf32>
    %63 = vector.extract_strided_slice %53 {offsets = [0, 192], sizes = [8, 64], strides = [1, 1]} : vector<8x256xf32> to vector<8x64xf32>
    %64 = math.tanh %63 : vector<8x64xf32>
    %65 = arith.mulf %61, %47 : vector<8x64xf32>
    %66 = arith.mulf %60, %64 : vector<8x64xf32>
    %67 = arith.addf %65, %66 : vector<8x64xf32>
    %68 = math.tanh %67 : vector<8x64xf32>
    %69 = arith.mulf %62, %68 : vector<8x64xf32>
    %70 = vector.extract_strided_slice %9 {offsets = [24, 0], sizes = [8, 256], strides = [1, 1]} : vector<96x256xf32> to vector<8x256xf32>
    %71 = arith.truncf %69 : vector<8x64xf32> to vector<8x64xbf16>
    %cst_18 = arith.constant dense<0.000000e+00> : vector<8x256xf32>
    %72 = tpu.matmul %71, %1, %cst_18 {dimension_numbers = #tpu.dot_dimension_numbers<[1], [0], [0], [1], [0, 0, 1, 1], [], []>} : vector<8x64xbf16>, vector<64x256xbf16>, vector<8x256xf32> -> vector<8x256xf32>
    %73 = arith.addf %70, %72 : vector<8x256xf32>
    %74 = vector.extract_strided_slice %73 {offsets = [0, 0], sizes = [8, 192], strides = [1, 1]} : vector<8x256xf32> to vector<8x192xf32>
    %75 = arith.negf %74 : vector<8x192xf32>
    %76 = math.exp %75 : vector<8x192xf32>
    %cst_19 = arith.constant 1.000000e+00 : f32
    %77 = vector.broadcast %cst_19 : f32 to vector<8x192xf32>
    %78 = arith.addf %77, %76 : vector<8x192xf32>
    %79 = arith.divf %77, %78 : vector<8x192xf32>
    %80 = vector.extract_strided_slice %79 {offsets = [0, 0], sizes = [8, 64], strides = [1, 1]} : vector<8x192xf32> to vector<8x64xf32>
    %81 = vector.extract_strided_slice %79 {offsets = [0, 64], sizes = [8, 64], strides = [1, 1]} : vector<8x192xf32> to vector<8x64xf32>
    %82 = vector.extract_strided_slice %79 {offsets = [0, 128], sizes = [8, 64], strides = [1, 1]} : vector<8x192xf32> to vector<8x64xf32>
    %83 = vector.extract_strided_slice %73 {offsets = [0, 192], sizes = [8, 64], strides = [1, 1]} : vector<8x256xf32> to vector<8x64xf32>
    %84 = math.tanh %83 : vector<8x64xf32>
    %85 = arith.mulf %81, %67 : vector<8x64xf32>
    %86 = arith.mulf %80, %84 : vector<8x64xf32>
    %87 = arith.addf %85, %86 : vector<8x64xf32>
    %88 = math.tanh %87 : vector<8x64xf32>
    %89 = arith.mulf %82, %88 : vector<8x64xf32>
    %90 = vector.extract_strided_slice %9 {offsets = [32, 0], sizes = [8, 256], strides = [1, 1]} : vector<96x256xf32> to vector<8x256xf32>
    %91 = arith.truncf %89 : vector<8x64xf32> to vector<8x64xbf16>
    %cst_20 = arith.constant dense<0.000000e+00> : vector<8x256xf32>
    %92 = tpu.matmul %91, %1, %cst_20 {dimension_numbers = #tpu.dot_dimension_numbers<[1], [0], [0], [1], [0, 0, 1, 1], [], []>} : vector<8x64xbf16>, vector<64x256xbf16>, vector<8x256xf32> -> vector<8x256xf32>
    %93 = arith.addf %90, %92 : vector<8x256xf32>
    %94 = vector.extract_strided_slice %93 {offsets = [0, 0], sizes = [8, 192], strides = [1, 1]} : vector<8x256xf32> to vector<8x192xf32>
    %95 = arith.negf %94 : vector<8x192xf32>
    %96 = math.exp %95 : vector<8x192xf32>
    %cst_21 = arith.constant 1.000000e+00 : f32
    %97 = vector.broadcast %cst_21 : f32 to vector<8x192xf32>
    %98 = arith.addf %97, %96 : vector<8x192xf32>
    %99 = arith.divf %97, %98 : vector<8x192xf32>
    %100 = vector.extract_strided_slice %99 {offsets = [0, 0], sizes = [8, 64], strides = [1, 1]} : vector<8x192xf32> to vector<8x64xf32>
    %101 = vector.extract_strided_slice %99 {offsets = [0, 64], sizes = [8, 64], strides = [1, 1]} : vector<8x192xf32> to vector<8x64xf32>
    %102 = vector.extract_strided_slice %99 {offsets = [0, 128], sizes = [8, 64], strides = [1, 1]} : vector<8x192xf32> to vector<8x64xf32>
    %103 = vector.extract_strided_slice %93 {offsets = [0, 192], sizes = [8, 64], strides = [1, 1]} : vector<8x256xf32> to vector<8x64xf32>
    %104 = math.tanh %103 : vector<8x64xf32>
    %105 = arith.mulf %101, %87 : vector<8x64xf32>
    %106 = arith.mulf %100, %104 : vector<8x64xf32>
    %107 = arith.addf %105, %106 : vector<8x64xf32>
    %108 = math.tanh %107 : vector<8x64xf32>
    %109 = arith.mulf %102, %108 : vector<8x64xf32>
    %110 = vector.extract_strided_slice %9 {offsets = [40, 0], sizes = [8, 256], strides = [1, 1]} : vector<96x256xf32> to vector<8x256xf32>
    %111 = arith.truncf %109 : vector<8x64xf32> to vector<8x64xbf16>
    %cst_22 = arith.constant dense<0.000000e+00> : vector<8x256xf32>
    %112 = tpu.matmul %111, %1, %cst_22 {dimension_numbers = #tpu.dot_dimension_numbers<[1], [0], [0], [1], [0, 0, 1, 1], [], []>} : vector<8x64xbf16>, vector<64x256xbf16>, vector<8x256xf32> -> vector<8x256xf32>
    %113 = arith.addf %110, %112 : vector<8x256xf32>
    %114 = vector.extract_strided_slice %113 {offsets = [0, 0], sizes = [8, 192], strides = [1, 1]} : vector<8x256xf32> to vector<8x192xf32>
    %115 = arith.negf %114 : vector<8x192xf32>
    %116 = math.exp %115 : vector<8x192xf32>
    %cst_23 = arith.constant 1.000000e+00 : f32
    %117 = vector.broadcast %cst_23 : f32 to vector<8x192xf32>
    %118 = arith.addf %117, %116 : vector<8x192xf32>
    %119 = arith.divf %117, %118 : vector<8x192xf32>
    %120 = vector.extract_strided_slice %119 {offsets = [0, 0], sizes = [8, 64], strides = [1, 1]} : vector<8x192xf32> to vector<8x64xf32>
    %121 = vector.extract_strided_slice %119 {offsets = [0, 64], sizes = [8, 64], strides = [1, 1]} : vector<8x192xf32> to vector<8x64xf32>
    %122 = vector.extract_strided_slice %119 {offsets = [0, 128], sizes = [8, 64], strides = [1, 1]} : vector<8x192xf32> to vector<8x64xf32>
    %123 = vector.extract_strided_slice %113 {offsets = [0, 192], sizes = [8, 64], strides = [1, 1]} : vector<8x256xf32> to vector<8x64xf32>
    %124 = math.tanh %123 : vector<8x64xf32>
    %125 = arith.mulf %121, %107 : vector<8x64xf32>
    %126 = arith.mulf %120, %124 : vector<8x64xf32>
    %127 = arith.addf %125, %126 : vector<8x64xf32>
    %128 = math.tanh %127 : vector<8x64xf32>
    %129 = arith.mulf %122, %128 : vector<8x64xf32>
    %130 = vector.extract_strided_slice %9 {offsets = [48, 0], sizes = [8, 256], strides = [1, 1]} : vector<96x256xf32> to vector<8x256xf32>
    %131 = arith.truncf %129 : vector<8x64xf32> to vector<8x64xbf16>
    %cst_24 = arith.constant dense<0.000000e+00> : vector<8x256xf32>
    %132 = tpu.matmul %131, %1, %cst_24 {dimension_numbers = #tpu.dot_dimension_numbers<[1], [0], [0], [1], [0, 0, 1, 1], [], []>} : vector<8x64xbf16>, vector<64x256xbf16>, vector<8x256xf32> -> vector<8x256xf32>
    %133 = arith.addf %130, %132 : vector<8x256xf32>
    %134 = vector.extract_strided_slice %133 {offsets = [0, 0], sizes = [8, 192], strides = [1, 1]} : vector<8x256xf32> to vector<8x192xf32>
    %135 = arith.negf %134 : vector<8x192xf32>
    %136 = math.exp %135 : vector<8x192xf32>
    %cst_25 = arith.constant 1.000000e+00 : f32
    %137 = vector.broadcast %cst_25 : f32 to vector<8x192xf32>
    %138 = arith.addf %137, %136 : vector<8x192xf32>
    %139 = arith.divf %137, %138 : vector<8x192xf32>
    %140 = vector.extract_strided_slice %139 {offsets = [0, 0], sizes = [8, 64], strides = [1, 1]} : vector<8x192xf32> to vector<8x64xf32>
    %141 = vector.extract_strided_slice %139 {offsets = [0, 64], sizes = [8, 64], strides = [1, 1]} : vector<8x192xf32> to vector<8x64xf32>
    %142 = vector.extract_strided_slice %139 {offsets = [0, 128], sizes = [8, 64], strides = [1, 1]} : vector<8x192xf32> to vector<8x64xf32>
    %143 = vector.extract_strided_slice %133 {offsets = [0, 192], sizes = [8, 64], strides = [1, 1]} : vector<8x256xf32> to vector<8x64xf32>
    %144 = math.tanh %143 : vector<8x64xf32>
    %145 = arith.mulf %141, %127 : vector<8x64xf32>
    %146 = arith.mulf %140, %144 : vector<8x64xf32>
    %147 = arith.addf %145, %146 : vector<8x64xf32>
    %148 = math.tanh %147 : vector<8x64xf32>
    %149 = arith.mulf %142, %148 : vector<8x64xf32>
    %150 = vector.extract_strided_slice %9 {offsets = [56, 0], sizes = [8, 256], strides = [1, 1]} : vector<96x256xf32> to vector<8x256xf32>
    %151 = arith.truncf %149 : vector<8x64xf32> to vector<8x64xbf16>
    %cst_26 = arith.constant dense<0.000000e+00> : vector<8x256xf32>
    %152 = tpu.matmul %151, %1, %cst_26 {dimension_numbers = #tpu.dot_dimension_numbers<[1], [0], [0], [1], [0, 0, 1, 1], [], []>} : vector<8x64xbf16>, vector<64x256xbf16>, vector<8x256xf32> -> vector<8x256xf32>
    %153 = arith.addf %150, %152 : vector<8x256xf32>
    %154 = vector.extract_strided_slice %153 {offsets = [0, 0], sizes = [8, 192], strides = [1, 1]} : vector<8x256xf32> to vector<8x192xf32>
    %155 = arith.negf %154 : vector<8x192xf32>
    %156 = math.exp %155 : vector<8x192xf32>
    %cst_27 = arith.constant 1.000000e+00 : f32
    %157 = vector.broadcast %cst_27 : f32 to vector<8x192xf32>
    %158 = arith.addf %157, %156 : vector<8x192xf32>
    %159 = arith.divf %157, %158 : vector<8x192xf32>
    %160 = vector.extract_strided_slice %159 {offsets = [0, 0], sizes = [8, 64], strides = [1, 1]} : vector<8x192xf32> to vector<8x64xf32>
    %161 = vector.extract_strided_slice %159 {offsets = [0, 64], sizes = [8, 64], strides = [1, 1]} : vector<8x192xf32> to vector<8x64xf32>
    %162 = vector.extract_strided_slice %159 {offsets = [0, 128], sizes = [8, 64], strides = [1, 1]} : vector<8x192xf32> to vector<8x64xf32>
    %163 = vector.extract_strided_slice %153 {offsets = [0, 192], sizes = [8, 64], strides = [1, 1]} : vector<8x256xf32> to vector<8x64xf32>
    %164 = math.tanh %163 : vector<8x64xf32>
    %165 = arith.mulf %161, %147 : vector<8x64xf32>
    %166 = arith.mulf %160, %164 : vector<8x64xf32>
    %167 = arith.addf %165, %166 : vector<8x64xf32>
    %168 = math.tanh %167 : vector<8x64xf32>
    %169 = arith.mulf %162, %168 : vector<8x64xf32>
    %170 = vector.extract_strided_slice %9 {offsets = [64, 0], sizes = [8, 256], strides = [1, 1]} : vector<96x256xf32> to vector<8x256xf32>
    %171 = arith.truncf %169 : vector<8x64xf32> to vector<8x64xbf16>
    %cst_28 = arith.constant dense<0.000000e+00> : vector<8x256xf32>
    %172 = tpu.matmul %171, %1, %cst_28 {dimension_numbers = #tpu.dot_dimension_numbers<[1], [0], [0], [1], [0, 0, 1, 1], [], []>} : vector<8x64xbf16>, vector<64x256xbf16>, vector<8x256xf32> -> vector<8x256xf32>
    %173 = arith.addf %170, %172 : vector<8x256xf32>
    %174 = vector.extract_strided_slice %173 {offsets = [0, 0], sizes = [8, 192], strides = [1, 1]} : vector<8x256xf32> to vector<8x192xf32>
    %175 = arith.negf %174 : vector<8x192xf32>
    %176 = math.exp %175 : vector<8x192xf32>
    %cst_29 = arith.constant 1.000000e+00 : f32
    %177 = vector.broadcast %cst_29 : f32 to vector<8x192xf32>
    %178 = arith.addf %177, %176 : vector<8x192xf32>
    %179 = arith.divf %177, %178 : vector<8x192xf32>
    %180 = vector.extract_strided_slice %179 {offsets = [0, 0], sizes = [8, 64], strides = [1, 1]} : vector<8x192xf32> to vector<8x64xf32>
    %181 = vector.extract_strided_slice %179 {offsets = [0, 64], sizes = [8, 64], strides = [1, 1]} : vector<8x192xf32> to vector<8x64xf32>
    %182 = vector.extract_strided_slice %179 {offsets = [0, 128], sizes = [8, 64], strides = [1, 1]} : vector<8x192xf32> to vector<8x64xf32>
    %183 = vector.extract_strided_slice %173 {offsets = [0, 192], sizes = [8, 64], strides = [1, 1]} : vector<8x256xf32> to vector<8x64xf32>
    %184 = math.tanh %183 : vector<8x64xf32>
    %185 = arith.mulf %181, %167 : vector<8x64xf32>
    %186 = arith.mulf %180, %184 : vector<8x64xf32>
    %187 = arith.addf %185, %186 : vector<8x64xf32>
    %188 = math.tanh %187 : vector<8x64xf32>
    %189 = arith.mulf %182, %188 : vector<8x64xf32>
    %190 = vector.extract_strided_slice %9 {offsets = [72, 0], sizes = [8, 256], strides = [1, 1]} : vector<96x256xf32> to vector<8x256xf32>
    %191 = arith.truncf %189 : vector<8x64xf32> to vector<8x64xbf16>
    %cst_30 = arith.constant dense<0.000000e+00> : vector<8x256xf32>
    %192 = tpu.matmul %191, %1, %cst_30 {dimension_numbers = #tpu.dot_dimension_numbers<[1], [0], [0], [1], [0, 0, 1, 1], [], []>} : vector<8x64xbf16>, vector<64x256xbf16>, vector<8x256xf32> -> vector<8x256xf32>
    %193 = arith.addf %190, %192 : vector<8x256xf32>
    %194 = vector.extract_strided_slice %193 {offsets = [0, 0], sizes = [8, 192], strides = [1, 1]} : vector<8x256xf32> to vector<8x192xf32>
    %195 = arith.negf %194 : vector<8x192xf32>
    %196 = math.exp %195 : vector<8x192xf32>
    %cst_31 = arith.constant 1.000000e+00 : f32
    %197 = vector.broadcast %cst_31 : f32 to vector<8x192xf32>
    %198 = arith.addf %197, %196 : vector<8x192xf32>
    %199 = arith.divf %197, %198 : vector<8x192xf32>
    %200 = vector.extract_strided_slice %199 {offsets = [0, 0], sizes = [8, 64], strides = [1, 1]} : vector<8x192xf32> to vector<8x64xf32>
    %201 = vector.extract_strided_slice %199 {offsets = [0, 64], sizes = [8, 64], strides = [1, 1]} : vector<8x192xf32> to vector<8x64xf32>
    %202 = vector.extract_strided_slice %199 {offsets = [0, 128], sizes = [8, 64], strides = [1, 1]} : vector<8x192xf32> to vector<8x64xf32>
    %203 = vector.extract_strided_slice %193 {offsets = [0, 192], sizes = [8, 64], strides = [1, 1]} : vector<8x256xf32> to vector<8x64xf32>
    %204 = math.tanh %203 : vector<8x64xf32>
    %205 = arith.mulf %201, %187 : vector<8x64xf32>
    %206 = arith.mulf %200, %204 : vector<8x64xf32>
    %207 = arith.addf %205, %206 : vector<8x64xf32>
    %208 = math.tanh %207 : vector<8x64xf32>
    %209 = arith.mulf %202, %208 : vector<8x64xf32>
    %210 = vector.extract_strided_slice %9 {offsets = [80, 0], sizes = [8, 256], strides = [1, 1]} : vector<96x256xf32> to vector<8x256xf32>
    %211 = arith.truncf %209 : vector<8x64xf32> to vector<8x64xbf16>
    %cst_32 = arith.constant dense<0.000000e+00> : vector<8x256xf32>
    %212 = tpu.matmul %211, %1, %cst_32 {dimension_numbers = #tpu.dot_dimension_numbers<[1], [0], [0], [1], [0, 0, 1, 1], [], []>} : vector<8x64xbf16>, vector<64x256xbf16>, vector<8x256xf32> -> vector<8x256xf32>
    %213 = arith.addf %210, %212 : vector<8x256xf32>
    %214 = vector.extract_strided_slice %213 {offsets = [0, 0], sizes = [8, 192], strides = [1, 1]} : vector<8x256xf32> to vector<8x192xf32>
    %215 = arith.negf %214 : vector<8x192xf32>
    %216 = math.exp %215 : vector<8x192xf32>
    %cst_33 = arith.constant 1.000000e+00 : f32
    %217 = vector.broadcast %cst_33 : f32 to vector<8x192xf32>
    %218 = arith.addf %217, %216 : vector<8x192xf32>
    %219 = arith.divf %217, %218 : vector<8x192xf32>
    %220 = vector.extract_strided_slice %219 {offsets = [0, 0], sizes = [8, 64], strides = [1, 1]} : vector<8x192xf32> to vector<8x64xf32>
    %221 = vector.extract_strided_slice %219 {offsets = [0, 64], sizes = [8, 64], strides = [1, 1]} : vector<8x192xf32> to vector<8x64xf32>
    %222 = vector.extract_strided_slice %219 {offsets = [0, 128], sizes = [8, 64], strides = [1, 1]} : vector<8x192xf32> to vector<8x64xf32>
    %223 = vector.extract_strided_slice %213 {offsets = [0, 192], sizes = [8, 64], strides = [1, 1]} : vector<8x256xf32> to vector<8x64xf32>
    %224 = math.tanh %223 : vector<8x64xf32>
    %225 = arith.mulf %221, %207 : vector<8x64xf32>
    %226 = arith.mulf %220, %224 : vector<8x64xf32>
    %227 = arith.addf %225, %226 : vector<8x64xf32>
    %228 = math.tanh %227 : vector<8x64xf32>
    %229 = arith.mulf %222, %228 : vector<8x64xf32>
    %230 = vector.extract_strided_slice %9 {offsets = [88, 0], sizes = [8, 256], strides = [1, 1]} : vector<96x256xf32> to vector<8x256xf32>
    %231 = arith.truncf %229 : vector<8x64xf32> to vector<8x64xbf16>
    %cst_34 = arith.constant dense<0.000000e+00> : vector<8x256xf32>
    %232 = tpu.matmul %231, %1, %cst_34 {dimension_numbers = #tpu.dot_dimension_numbers<[1], [0], [0], [1], [0, 0, 1, 1], [], []>} : vector<8x64xbf16>, vector<64x256xbf16>, vector<8x256xf32> -> vector<8x256xf32>
    %233 = arith.addf %230, %232 : vector<8x256xf32>
    %234 = vector.extract_strided_slice %233 {offsets = [0, 0], sizes = [8, 192], strides = [1, 1]} : vector<8x256xf32> to vector<8x192xf32>
    %235 = arith.negf %234 : vector<8x192xf32>
    %236 = math.exp %235 : vector<8x192xf32>
    %cst_35 = arith.constant 1.000000e+00 : f32
    %237 = vector.broadcast %cst_35 : f32 to vector<8x192xf32>
    %238 = arith.addf %237, %236 : vector<8x192xf32>
    %239 = arith.divf %237, %238 : vector<8x192xf32>
    %240 = vector.extract_strided_slice %239 {offsets = [0, 0], sizes = [8, 64], strides = [1, 1]} : vector<8x192xf32> to vector<8x64xf32>
    %241 = vector.extract_strided_slice %239 {offsets = [0, 64], sizes = [8, 64], strides = [1, 1]} : vector<8x192xf32> to vector<8x64xf32>
    %242 = vector.extract_strided_slice %239 {offsets = [0, 128], sizes = [8, 64], strides = [1, 1]} : vector<8x192xf32> to vector<8x64xf32>
    %243 = vector.extract_strided_slice %233 {offsets = [0, 192], sizes = [8, 64], strides = [1, 1]} : vector<8x256xf32> to vector<8x64xf32>
    %244 = math.tanh %243 : vector<8x64xf32>
    %245 = arith.mulf %241, %227 : vector<8x64xf32>
    %246 = arith.mulf %240, %244 : vector<8x64xf32>
    %247 = arith.addf %245, %246 : vector<8x64xf32>
    %248 = math.tanh %247 : vector<8x64xf32>
    %249 = arith.mulf %242, %248 : vector<8x64xf32>
    %250 = tpu.concatenate %109, %129, %149, %169, %189, %209, %229, %249 in 0 : vector<8x64xf32>, vector<8x64xf32>, vector<8x64xf32>, vector<8x64xf32>, vector<8x64xf32>, vector<8x64xf32>, vector<8x64xf32>, vector<8x64xf32> -> vector<64x64xf32>
    %c0_36 = arith.constant 0 : index
    %c0_37 = arith.constant 0 : index
    %251 = vector.load %arg5[%c0_36, %c0_37] : memref<64x256xf32, #tpu.memory_space<vmem>>, vector<64x256xf32>
    %cst_38 = arith.constant dense<0.000000e+00> : vector<64x256xf32>
    %252 = tpu.matmul %250, %251, %cst_38 {dimension_numbers = #tpu.dot_dimension_numbers<[1], [0], [0], [1], [0, 0, 1, 1], [], []>} : vector<64x64xf32>, vector<64x256xf32>, vector<64x256xf32> -> vector<64x256xf32>
    %c0_39 = arith.constant 0 : index
    %c0_40 = arith.constant 0 : index
    %253 = vector.load %arg7[%c0_39, %c0_40] : memref<1x256xf32, #tpu.memory_space<vmem>>, vector<1x256xf32>
    %254 = vector.broadcast %253 : vector<1x256xf32> to vector<64x256xf32>
    %255 = arith.addf %252, %254 : vector<64x256xf32>
    %256 = vector.extract_strided_slice %255 {offsets = [0, 0], sizes = [8, 256], strides = [1, 1]} : vector<64x256xf32> to vector<8x256xf32>
    %257 = arith.truncf %0 : vector<8x64xf32> to vector<8x64xbf16>
    %cst_41 = arith.constant dense<0.000000e+00> : vector<8x256xf32>
    %258 = tpu.matmul %257, %2, %cst_41 {dimension_numbers = #tpu.dot_dimension_numbers<[1], [0], [0], [1], [0, 0, 1, 1], [], []>} : vector<8x64xbf16>, vector<64x256xbf16>, vector<8x256xf32> -> vector<8x256xf32>
    %259 = arith.addf %256, %258 : vector<8x256xf32>
    %260 = vector.extract_strided_slice %259 {offsets = [0, 0], sizes = [8, 192], strides = [1, 1]} : vector<8x256xf32> to vector<8x192xf32>
    %261 = arith.negf %260 : vector<8x192xf32>
    %262 = math.exp %261 : vector<8x192xf32>
    %cst_42 = arith.constant 1.000000e+00 : f32
    %263 = vector.broadcast %cst_42 : f32 to vector<8x192xf32>
    %264 = arith.addf %263, %262 : vector<8x192xf32>
    %265 = arith.divf %263, %264 : vector<8x192xf32>
    %266 = vector.extract_strided_slice %265 {offsets = [0, 0], sizes = [8, 64], strides = [1, 1]} : vector<8x192xf32> to vector<8x64xf32>
    %267 = vector.extract_strided_slice %265 {offsets = [0, 64], sizes = [8, 64], strides = [1, 1]} : vector<8x192xf32> to vector<8x64xf32>
    %268 = vector.extract_strided_slice %265 {offsets = [0, 128], sizes = [8, 64], strides = [1, 1]} : vector<8x192xf32> to vector<8x64xf32>
    %269 = vector.extract_strided_slice %259 {offsets = [0, 192], sizes = [8, 64], strides = [1, 1]} : vector<8x256xf32> to vector<8x64xf32>
    %270 = math.tanh %269 : vector<8x64xf32>
    %271 = arith.mulf %267, %0 : vector<8x64xf32>
    %272 = arith.mulf %266, %270 : vector<8x64xf32>
    %273 = arith.addf %271, %272 : vector<8x64xf32>
    %274 = math.tanh %273 : vector<8x64xf32>
    %275 = arith.mulf %268, %274 : vector<8x64xf32>
    %276 = vector.extract_strided_slice %255 {offsets = [8, 0], sizes = [8, 256], strides = [1, 1]} : vector<64x256xf32> to vector<8x256xf32>
    %277 = arith.truncf %275 : vector<8x64xf32> to vector<8x64xbf16>
    %cst_43 = arith.constant dense<0.000000e+00> : vector<8x256xf32>
    %278 = tpu.matmul %277, %2, %cst_43 {dimension_numbers = #tpu.dot_dimension_numbers<[1], [0], [0], [1], [0, 0, 1, 1], [], []>} : vector<8x64xbf16>, vector<64x256xbf16>, vector<8x256xf32> -> vector<8x256xf32>
    %279 = arith.addf %276, %278 : vector<8x256xf32>
    %280 = vector.extract_strided_slice %279 {offsets = [0, 0], sizes = [8, 192], strides = [1, 1]} : vector<8x256xf32> to vector<8x192xf32>
    %281 = arith.negf %280 : vector<8x192xf32>
    %282 = math.exp %281 : vector<8x192xf32>
    %cst_44 = arith.constant 1.000000e+00 : f32
    %283 = vector.broadcast %cst_44 : f32 to vector<8x192xf32>
    %284 = arith.addf %283, %282 : vector<8x192xf32>
    %285 = arith.divf %283, %284 : vector<8x192xf32>
    %286 = vector.extract_strided_slice %285 {offsets = [0, 0], sizes = [8, 64], strides = [1, 1]} : vector<8x192xf32> to vector<8x64xf32>
    %287 = vector.extract_strided_slice %285 {offsets = [0, 64], sizes = [8, 64], strides = [1, 1]} : vector<8x192xf32> to vector<8x64xf32>
    %288 = vector.extract_strided_slice %285 {offsets = [0, 128], sizes = [8, 64], strides = [1, 1]} : vector<8x192xf32> to vector<8x64xf32>
    %289 = vector.extract_strided_slice %279 {offsets = [0, 192], sizes = [8, 64], strides = [1, 1]} : vector<8x256xf32> to vector<8x64xf32>
    %290 = math.tanh %289 : vector<8x64xf32>
    %291 = arith.mulf %287, %273 : vector<8x64xf32>
    %292 = arith.mulf %286, %290 : vector<8x64xf32>
    %293 = arith.addf %291, %292 : vector<8x64xf32>
    %294 = math.tanh %293 : vector<8x64xf32>
    %295 = arith.mulf %288, %294 : vector<8x64xf32>
    %296 = vector.extract_strided_slice %255 {offsets = [16, 0], sizes = [8, 256], strides = [1, 1]} : vector<64x256xf32> to vector<8x256xf32>
    %297 = arith.truncf %295 : vector<8x64xf32> to vector<8x64xbf16>
    %cst_45 = arith.constant dense<0.000000e+00> : vector<8x256xf32>
    %298 = tpu.matmul %297, %2, %cst_45 {dimension_numbers = #tpu.dot_dimension_numbers<[1], [0], [0], [1], [0, 0, 1, 1], [], []>} : vector<8x64xbf16>, vector<64x256xbf16>, vector<8x256xf32> -> vector<8x256xf32>
    %299 = arith.addf %296, %298 : vector<8x256xf32>
    %300 = vector.extract_strided_slice %299 {offsets = [0, 0], sizes = [8, 192], strides = [1, 1]} : vector<8x256xf32> to vector<8x192xf32>
    %301 = arith.negf %300 : vector<8x192xf32>
    %302 = math.exp %301 : vector<8x192xf32>
    %cst_46 = arith.constant 1.000000e+00 : f32
    %303 = vector.broadcast %cst_46 : f32 to vector<8x192xf32>
    %304 = arith.addf %303, %302 : vector<8x192xf32>
    %305 = arith.divf %303, %304 : vector<8x192xf32>
    %306 = vector.extract_strided_slice %305 {offsets = [0, 0], sizes = [8, 64], strides = [1, 1]} : vector<8x192xf32> to vector<8x64xf32>
    %307 = vector.extract_strided_slice %305 {offsets = [0, 64], sizes = [8, 64], strides = [1, 1]} : vector<8x192xf32> to vector<8x64xf32>
    %308 = vector.extract_strided_slice %305 {offsets = [0, 128], sizes = [8, 64], strides = [1, 1]} : vector<8x192xf32> to vector<8x64xf32>
    %309 = vector.extract_strided_slice %299 {offsets = [0, 192], sizes = [8, 64], strides = [1, 1]} : vector<8x256xf32> to vector<8x64xf32>
    %310 = math.tanh %309 : vector<8x64xf32>
    %311 = arith.mulf %307, %293 : vector<8x64xf32>
    %312 = arith.mulf %306, %310 : vector<8x64xf32>
    %313 = arith.addf %311, %312 : vector<8x64xf32>
    %314 = math.tanh %313 : vector<8x64xf32>
    %315 = arith.mulf %308, %314 : vector<8x64xf32>
    %316 = vector.extract_strided_slice %255 {offsets = [24, 0], sizes = [8, 256], strides = [1, 1]} : vector<64x256xf32> to vector<8x256xf32>
    %317 = arith.truncf %315 : vector<8x64xf32> to vector<8x64xbf16>
    %cst_47 = arith.constant dense<0.000000e+00> : vector<8x256xf32>
    %318 = tpu.matmul %317, %2, %cst_47 {dimension_numbers = #tpu.dot_dimension_numbers<[1], [0], [0], [1], [0, 0, 1, 1], [], []>} : vector<8x64xbf16>, vector<64x256xbf16>, vector<8x256xf32> -> vector<8x256xf32>
    %319 = arith.addf %316, %318 : vector<8x256xf32>
    %320 = vector.extract_strided_slice %319 {offsets = [0, 0], sizes = [8, 192], strides = [1, 1]} : vector<8x256xf32> to vector<8x192xf32>
    %321 = arith.negf %320 : vector<8x192xf32>
    %322 = math.exp %321 : vector<8x192xf32>
    %cst_48 = arith.constant 1.000000e+00 : f32
    %323 = vector.broadcast %cst_48 : f32 to vector<8x192xf32>
    %324 = arith.addf %323, %322 : vector<8x192xf32>
    %325 = arith.divf %323, %324 : vector<8x192xf32>
    %326 = vector.extract_strided_slice %325 {offsets = [0, 0], sizes = [8, 64], strides = [1, 1]} : vector<8x192xf32> to vector<8x64xf32>
    %327 = vector.extract_strided_slice %325 {offsets = [0, 64], sizes = [8, 64], strides = [1, 1]} : vector<8x192xf32> to vector<8x64xf32>
    %328 = vector.extract_strided_slice %325 {offsets = [0, 128], sizes = [8, 64], strides = [1, 1]} : vector<8x192xf32> to vector<8x64xf32>
    %329 = vector.extract_strided_slice %319 {offsets = [0, 192], sizes = [8, 64], strides = [1, 1]} : vector<8x256xf32> to vector<8x64xf32>
    %330 = math.tanh %329 : vector<8x64xf32>
    %331 = arith.mulf %327, %313 : vector<8x64xf32>
    %332 = arith.mulf %326, %330 : vector<8x64xf32>
    %333 = arith.addf %331, %332 : vector<8x64xf32>
    %334 = math.tanh %333 : vector<8x64xf32>
    %335 = arith.mulf %328, %334 : vector<8x64xf32>
    %336 = vector.extract_strided_slice %255 {offsets = [32, 0], sizes = [8, 256], strides = [1, 1]} : vector<64x256xf32> to vector<8x256xf32>
    %337 = arith.truncf %335 : vector<8x64xf32> to vector<8x64xbf16>
    %cst_49 = arith.constant dense<0.000000e+00> : vector<8x256xf32>
    %338 = tpu.matmul %337, %2, %cst_49 {dimension_numbers = #tpu.dot_dimension_numbers<[1], [0], [0], [1], [0, 0, 1, 1], [], []>} : vector<8x64xbf16>, vector<64x256xbf16>, vector<8x256xf32> -> vector<8x256xf32>
    %339 = arith.addf %336, %338 : vector<8x256xf32>
    %340 = vector.extract_strided_slice %339 {offsets = [0, 0], sizes = [8, 192], strides = [1, 1]} : vector<8x256xf32> to vector<8x192xf32>
    %341 = arith.negf %340 : vector<8x192xf32>
    %342 = math.exp %341 : vector<8x192xf32>
    %cst_50 = arith.constant 1.000000e+00 : f32
    %343 = vector.broadcast %cst_50 : f32 to vector<8x192xf32>
    %344 = arith.addf %343, %342 : vector<8x192xf32>
    %345 = arith.divf %343, %344 : vector<8x192xf32>
    %346 = vector.extract_strided_slice %345 {offsets = [0, 0], sizes = [8, 64], strides = [1, 1]} : vector<8x192xf32> to vector<8x64xf32>
    %347 = vector.extract_strided_slice %345 {offsets = [0, 64], sizes = [8, 64], strides = [1, 1]} : vector<8x192xf32> to vector<8x64xf32>
    %348 = vector.extract_strided_slice %345 {offsets = [0, 128], sizes = [8, 64], strides = [1, 1]} : vector<8x192xf32> to vector<8x64xf32>
    %349 = vector.extract_strided_slice %339 {offsets = [0, 192], sizes = [8, 64], strides = [1, 1]} : vector<8x256xf32> to vector<8x64xf32>
    %350 = math.tanh %349 : vector<8x64xf32>
    %351 = arith.mulf %347, %333 : vector<8x64xf32>
    %352 = arith.mulf %346, %350 : vector<8x64xf32>
    %353 = arith.addf %351, %352 : vector<8x64xf32>
    %354 = math.tanh %353 : vector<8x64xf32>
    %355 = arith.mulf %348, %354 : vector<8x64xf32>
    %356 = vector.extract_strided_slice %255 {offsets = [40, 0], sizes = [8, 256], strides = [1, 1]} : vector<64x256xf32> to vector<8x256xf32>
    %357 = arith.truncf %355 : vector<8x64xf32> to vector<8x64xbf16>
    %cst_51 = arith.constant dense<0.000000e+00> : vector<8x256xf32>
    %358 = tpu.matmul %357, %2, %cst_51 {dimension_numbers = #tpu.dot_dimension_numbers<[1], [0], [0], [1], [0, 0, 1, 1], [], []>} : vector<8x64xbf16>, vector<64x256xbf16>, vector<8x256xf32> -> vector<8x256xf32>
    %359 = arith.addf %356, %358 : vector<8x256xf32>
    %360 = vector.extract_strided_slice %359 {offsets = [0, 0], sizes = [8, 192], strides = [1, 1]} : vector<8x256xf32> to vector<8x192xf32>
    %361 = arith.negf %360 : vector<8x192xf32>
    %362 = math.exp %361 : vector<8x192xf32>
    %cst_52 = arith.constant 1.000000e+00 : f32
    %363 = vector.broadcast %cst_52 : f32 to vector<8x192xf32>
    %364 = arith.addf %363, %362 : vector<8x192xf32>
    %365 = arith.divf %363, %364 : vector<8x192xf32>
    %366 = vector.extract_strided_slice %365 {offsets = [0, 0], sizes = [8, 64], strides = [1, 1]} : vector<8x192xf32> to vector<8x64xf32>
    %367 = vector.extract_strided_slice %365 {offsets = [0, 64], sizes = [8, 64], strides = [1, 1]} : vector<8x192xf32> to vector<8x64xf32>
    %368 = vector.extract_strided_slice %365 {offsets = [0, 128], sizes = [8, 64], strides = [1, 1]} : vector<8x192xf32> to vector<8x64xf32>
    %369 = vector.extract_strided_slice %359 {offsets = [0, 192], sizes = [8, 64], strides = [1, 1]} : vector<8x256xf32> to vector<8x64xf32>
    %370 = math.tanh %369 : vector<8x64xf32>
    %371 = arith.mulf %367, %353 : vector<8x64xf32>
    %372 = arith.mulf %366, %370 : vector<8x64xf32>
    %373 = arith.addf %371, %372 : vector<8x64xf32>
    %374 = math.tanh %373 : vector<8x64xf32>
    %375 = arith.mulf %368, %374 : vector<8x64xf32>
    %376 = vector.extract_strided_slice %255 {offsets = [48, 0], sizes = [8, 256], strides = [1, 1]} : vector<64x256xf32> to vector<8x256xf32>
    %377 = arith.truncf %375 : vector<8x64xf32> to vector<8x64xbf16>
    %cst_53 = arith.constant dense<0.000000e+00> : vector<8x256xf32>
    %378 = tpu.matmul %377, %2, %cst_53 {dimension_numbers = #tpu.dot_dimension_numbers<[1], [0], [0], [1], [0, 0, 1, 1], [], []>} : vector<8x64xbf16>, vector<64x256xbf16>, vector<8x256xf32> -> vector<8x256xf32>
    %379 = arith.addf %376, %378 : vector<8x256xf32>
    %380 = vector.extract_strided_slice %379 {offsets = [0, 0], sizes = [8, 192], strides = [1, 1]} : vector<8x256xf32> to vector<8x192xf32>
    %381 = arith.negf %380 : vector<8x192xf32>
    %382 = math.exp %381 : vector<8x192xf32>
    %cst_54 = arith.constant 1.000000e+00 : f32
    %383 = vector.broadcast %cst_54 : f32 to vector<8x192xf32>
    %384 = arith.addf %383, %382 : vector<8x192xf32>
    %385 = arith.divf %383, %384 : vector<8x192xf32>
    %386 = vector.extract_strided_slice %385 {offsets = [0, 0], sizes = [8, 64], strides = [1, 1]} : vector<8x192xf32> to vector<8x64xf32>
    %387 = vector.extract_strided_slice %385 {offsets = [0, 64], sizes = [8, 64], strides = [1, 1]} : vector<8x192xf32> to vector<8x64xf32>
    %388 = vector.extract_strided_slice %385 {offsets = [0, 128], sizes = [8, 64], strides = [1, 1]} : vector<8x192xf32> to vector<8x64xf32>
    %389 = vector.extract_strided_slice %379 {offsets = [0, 192], sizes = [8, 64], strides = [1, 1]} : vector<8x256xf32> to vector<8x64xf32>
    %390 = math.tanh %389 : vector<8x64xf32>
    %391 = arith.mulf %387, %373 : vector<8x64xf32>
    %392 = arith.mulf %386, %390 : vector<8x64xf32>
    %393 = arith.addf %391, %392 : vector<8x64xf32>
    %394 = math.tanh %393 : vector<8x64xf32>
    %395 = arith.mulf %388, %394 : vector<8x64xf32>
    %396 = vector.extract_strided_slice %255 {offsets = [56, 0], sizes = [8, 256], strides = [1, 1]} : vector<64x256xf32> to vector<8x256xf32>
    %397 = arith.truncf %395 : vector<8x64xf32> to vector<8x64xbf16>
    %cst_55 = arith.constant dense<0.000000e+00> : vector<8x256xf32>
    %398 = tpu.matmul %397, %2, %cst_55 {dimension_numbers = #tpu.dot_dimension_numbers<[1], [0], [0], [1], [0, 0, 1, 1], [], []>} : vector<8x64xbf16>, vector<64x256xbf16>, vector<8x256xf32> -> vector<8x256xf32>
    %399 = arith.addf %396, %398 : vector<8x256xf32>
    %400 = vector.extract_strided_slice %399 {offsets = [0, 0], sizes = [8, 192], strides = [1, 1]} : vector<8x256xf32> to vector<8x192xf32>
    %401 = arith.negf %400 : vector<8x192xf32>
    %402 = math.exp %401 : vector<8x192xf32>
    %cst_56 = arith.constant 1.000000e+00 : f32
    %403 = vector.broadcast %cst_56 : f32 to vector<8x192xf32>
    %404 = arith.addf %403, %402 : vector<8x192xf32>
    %405 = arith.divf %403, %404 : vector<8x192xf32>
    %406 = vector.extract_strided_slice %405 {offsets = [0, 0], sizes = [8, 64], strides = [1, 1]} : vector<8x192xf32> to vector<8x64xf32>
    %407 = vector.extract_strided_slice %405 {offsets = [0, 64], sizes = [8, 64], strides = [1, 1]} : vector<8x192xf32> to vector<8x64xf32>
    %408 = vector.extract_strided_slice %405 {offsets = [0, 128], sizes = [8, 64], strides = [1, 1]} : vector<8x192xf32> to vector<8x64xf32>
    %409 = vector.extract_strided_slice %399 {offsets = [0, 192], sizes = [8, 64], strides = [1, 1]} : vector<8x256xf32> to vector<8x64xf32>
    %410 = math.tanh %409 : vector<8x64xf32>
    %411 = arith.mulf %407, %393 : vector<8x64xf32>
    %412 = arith.mulf %406, %410 : vector<8x64xf32>
    %413 = arith.addf %411, %412 : vector<8x64xf32>
    %414 = math.tanh %413 : vector<8x64xf32>
    %415 = arith.mulf %408, %414 : vector<8x64xf32>
    %416 = tpu.concatenate %375, %395, %415 in 0 : vector<8x64xf32>, vector<8x64xf32>, vector<8x64xf32> -> vector<24x64xf32>
    %c0_57 = arith.constant 0 : index
    %c0_58 = arith.constant 0 : index
    %417 = vector.load %arg8[%c0_57, %c0_58] : memref<64x256xf32, #tpu.memory_space<vmem>>, vector<64x256xf32>
    %cst_59 = arith.constant dense<0.000000e+00> : vector<24x256xf32>
    %418 = tpu.matmul %416, %417, %cst_59 {dimension_numbers = #tpu.dot_dimension_numbers<[1], [0], [0], [1], [0, 0, 1, 1], [], []>} : vector<24x64xf32>, vector<64x256xf32>, vector<24x256xf32> -> vector<24x256xf32>
    %c0_60 = arith.constant 0 : index
    %c0_61 = arith.constant 0 : index
    %419 = vector.load %arg10[%c0_60, %c0_61] : memref<1x256xf32, #tpu.memory_space<vmem>>, vector<1x256xf32>
    %420 = vector.broadcast %419 : vector<1x256xf32> to vector<24x256xf32>
    %421 = arith.addf %418, %420 : vector<24x256xf32>
    %422 = vector.extract_strided_slice %421 {offsets = [0, 0], sizes = [8, 256], strides = [1, 1]} : vector<24x256xf32> to vector<8x256xf32>
    %423 = arith.truncf %0 : vector<8x64xf32> to vector<8x64xbf16>
    %cst_62 = arith.constant dense<0.000000e+00> : vector<8x256xf32>
    %424 = tpu.matmul %423, %3, %cst_62 {dimension_numbers = #tpu.dot_dimension_numbers<[1], [0], [0], [1], [0, 0, 1, 1], [], []>} : vector<8x64xbf16>, vector<64x256xbf16>, vector<8x256xf32> -> vector<8x256xf32>
    %425 = arith.addf %422, %424 : vector<8x256xf32>
    %426 = vector.extract_strided_slice %425 {offsets = [0, 0], sizes = [8, 192], strides = [1, 1]} : vector<8x256xf32> to vector<8x192xf32>
    %427 = arith.negf %426 : vector<8x192xf32>
    %428 = math.exp %427 : vector<8x192xf32>
    %cst_63 = arith.constant 1.000000e+00 : f32
    %429 = vector.broadcast %cst_63 : f32 to vector<8x192xf32>
    %430 = arith.addf %429, %428 : vector<8x192xf32>
    %431 = arith.divf %429, %430 : vector<8x192xf32>
    %432 = vector.extract_strided_slice %431 {offsets = [0, 0], sizes = [8, 64], strides = [1, 1]} : vector<8x192xf32> to vector<8x64xf32>
    %433 = vector.extract_strided_slice %431 {offsets = [0, 64], sizes = [8, 64], strides = [1, 1]} : vector<8x192xf32> to vector<8x64xf32>
    %434 = vector.extract_strided_slice %431 {offsets = [0, 128], sizes = [8, 64], strides = [1, 1]} : vector<8x192xf32> to vector<8x64xf32>
    %435 = vector.extract_strided_slice %425 {offsets = [0, 192], sizes = [8, 64], strides = [1, 1]} : vector<8x256xf32> to vector<8x64xf32>
    %436 = math.tanh %435 : vector<8x64xf32>
    %437 = arith.mulf %433, %0 : vector<8x64xf32>
    %438 = arith.mulf %432, %436 : vector<8x64xf32>
    %439 = arith.addf %437, %438 : vector<8x64xf32>
    %440 = math.tanh %439 : vector<8x64xf32>
    %441 = arith.mulf %434, %440 : vector<8x64xf32>
    %442 = vector.extract_strided_slice %421 {offsets = [8, 0], sizes = [8, 256], strides = [1, 1]} : vector<24x256xf32> to vector<8x256xf32>
    %443 = arith.truncf %441 : vector<8x64xf32> to vector<8x64xbf16>
    %cst_64 = arith.constant dense<0.000000e+00> : vector<8x256xf32>
    %444 = tpu.matmul %443, %3, %cst_64 {dimension_numbers = #tpu.dot_dimension_numbers<[1], [0], [0], [1], [0, 0, 1, 1], [], []>} : vector<8x64xbf16>, vector<64x256xbf16>, vector<8x256xf32> -> vector<8x256xf32>
    %445 = arith.addf %442, %444 : vector<8x256xf32>
    %446 = vector.extract_strided_slice %445 {offsets = [0, 0], sizes = [8, 192], strides = [1, 1]} : vector<8x256xf32> to vector<8x192xf32>
    %447 = arith.negf %446 : vector<8x192xf32>
    %448 = math.exp %447 : vector<8x192xf32>
    %cst_65 = arith.constant 1.000000e+00 : f32
    %449 = vector.broadcast %cst_65 : f32 to vector<8x192xf32>
    %450 = arith.addf %449, %448 : vector<8x192xf32>
    %451 = arith.divf %449, %450 : vector<8x192xf32>
    %452 = vector.extract_strided_slice %451 {offsets = [0, 0], sizes = [8, 64], strides = [1, 1]} : vector<8x192xf32> to vector<8x64xf32>
    %453 = vector.extract_strided_slice %451 {offsets = [0, 64], sizes = [8, 64], strides = [1, 1]} : vector<8x192xf32> to vector<8x64xf32>
    %454 = vector.extract_strided_slice %451 {offsets = [0, 128], sizes = [8, 64], strides = [1, 1]} : vector<8x192xf32> to vector<8x64xf32>
    %455 = vector.extract_strided_slice %445 {offsets = [0, 192], sizes = [8, 64], strides = [1, 1]} : vector<8x256xf32> to vector<8x64xf32>
    %456 = math.tanh %455 : vector<8x64xf32>
    %457 = arith.mulf %453, %439 : vector<8x64xf32>
    %458 = arith.mulf %452, %456 : vector<8x64xf32>
    %459 = arith.addf %457, %458 : vector<8x64xf32>
    %460 = math.tanh %459 : vector<8x64xf32>
    %461 = arith.mulf %454, %460 : vector<8x64xf32>
    %462 = vector.extract_strided_slice %421 {offsets = [16, 0], sizes = [8, 256], strides = [1, 1]} : vector<24x256xf32> to vector<8x256xf32>
    %463 = arith.truncf %461 : vector<8x64xf32> to vector<8x64xbf16>
    %cst_66 = arith.constant dense<0.000000e+00> : vector<8x256xf32>
    %464 = tpu.matmul %463, %3, %cst_66 {dimension_numbers = #tpu.dot_dimension_numbers<[1], [0], [0], [1], [0, 0, 1, 1], [], []>} : vector<8x64xbf16>, vector<64x256xbf16>, vector<8x256xf32> -> vector<8x256xf32>
    %465 = arith.addf %462, %464 : vector<8x256xf32>
    %466 = vector.extract_strided_slice %465 {offsets = [0, 0], sizes = [8, 192], strides = [1, 1]} : vector<8x256xf32> to vector<8x192xf32>
    %467 = arith.negf %466 : vector<8x192xf32>
    %468 = math.exp %467 : vector<8x192xf32>
    %cst_67 = arith.constant 1.000000e+00 : f32
    %469 = vector.broadcast %cst_67 : f32 to vector<8x192xf32>
    %470 = arith.addf %469, %468 : vector<8x192xf32>
    %471 = arith.divf %469, %470 : vector<8x192xf32>
    %472 = vector.extract_strided_slice %471 {offsets = [0, 0], sizes = [8, 64], strides = [1, 1]} : vector<8x192xf32> to vector<8x64xf32>
    %473 = vector.extract_strided_slice %471 {offsets = [0, 64], sizes = [8, 64], strides = [1, 1]} : vector<8x192xf32> to vector<8x64xf32>
    %474 = vector.extract_strided_slice %471 {offsets = [0, 128], sizes = [8, 64], strides = [1, 1]} : vector<8x192xf32> to vector<8x64xf32>
    %475 = vector.extract_strided_slice %465 {offsets = [0, 192], sizes = [8, 64], strides = [1, 1]} : vector<8x256xf32> to vector<8x64xf32>
    %476 = math.tanh %475 : vector<8x64xf32>
    %477 = arith.mulf %473, %459 : vector<8x64xf32>
    %478 = arith.mulf %472, %476 : vector<8x64xf32>
    %479 = arith.addf %477, %478 : vector<8x64xf32>
    %480 = math.tanh %479 : vector<8x64xf32>
    %481 = arith.mulf %474, %480 : vector<8x64xf32>
    %c0_68 = arith.constant 0 : index
    %c0_69 = arith.constant 0 : index
    %482 = vector.load %arg17[%c0_68, %c0_69] : memref<8x64xf32, #tpu.memory_space<vmem>>, vector<8x64xf32>
    tpu.vector_store %arg17[%c0_68, %c0_69], %481 {strides = array<i32>} : memref<8x64xf32, #tpu.memory_space<vmem>>, vector<8x64xf32>,
    %c0_70 = arith.constant 0 : index
    %c0_71 = arith.constant 0 : index
    %483 = vector.load %arg18[%c0_70, %c0_71] : memref<8x64xf32, #tpu.memory_space<vmem>>, vector<8x64xf32>
    tpu.vector_store %arg18[%c0_70, %c0_71], %479 {strides = array<i32>} : memref<8x64xf32, #tpu.memory_space<vmem>>, vector<8x64xf32>,
    %c0_72 = arith.constant 0 : index
    %c0_73 = arith.constant 0 : index
    %484 = vector.load %arg11[%c0_72, %c0_73] : memref<64x64xf32, #tpu.memory_space<vmem>>, vector<64x64xf32>
    %cst_74 = arith.constant dense<0.000000e+00> : vector<8x64xf32>
    %485 = tpu.matmul %481, %484, %cst_74 {dimension_numbers = #tpu.dot_dimension_numbers<[1], [0], [0], [1], [0, 0, 1, 1], [], []>} : vector<8x64xf32>, vector<64x64xf32>, vector<8x64xf32> -> vector<8x64xf32>
    %c0_75 = arith.constant 0 : index
    %c0_76 = arith.constant 0 : index
    %486 = vector.load %arg1[%c0_75, %c0_76] : memref<8x2xf32, #tpu.memory_space<vmem>>, vector<8x2xf32>
    %c0_77 = arith.constant 0 : index
    %c0_78 = arith.constant 0 : index
    %487 = vector.load %arg12[%c0_77, %c0_78] : memref<2x64xf32, #tpu.memory_space<vmem>>, vector<2x64xf32>
    %cst_79 = arith.constant dense<0.000000e+00> : vector<8x64xf32>
    %488 = tpu.matmul %486, %487, %cst_79 {dimension_numbers = #tpu.dot_dimension_numbers<[1], [0], [0], [1], [0, 0, 1, 1], [], []>} : vector<8x2xf32>, vector<2x64xf32>, vector<8x64xf32> -> vector<8x64xf32>
    %489 = arith.addf %485, %488 : vector<8x64xf32>
    %c0_80 = arith.constant 0 : index
    %c0_81 = arith.constant 0 : index
    %490 = vector.load %arg13[%c0_80, %c0_81] : memref<1x64xf32, #tpu.memory_space<vmem>>, vector<1x64xf32>
    %491 = vector.broadcast %490 : vector<1x64xf32> to vector<8x64xf32>
    %492 = arith.addf %489, %491 : vector<8x64xf32>
    %c0_82 = arith.constant 0 : index
    %c0_83 = arith.constant 0 : index
    %493 = vector.load %arg14[%c0_82, %c0_83] : memref<64x2xf32, #tpu.memory_space<vmem>>, vector<64x2xf32>
    %cst_84 = arith.constant dense<0.000000e+00> : vector<8x2xf32>
    %494 = tpu.matmul %492, %493, %cst_84 {dimension_numbers = #tpu.dot_dimension_numbers<[1], [0], [0], [1], [0, 0, 1, 1], [], []>} : vector<8x64xf32>, vector<64x2xf32>, vector<8x2xf32> -> vector<8x2xf32>
    %c0_85 = arith.constant 0 : index
    %c0_86 = arith.constant 0 : index
    %495 = vector.load %arg15[%c0_85, %c0_86] : memref<1x2xf32, #tpu.memory_space<vmem>>, vector<1x2xf32>
    %496 = vector.broadcast %495 : vector<1x2xf32> to vector<8x2xf32>
    %497 = arith.addf %494, %496 : vector<8x2xf32>
    %c0_87 = arith.constant 0 : index
    %c0_88 = arith.constant 0 : index
    %498 = vector.load %arg16[%c0_87, %c0_88] : memref<8x2xf32, #tpu.memory_space<vmem>>, vector<8x2xf32>
    tpu.vector_store %arg16[%c0_87, %c0_88], %497 {strides = array<i32>} : memref<8x2xf32, #tpu.memory_space<vmem>>, vector<8x2xf32>,
    return
  }
}

</mosaic_0001>

<bundles_post_ra>
// kernel: tpu_custom_call.1
= control target key start
LH: loop header
LB: loop body
LE: loop exit
PB: predicated region body
PF: predicated region fallthrough
CT: control target
= control target key end

     0   :  { %s4387_s0 = inlined_call_operand.vmem [shape: f32[96,7], index: 0, kind: input, shape index: {}]   ;;  %s4388_s1 = inlined_call_operand.vmem [shape: f32[8,2], index: 1, kind: input, shape index: {}]   ;;  %s4389_s2 = inlined_call_operand.hbm [shape: f32[7,256], index: 2, kind: input, shape index: {}]   ;;  %s4390_s3 = inlined_call_operand.hbm [shape: bf16[64,256], index: 3, kind: input, shape index: {}]   ;;  %s4391_s4 = inlined_call_operand.vmem [shape: f32[1,256], index: 4, kind: input, shape index: {}]   ;;  %s4392_s5 = inlined_call_operand.vmem [shape: f32[64,256], index: 5, kind: input, shape index: {}]   ;;  %s4393_s6 = inlined_call_operand.hbm [shape: bf16[64,256], index: 6, kind: input, shape index: {}]   ;;  %s4394_s7 = inlined_call_operand.hbm [shape: f32[1,256], index: 7, kind: input, shape index: {}]   ;;  %s4395_s8 = inlined_call_operand.hbm [shape: f32[64,256], index: 8, kind: input, shape index: {}]   ;;  %s4396_s9 = inlined_call_operand.vmem [shape: bf16[64,256], index: 9, kind: input, shape index: {}]   ;;  %s4397_s10 = inlined_call_operand.vmem [shape: f32[1,256], index: 10, kind: input, shape index: {}]   ;;  %s4398_s11 = inlined_call_operand.hbm [shape: f32[64,64], index: 11, kind: input, shape index: {}]   ;;  %s4399_s12 = inlined_call_operand.vmem [shape: f32[2,64], index: 12, kind: input, shape index: {}]   ;;  %s4400_s13 = inlined_call_operand.vmem [shape: f32[1,64], index: 13, kind: input, shape index: {}]   ;;  %s4401_s14 = inlined_call_operand.vmem [shape: f32[64,2], index: 14, kind: input, shape index: {}]   ;;  %s4402_s15 = inlined_call_operand.vmem [shape: f32[1,2], index: 15, kind: input, shape index: {}]   ;;  %s4403_s16 = inlined_call_operand.vmem [shape: f32[8,2], index: 16, kind: output, shape index: {0}]   ;;  %s4404_s17 = inlined_call_operand.hbm [shape: f32[8,64], index: 17, kind: output, shape index: {1}]   ;;  %s4405_s18 = inlined_call_operand.hbm [shape: f32[8,64], index: 18, kind: output, shape index: {2}]  }
   0x1   :  { %4407 = sst [smem:[#allocation22_spill]] %s4387_s0 }
   0x2   :  { %4408 = sst [smem:[#allocation23_spill]] %s4388_s1 }
   0x3   :  { %4409 = sst [smem:[#allocation24_spill]] %s4389_s2 }
   0x4   :  { %24 = vsyncpa [#allocation3], 0 }
   0x5   :  { %25 = vsyncpa [#allocation6], 0 }
   0x6   :  { %26 = vsyncpa [#allocation9], 0 }
   0x7   :  { %27 = vsyncpa [#allocation12], 0 }
   0x8   :  { %28 = vsyncpa [#allocation4], 0 }
   0x9   :  { %29 = vsyncpa [#allocation15], 0  ;;  %s3526_s27 = smov [#allocation5]  }
   0xa   :  { %s49_s28 = sshll.u32 %s3526_s27, 4  ;;  %s50_s28 = int_to_ptr.vmem [resolvable:$true] %s49_s28 }
   0xb   :  { %s3362_s29 = scalar_lea.vmem %s50_s28, 1024  ;;  %p3367_p1 = scmp.lt.s32.totalorder %s50_s28, %s50_s28 }
   0xc   :  { %p3363_p0 = scmp.ne.s32.totalorder %s50_s28, %s3362_s29  ;;  %p3368_p2 = scmp.lt.s32.totalorder %s3362_s29, %s3362_s29 }
   0xe   :  { %p3369_p3 = por %p3368_p2, %p3367_p1 }
  0x10   :  { %p3370_p4 = pnand %p3369_p3, %p3363_p0 }
  0x12   :  { %3373 = shalt.err (!%p3370_p4)
}
  0x13   :  { %s3527_s30 = smov 128   ;;  %s3528_s0 = smov 8  }
  0x14   :  { %55 = dma.hbm_to_vmem [thread:$0]  %s4390_s3, 1024, %s50_s28, [#allocation6], %s3527_s30, %s3527_s30, %s3528_s0  }
  0x15   :  { %s3529_s20 = smov [#allocation8]   ;;  %s3530_s22 = smov [#allocation2]  }
  0x16   :  { %s78_s21 = sshll.u32 %s3529_s20, 4  ;;  %s40_s2 = sshll.u32 %s3530_s22, 4  ;;  %s79_s21 = int_to_ptr.vmem [resolvable:$true] %s78_s21  ;;  %s41_s2 = int_to_ptr.vmem [resolvable:$true] %s40_s2 }
  0x17   :  { %s3382_s23 = scalar_lea.vmem %s79_s21, 32  ;;  %p3387_p6 = scmp.lt.s32.totalorder %s79_s21, %s79_s21 }
  0x18   :  { %p3383_p5 = scmp.ne.s32.totalorder %s79_s21, %s3382_s23  ;;  %p3388_p7 = scmp.lt.s32.totalorder %s3382_s23, %s3382_s23 }
  0x1a   :  { %p3389_p8 = por %p3388_p7, %p3387_p6 }
  0x1c   :  { %p3390_p9 = pnand %p3389_p8, %p3383_p5 }
  0x1e   :  { %3393 = shalt.err (!%p3390_p9)
}
  0x1f   :  { %81 = dma.hbm_to_vmem [thread:$0]  %s4394_s7, 32, %s79_s21, [#allocation9]  }
  0x20   :  { %s3402_s26 = scalar_lea.vmem %s41_s2, 256  ;;  %p3407_p11 = scmp.lt.s32.totalorder %s41_s2, %s41_s2 }
  0x21   :  { %p3403_p10 = scmp.ne.s32.totalorder %s41_s2, %s3402_s26  ;;  %p3408_p12 = scmp.lt.s32.totalorder %s3402_s26, %s3402_s26 }
  0x23   :  { %p3409_p13 = por %p3408_p12, %p3407_p11 }
  0x25   :  { %p3410_p0 = pnand %p3409_p13, %p3403_p10 }
  0x27   :  { %3413 = shalt.err (!%p3410_p0)
}
  0x28   :  { %s4410_s28 = sld [smem:[#allocation24_spill]]  ;;  %s3531_s29 = smov [#allocation7]  }
  0x29   :  { %s65_s19 = sshll.u32 %s3531_s29, 4  ;;  %s3532_s1 = smov [#allocation10]   ;;  %s66_s19 = int_to_ptr.vmem [resolvable:$true] %s65_s19 }
  0x2a   :  { %s87_s20 = sshll.u32 %s3532_s1, 4  ;;  %s3422_s22 = scalar_lea.vmem %s66_s19, 1024  ;;  %s88_s20 = int_to_ptr.vmem [resolvable:$true] %s87_s20 }
  0x2b   :  { %p3423_p1 = scmp.ne.s32.totalorder %s66_s19, %s3422_s22  ;;  %p3427_p2 = scmp.lt.s32.totalorder %s66_s19, %s66_s19 }
  0x2c   :  { %p3428_p3 = scmp.lt.s32.totalorder %s3422_s22, %s3422_s22 }
  0x2e   :  { %43 = dma.hbm_to_vmem [thread:$0]  %s4410_s28, 256, %s41_s2, [#allocation3]  }
  0x2f   :  { %p3429_p4 = por %p3428_p3, %p3427_p2 }
  0x31   :  { %p3430_p5 = pnand %p3429_p4, %p3423_p1 }
  0x33   :  { %3433 = shalt.err (!%p3430_p5)
}
  0x34   :  { %71 = dma.hbm_to_vmem [thread:$0]  %s4393_s6, 1024, %s66_s19, [#allocation6], %s3527_s30, %s3527_s30, %s3528_s0  }
  0x35   :  { %s3442_s2 = scalar_lea.vmem %s88_s20, 2048  ;;  %p3447_p7 = scmp.lt.s32.totalorder %s88_s20, %s88_s20 }
  0x36   :  { %p3443_p6 = scmp.ne.s32.totalorder %s88_s20, %s3442_s2  ;;  %p3448_p8 = scmp.lt.s32.totalorder %s3442_s2, %s3442_s2 }
  0x38   :  { %p3449_p9 = por %p3448_p8, %p3447_p7 }
  0x3a   :  { %p3450_p10 = pnand %p3449_p9, %p3443_p6 }
  0x3c   :  { %3453 = shalt.err (!%p3450_p10)
}
  0x3d   :  { %s3533_s23 = smov 256   ;;  %s3534_s24 = smov 16  }
  0x3e   :  { %93 = dma.hbm_to_vmem [thread:$0]  %s4395_s8, 2048, %s88_s20, [#allocation9], %s3533_s23, %s3533_s23, %s3534_s24  }
  0x3f   :  { %s3535_s3 = smov [#allocation11]  }
  0x40   :  { %s103_s27 = sshll.u32 %s3535_s3, 4  ;;  %s104_s27 = int_to_ptr.vmem [resolvable:$true] %s103_s27 }
  0x41   :  { %s3462_s28 = scalar_lea.vmem %s104_s27, 1024  ;;  %p3467_p12 = scmp.lt.s32.totalorder %s104_s27, %s104_s27 }
  0x42   :  { %p3463_p11 = scmp.ne.s32.totalorder %s104_s27, %s3462_s28  ;;  %p3468_p13 = scmp.lt.s32.totalorder %s3462_s28, %s3462_s28 }
  0x44   :  { %p3469_p0 = por %p3468_p13, %p3467_p12 }
  0x46   :  { %p3470_p1 = pnand %p3469_p0, %p3463_p11 }
  0x48   :  { %3473 = shalt.err (!%p3470_p1)
}
  0x49   :  { %109 = dma.hbm_to_vmem [thread:$0]  %s4398_s11, 1024, %s104_s27, [#allocation12], %s3527_s30, %s3527_s30, %s3528_s0  }
  0x4a   :  { %3514 = dma.done.wait [#allocation3], 256  }
  0x4b   :  { %3515 = vsyncadd [#allocation3], 4294967040 }
  0x4c   :  { %3516 = dma.done.wait [#allocation6], 2048  }
  0x4d   :  { %3517 = vsyncadd [#allocation6], 4294965248 }
  0x4e   :  { %3518 = dma.done.wait [#allocation9], 2080  }
  0x4f   :  { %3519 = vsyncadd [#allocation9], 4294965216 }
  0x50   :  { %3520 = dma.done.wait [#allocation12], 1024  }
  0x51   :  { %3521 = vsyncadd [#allocation12], 4294966272  ;;  %v3536_v0 = vmov 0.0   ;;  %v3537_v1 = vmov 0   ;;  %v3666_v2 = vld [vmem:[#allocation5 + $0x34] ss:$8 sps:$4 sm:$0xff]   ;;  %v177_v13 = vlaneseq }
  0x52   :  { %295 = vmatprep.mubr.f32.mxu0 %v3536_v0  ;;  %444 = vmatprep.mubr.bf16.mxu1 %v3537_v1  ;;  %v3668_v3 = vld [vmem:[#allocation5 + $0x30] ss:$8 sps:$4 sm:$0xff]   ;;  %v3671_v4 = vld [vmem:[#allocation5 + $0x24] ss:$8 sps:$4 sm:$0xff]   ;;  %vm224_vm0 = vcmask 1046528   ;;  %s4411_s30 = sld [smem:[#allocation22_spill]] }
  0x53   :  { %420 = vmatprep.subr.bf16.mxu1 %v3666_v2  ;;  %v3674_v5 = vld [vmem:[#allocation5 + $0x20] ss:$8 sps:$4 sm:$0xff]   ;;  %v3676_v6 = vld [vmem:[#allocation5 + $0x14] ss:$8 sps:$4 sm:$0xff]   ;;  %vm187_vm1 = vcmask 56320   ;;  %v178_v14 = vshrl.u32 %v177_v13, 7 }
  0x54   :  { %421 = vmatpush1.bf16.msra.mxu1 %v3668_v3  ;;  %v174_v7 = vld [vmem:[#allocation2 + $0x8] sm:$0x7f]  ;;  %v173_v8 = vld [vmem:[#allocation2] sm:$0x7f]  ;;  %v3684_v11 = vld [vmem:[#allocation5 + $0x4] ss:$8 sps:$4 sm:$0xff]  }
  0x55   :  { %422 = vmatprep.subr.bf16.mxu1 %v3671_v4  ;;  %2836 = vmatprep.subr.msk.mxu0 %vm224_vm0, %v174_v7  ;;  %v3682_v10 = vld [vmem:[#allocation5 + $0x10] ss:$8 sps:$4 sm:$0xff]   ;;  %v3690_v12 = vld [vmem:[#allocation5] ss:$8 sps:$4 sm:$0xff]   ;;  %v3715_v15 = vsub.s32 0, %v178_v14  ;;  %v3723_v18 = vsub.s32 1, %v178_v14 }
  0x56   :  { %2837 = vmatpush1.msk.msra.mxu0 %vm224_vm0, %v173_v8  ;;  %v175_v16 = vld [vmem:[%s4391_s4] sm:$0x3]  ;;  %s3538_s4 = smov 64   ;;  %vm408_vm2 = vcmask 523264   ;;  %vm2556_vm3 = vcmask 1041408   ;;  %vm3539_vm4 = vmmov 0  }
  0x57   :  { %651 = vmatprep.subr.bf16.mxu0 %v3666_v2  ;;  %v3721_v17 = vrot.slane %v175_v16, %v3715_v15  ;;  %v3727_v21 = vrot.slane %v175_v16, %v3723_v18  ;;  %s4412_s28 = sld [smem:[#allocation23_spill]]  ;;  %vm2552_vm5 = vcmask 15360  }
  0x58   :  { %v161_v9 = vld [vmem:[%s4411_s30] sm:$0xff]  ;;  %423 = vmatpush1.bf16.msra.mxu1 %v3674_v5  ;;  %v162_v40 = vld [vmem:[%s4411_s30 + $0x8] sm:$0xff]  ;;  %v163_v16 = vld [vmem:[%s4411_s30 + $0x10] sm:$0xff] }
  0x59   :  { %2838 = vmatmul.mubr.msk.f32.vlgmr.msra.gmra.mxu0 %vm187_vm1, %v161_v9  ;;  %424 = vmatprep.subr.bf16.mxu1 %v3676_v6 }
  0x5a   :  { %301 = vmatprep.mubr.f32.mxu0 %v3536_v0  ;;  %652 = vmatpush1.bf16.msra.mxu0 %v3668_v3 }
  0x5b   :  { %653 = vmatprep.subr.bf16.mxu0 %v3671_v4 }
  0x5c   :  { %425 = vmatpush1.bf16.msra.mxu1 %v3682_v10 }
  0x5d   :  { %426 = vmatprep.subr.bf16.mxu1 %v3684_v11  ;;  %2839 = vmatmul.mubr.msk.f32.gmra.mxu0 %vm187_vm1, %v162_v40 }
  0x5e   :  { %654 = vmatpush1.bf16.msra.mxu0 %v3674_v5  ;;  %307 = vmatprep.mubr.f32.mxu0 %v3536_v0 }
  0x5f   :  { %655 = vmatprep.subr.bf16.mxu0 %v3676_v6 }
  0x60   :  { %427 = vmatpush1.bf16.msra.mxu1 %v3690_v12 }
  0x61   :  { %497 = vmatprep.subr.bf16.mxu1 %v3666_v2  ;;  %2840 = vmatmul.mubr.msk.f32.gmra.mxu0 %vm187_vm1, %v163_v16 }
  0x62   :  { %656 = vmatpush1.bf16.msra.mxu0 %v3682_v10  ;;  %313 = vmatprep.mubr.f32.mxu0 %v3536_v0 }
  0x63   :  { %445 = vmatmul.mubr.bf16.vlgmr.msra.gmra.mxu1 %v3537_v1  ;;  %657 = vmatprep.subr.bf16.mxu0 %v3684_v11 }
  0x64   :  { %498 = vmatpush1.bf16.msra.mxu1 %v3668_v3  ;;  %521 = vmatprep.mubr.bf16.mxu1 %v3537_v1 }
  0x65   :  { %499 = vmatprep.subr.bf16.mxu1 %v3671_v4 }
  0x66   :  { %658 = vmatpush1.bf16.msra.mxu0 %v3690_v12 }
  0x67   :  { %805 = vmatprep.subr.bf16.mxu0 %v3666_v2 }
  0x68   :  { %500 = vmatpush1.bf16.msra.mxu1 %v3674_v5 }
  0x69   :  { %501 = vmatprep.subr.bf16.mxu1 %v3676_v6 }
  0x6c   :  { %502 = vmatpush1.bf16.msra.mxu1 %v3682_v10 }
  0x6d   :  { %503 = vmatprep.subr.bf16.mxu1 %v3684_v11 }
  0x70   :  { %504 = vmatpush1.bf16.msra.mxu1 %v3690_v12 }
  0x71   :  { %574 = vmatprep.subr.bf16.mxu1 %v3666_v2 }
 0x119   :  { %v297_v19 = vpop.f32.mrf.mxu0 }
 0x11a   :  { %v298_v20 = vadd.f32 %v297_v19, %v3721_v17 }
 0x11b   :  { %v299_v22 = vpop.f32.mrf.mxu0 }
 0x11c   :  { %v300_v24 = vadd.f32 %v299_v22, %v3727_v21 }
 0x11d   :  { %v303_v49 = vpop.f32.mrf.mxu0 }
 0x11e   :  { %v304_v50 = vadd.f32 %v303_v49, %v3721_v17  ;;  %v168_v49 = vld [vmem:[%s4411_s30 + $0x38] sm:$0xff] }
 0x11f   :  { %v305_v51 = vpop.f32.mrf.mxu0 }
 0x120   :  { %v306_v53 = vadd.f32 %v305_v51, %v3727_v21  ;;  %v170_v51 = vld [vmem:[%s4411_s30 + $0x48] sm:$0xff] }
 0x123   :  { %v446_v23 = vpop.f32.mrf.mxu1 }
 0x124   :  { %v453_v25 = vadd.f32 %v446_v23, %v298_v20 }
 0x125   :  { %v448_v26 = vpop.f32.mrf.mxu1 }
 0x126   :  { %v454_v27 = vadd.f32 %v448_v26, %v300_v24  ;;  %v2858_v31 = vmul.f32 -1.442695, %v453_v25 }
 0x127   :  { %v450_v28 = vpop.f32.mrf.mxu1 }
 0x128   :  { %3072 = vtanh.f32 %v454_v27  ;;  %v2859_v42 = vmul.f32 -1.442695, %v454_v27  ;;  %v309_v28 = vpop.f32.mrf.mxu0 }
 0x129   :  { %v451_v29 = vpop.f32.mrf.mxu1  ;;  %3074 = vpow2.f32 %v2858_v31 }
 0x12a   :  { %v310_v29 = vadd.f32 %v309_v28, %v3721_v17 }
 0x135   :  { %v3073_v30 = vpop.eup %3072 }
 0x136   :  { %470 = vrot.lane.b32.xlu0 %v3073_v30, %s3538_s4  ;;  %v3075_v32 = vpop.eup %3074  ;;  %v311_v30 = vpop.f32.mrf.mxu0 }
 0x137   :  { %v461_v33 = vadd.f32 1.0, %v3075_v32  ;;  %v312_v32 = vadd.f32 %v311_v30, %v3727_v21 }
 0x139   :  { %3076 = vrcp.f32 %v461_v33 }
 0x146   :  { %v3077_v34 = vpop.eup %3076 }
 0x147   :  { %v468_v37 = vmul.f32 0.0, %v3077_v34 }
 0x1a8   :  { %v471_v35 = vpop.permute.xlu0 %470 }
 0x1a9   :  { %v473_v36 = vmul.f32 %v3077_v34, %v471_v35 }
 0x1ab   :  { %475 = vrot.lane.b32.xlu0 %v473_v36, %s3538_s4 }
 0x21d   :  { %v476_v38 = vpop.permute.xlu0 %475 }
 0x21e   :  { %v478_v39 = vadd.f32 %v476_v38, %v468_v37 }
 0x220   :  { %3078 = vtanh.f32 %v478_v39 }
 0x221   :  { %3080 = vpow2.f32 %v2859_v42 }
 0x22d   :  { %v3079_v41 = vpop.eup %3078 }
 0x22e   :  { %481 = vrot.lane.b32.xlu1 %v3079_v41, %s3538_s4  ;;  %v3081_v43 = vpop.eup %3080 }
 0x22f   :  { %v462_v44 = vadd.f32 1.0, %v3081_v43 }
 0x231   :  { %3082 = vrcp.f32 %v462_v44 }
 0x23e   :  { %v3083_v45 = vpop.eup %3082 }
 0x2a0   :  { %v482_v46 = vpop.permute.xlu1 %481 }
 0x2a1   :  { %v484_v47 = vmul.f32 %v3083_v45, %v482_v46  ;;  %v164_v45 = vld [vmem:[%s4411_s30 + $0x18] sm:$0xff]  ;;  %v165_v46 = vld [vmem:[%s4411_s30 + $0x20] sm:$0xff] }
 0x2a2   :  { %2841 = vmatmul.mubr.msk.f32.gmra.mxu0 %vm187_vm1, %v164_v45 }
 0x2a3   :  { %v485_v48 = vpack.c.bf16 %v484_v47, %v484_v47  ;;  %319 = vmatprep.mubr.f32.mxu0 %v3536_v0  ;;  %v166_v47 = vld [vmem:[%s4411_s30 + $0x28] sm:$0xff] }
 0x2a5   :  { %2860 = vmatmul.mubr.msk.bf16.vlgmr.msra.gmra.mxu1 %vm408_vm2, %v485_v48  ;;  %v167_v48 = vld [vmem:[%s4411_s30 + $0x30] sm:$0xff] }
 0x2a6   :  { %575 = vmatpush1.bf16.msra.mxu1 %v3668_v3  ;;  %598 = vmatprep.mubr.bf16.mxu1 %v3537_v1 }
 0x2a7   :  { %576 = vmatprep.subr.bf16.mxu1 %v3671_v4  ;;  %2842 = vmatmul.mubr.msk.f32.gmra.mxu0 %vm187_vm1, %v165_v46 }
 0x2a8   :  { %325 = vmatprep.mubr.f32.mxu0 %v3536_v0 }
 0x2aa   :  { %577 = vmatpush1.bf16.msra.mxu1 %v3674_v5 }
 0x2ab   :  { %578 = vmatprep.subr.bf16.mxu1 %v3676_v6  ;;  %2843 = vmatmul.mubr.msk.f32.gmra.mxu0 %vm187_vm1, %v166_v47 }
 0x2ac   :  { %331 = vmatprep.mubr.f32.mxu0 %v3536_v0 }
 0x2ae   :  { %579 = vmatpush1.bf16.msra.mxu1 %v3682_v10 }
 0x2af   :  { %580 = vmatprep.subr.bf16.mxu1 %v3684_v11  ;;  %2844 = vmatmul.mubr.msk.f32.gmra.mxu0 %vm187_vm1, %v167_v48 }
 0x2b0   :  { %337 = vmatprep.mubr.f32.mxu0 %v3536_v0 }
 0x2b2   :  { %581 = vmatpush1.bf16.msra.mxu1 %v3690_v12 }
 0x2b3   :  { %728 = vmatprep.subr.bf16.mxu1 %v3666_v2  ;;  %2845 = vmatmul.mubr.msk.f32.gmra.mxu0 %vm187_vm1, %v168_v49 }
 0x2b4   :  { %343 = vmatprep.mubr.f32.mxu0 %v3536_v0 }
 0x365   :  { %v523_v52 = vpop.f32.mrf.mxu1 }
 0x366   :  { %v530_v54 = vadd.f32 %v523_v52, %v304_v50  ;;  %v169_v50 = vld [vmem:[%s4411_s30 + $0x40] sm:$0xff]  ;;  %v171_v52 = vld [vmem:[%s4411_s30 + $0x50] sm:$0xff] }
 0x367   :  { %v525_v55 = vpop.f32.mrf.mxu1  ;;  %2846 = vmatmul.mubr.msk.f32.gmra.mxu0 %vm187_vm1, %v169_v50 }
 0x368   :  { %v531_v56 = vadd.f32 %v525_v55, %v306_v53  ;;  %v2861_v60 = vmul.f32 -1.442695, %v530_v54  ;;  %349 = vmatprep.mubr.f32.mxu0 %v3536_v0  ;;  %v172_v53 = vld [vmem:[%s4411_s30 + $0x58] sm:$0xff] }
 0x369   :  { %v527_v57 = vpop.f32.mrf.mxu1 }
 0x36a   :  { %3084 = vtanh.f32 %v531_v56  ;;  %v2862_v20 = vmul.f32 -1.442695, %v531_v56 }
 0x36b   :  { %v528_v58 = vpop.f32.mrf.mxu1  ;;  %3086 = vpow2.f32 %v2861_v60  ;;  %2847 = vmatmul.mubr.msk.f32.gmra.mxu0 %vm187_vm1, %v170_v51 }
 0x36c   :  { %355 = vmatprep.mubr.f32.mxu0 %v3536_v0 }
 0x36f   :  { %2848 = vmatmul.mubr.msk.f32.gmra.mxu0 %vm187_vm1, %v171_v52 }
 0x370   :  { %361 = vmatprep.mubr.f32.mxu0 %v3536_v0 }
 0x373   :  { %2849 = vmatmul.mubr.msk.f32.gmra.mxu0 %vm187_vm1, %v172_v53 }
 0x374   :  { %675 = vmatprep.mubr.bf16.mxu0 %v3537_v1 }
 0x377   :  { %v3085_v59 = vpop.eup %3084 }
 0x378   :  { %547 = vrot.lane.b32.xlu1 %v3085_v59, %s3538_s4  ;;  %v3087_v61 = vpop.eup %3086 }
 0x379   :  { %v538_v62 = vadd.f32 1.0, %v3087_v61 }
 0x37b   :  { %3088 = vrcp.f32 %v538_v62 }
 0x388   :  { %v3089_v63 = vpop.eup %3088 }
 0x389   :  { %v545_v9 = vmul.f32 %v3089_v63, %v478_v39 }
 0x3ea   :  { %v548_v7 = vpop.permute.xlu1 %547 }
 0x3eb   :  { %v550_v8 = vmul.f32 %v3089_v63, %v548_v7 }
 0x3ed   :  { %552 = vrot.lane.b32.xlu0 %v550_v8, %s3538_s4  ;;  %v315_v8 = vpop.f32.mrf.mxu0 }
 0x45f   :  { %v553_v13 = vpop.permute.xlu0 %552 }
 0x460   :  { %v3752_v14 = vadd.f32 %v553_v13, %v545_v9  ;;  %v317_v9 = vpop.f32.mrf.mxu0 }
 0x462   :  { %3090 = vtanh.f32 %v3752_v14  ;;  %v321_v13 = vpop.f32.mrf.mxu0 }
 0x463   :  { %3092 = vpow2.f32 %v2862_v20 }
 0x46f   :  { %v3091_v19 = vpop.eup %3090 }
 0x470   :  { %558 = vrot.lane.b32.xlu1 %v3091_v19, %s3538_s4  ;;  %v3093_v22 = vpop.eup %3092 }
 0x471   :  { %v539_v23 = vadd.f32 1.0, %v3093_v22 }
 0x473   :  { %3094 = vrcp.f32 %v539_v23 }
 0x480   :  { %v3095_v24 = vpop.eup %3094 }
 0x4e2   :  { %v559_v25 = vpop.permute.xlu1 %558 }
 0x4e3   :  { %v561_v26 = vmul.f32 %v3095_v24, %v559_v25 }
 0x4e5   :  { %v562_v27 = vpack.c.bf16 %v561_v26, %v561_v26 }
 0x4e7   :  { %2863 = vmatmul.mubr.msk.bf16.vlgmr.msra.gmra.mxu1 %vm408_vm2, %v562_v27 }
 0x4e8   :  { %729 = vmatpush1.bf16.msra.mxu1 %v3668_v3  ;;  %752 = vmatprep.mubr.bf16.mxu1 %v3537_v1 }
 0x4e9   :  { %730 = vmatprep.subr.bf16.mxu1 %v3671_v4 }
 0x4ec   :  { %731 = vmatpush1.bf16.msra.mxu1 %v3674_v5 }
 0x4ed   :  { %732 = vmatprep.subr.bf16.mxu1 %v3676_v6 }
 0x4f0   :  { %733 = vmatpush1.bf16.msra.mxu1 %v3682_v10 }
 0x4f1   :  { %734 = vmatprep.subr.bf16.mxu1 %v3684_v11 }
 0x4f4   :  { %735 = vmatpush1.bf16.msra.mxu1 %v3690_v12 }
 0x4f5   :  { %882 = vmatprep.subr.bf16.mxu1 %v3666_v2 }
 0x5a7   :  { %v600_v31 = vpop.f32.mrf.mxu1 }
 0x5a8   :  { %v607_v33 = vadd.f32 %v600_v31, %v310_v29 }
 0x5a9   :  { %v602_v34 = vpop.f32.mrf.mxu1 }
 0x5aa   :  { %v608_v35 = vadd.f32 %v602_v34, %v312_v32  ;;  %v2864_v39 = vmul.f32 -1.442695, %v607_v33  ;;  %v316_v33 = vadd.f32 %v315_v8, %v3721_v17 }
 0x5ab   :  { %v604_v36 = vpop.f32.mrf.mxu1 }
 0x5ac   :  { %3096 = vtanh.f32 %v608_v35  ;;  %v2865_v58 = vmul.f32 -1.442695, %v608_v35  ;;  %v318_v35 = vadd.f32 %v317_v9, %v3727_v21 }
 0x5ad   :  { %v605_v37 = vpop.f32.mrf.mxu1  ;;  %3098 = vpow2.f32 %v2864_v39 }
 0x5b9   :  { %v3097_v38 = vpop.eup %3096 }
 0x5ba   :  { %624 = vrot.lane.b32.xlu0 %v3097_v38, %s3538_s4  ;;  %v3099_v40 = vpop.eup %3098 }
 0x5bb   :  { %v615_v41 = vadd.f32 1.0, %v3099_v40 }
 0x5bd   :  { %3100 = vrcp.f32 %v615_v41 }
 0x5ca   :  { %v3101_v42 = vpop.eup %3100 }
 0x5cb   :  { %v622_v54 = vmul.f32 %v3101_v42, %v3752_v14  ;;  %v323_v14 = vpop.f32.mrf.mxu0 }
 0x5cd   :  { %v3832_v16 = vpop.f32.mrf.mxu0 }
 0x5cf   :  { %v3834_v19 = vpop.f32.mrf.mxu0 }
 0x5d1   :  { %v3836_v20 = vpop.f32.mrf.mxu0 }
 0x5d3   :  { %v3838_v22 = vpop.f32.mrf.mxu0 }
 0x5d5   :  { %v3840_v23 = vpop.f32.mrf.mxu0 }
 0x5d7   :  { %v3842_v24 = vpop.f32.mrf.mxu0 }
 0x5d9   :  { %v3844_v25 = vpop.f32.mrf.mxu0 }
 0x5db   :  { %v3846_v26 = vpop.f32.mrf.mxu0 }
 0x5dd   :  { %v3848_v27 = vpop.f32.mrf.mxu0 }
 0x5df   :  { %v3850_v28 = vpop.f32.mrf.mxu0 }
 0x5e1   :  { %v3852_v29 = vpop.f32.mrf.mxu0 }
 0x5e3   :  { %v3854_v30 = vpop.f32.mrf.mxu0 }
 0x5e5   :  { %v3856_v31 = vpop.f32.mrf.mxu0 }
 0x5e7   :  { %v3858_v32 = vpop.f32.mrf.mxu0 }
 0x62c   :  { %v625_v43 = vpop.permute.xlu0 %624 }
 0x62d   :  { %v627_v44 = vmul.f32 %v3101_v42, %v625_v43 }
 0x62f   :  { %629 = vrot.lane.b32.xlu1 %v627_v44, %s3538_s4 }
 0x6a1   :  { %v630_v55 = vpop.permute.xlu1 %629 }
 0x6a2   :  { %v632_v56 = vadd.f32 %v630_v55, %v622_v54 }
 0x6a4   :  { %3102 = vtanh.f32 %v632_v56 }
 0x6a5   :  { %3104 = vpow2.f32 %v2865_v58 }
 0x6b1   :  { %v3103_v57 = vpop.eup %3102 }
 0x6b2   :  { %635 = vrot.lane.b32.xlu0 %v3103_v57, %s3538_s4  ;;  %v3105_v59 = vpop.eup %3104 }
 0x6b3   :  { %v616_v60 = vadd.f32 1.0, %v3105_v59 }
 0x6b5   :  { %3106 = vrcp.f32 %v616_v60 }
 0x6c2   :  { %v3107_v61 = vpop.eup %3106 }
 0x724   :  { %v636_v62 = vpop.permute.xlu0 %635 }
 0x725   :  { %v638_v63 = vmul.f32 %v3107_v61, %v636_v62  ;;  %v324_v61 = vadd.f32 %v323_v14, %v3727_v21 }
 0x727   :  { %v639_v7 = vpack.c.bf16 %v638_v63, %v638_v63 }
 0x729   :  { %2866 = vmatmul.mubr.msk.bf16.vlgmr.msra.gmra.mxu0 %vm408_vm2, %v639_v7 }
 0x72a   :  { %806 = vmatpush1.bf16.msra.mxu0 %v3668_v3  ;;  %829 = vmatprep.mubr.bf16.mxu0 %v3537_v1 }
 0x72b   :  { %807 = vmatprep.subr.bf16.mxu0 %v3671_v4 }
 0x72e   :  { %808 = vmatpush1.bf16.msra.mxu0 %v3674_v5 }
 0x72f   :  { %809 = vmatprep.subr.bf16.mxu0 %v3676_v6 }
 0x732   :  { %810 = vmatpush1.bf16.msra.mxu0 %v3682_v10 }
 0x733   :  { %811 = vmatprep.subr.bf16.mxu0 %v3684_v11 }
 0x736   :  { %812 = vmatpush1.bf16.msra.mxu0 %v3690_v12 }
 0x737   :  { %959 = vmatprep.subr.bf16.mxu0 %v3666_v2 }
 0x7e9   :  { %v677_v34 = vpop.f32.mrf.mxu0 }
 0x7ea   :  { %v684_v36 = vadd.f32 %v677_v34, %v316_v33 }
 0x7eb   :  { %v679_v37 = vpop.f32.mrf.mxu0 }
 0x7ec   :  { %v685_v38 = vadd.f32 %v679_v37, %v318_v35  ;;  %v2867_v42 = vmul.f32 -1.442695, %v684_v36 }
 0x7ed   :  { %v681_v39 = vpop.f32.mrf.mxu0 }
 0x7ee   :  { %3108 = vtanh.f32 %v685_v38  ;;  %v2868_v52 = vmul.f32 -1.442695, %v685_v38 }
 0x7ef   :  { %v682_v40 = vpop.f32.mrf.mxu0  ;;  %3110 = vpow2.f32 %v2867_v42 }
 0x7fb   :  { %v3109_v41 = vpop.eup %3108 }
 0x7fc   :  { %701 = vrot.lane.b32.xlu1 %v3109_v41, %s3538_s4  ;;  %v3111_v43 = vpop.eup %3110 }
 0x7fd   :  { %v692_v44 = vadd.f32 1.0, %v3111_v43 }
 0x7ff   :  { %3112 = vrcp.f32 %v692_v44 }
 0x80c   :  { %v3113_v45 = vpop.eup %3112 }
 0x80d   :  { %v699_v48 = vmul.f32 %v3113_v45, %v632_v56  ;;  %v322_v56 = vadd.f32 %v321_v13, %v3721_v17 }
 0x86e   :  { %v702_v46 = vpop.permute.xlu1 %701 }
 0x86f   :  { %v704_v47 = vmul.f32 %v3113_v45, %v702_v46 }
 0x871   :  { %706 = vrot.lane.b32.xlu0 %v704_v47, %s3538_s4 }
 0x8e3   :  { %v707_v49 = vpop.permute.xlu0 %706 }
 0x8e4   :  { %v709_v50 = vadd.f32 %v707_v49, %v699_v48  ;;  %v328_v49 = vadd.f32 %v3832_v16, %v3721_v17 }
 0x8e6   :  { %3114 = vtanh.f32 %v709_v50 }
 0x8e7   :  { %3116 = vpow2.f32 %v2868_v52 }
 0x8f3   :  { %v3115_v51 = vpop.eup %3114 }
 0x8f4   :  { %712 = vrot.lane.b32.xlu1 %v3115_v51, %s3538_s4  ;;  %v3117_v53 = vpop.eup %3116  ;;  %v330_v51 = vadd.f32 %v3834_v19, %v3727_v21 }
 0x8f5   :  { %v693_v54 = vadd.f32 1.0, %v3117_v53 }
 0x8f7   :  { %3118 = vrcp.f32 %v693_v54 }
 0x904   :  { %v3119_v55 = vpop.eup %3118 }
 0x966   :  { %v713_v57 = vpop.permute.xlu1 %712 }
 0x967   :  { %v715_v58 = vmul.f32 %v3119_v55, %v713_v57 }
 0x969   :  { %v716_v59 = vpack.c.bf16 %v715_v58, %v715_v58 }
 0x96b   :  { %2869 = vmatmul.mubr.msk.bf16.vlgmr.msra.gmra.mxu1 %vm408_vm2, %v716_v59 }
 0x96c   :  { %883 = vmatpush1.bf16.msra.mxu1 %v3668_v3  ;;  %906 = vmatprep.mubr.bf16.mxu1 %v3537_v1 }
 0x96d   :  { %884 = vmatprep.subr.bf16.mxu1 %v3671_v4 }
 0x970   :  { %885 = vmatpush1.bf16.msra.mxu1 %v3674_v5 }
 0x971   :  { %886 = vmatprep.subr.bf16.mxu1 %v3676_v6 }
 0x974   :  { %887 = vmatpush1.bf16.msra.mxu1 %v3682_v10 }
 0x975   :  { %888 = vmatprep.subr.bf16.mxu1 %v3684_v11 }
 0x978   :  { %889 = vmatpush1.bf16.msra.mxu1 %v3690_v12 }
 0x979   :  { %1036 = vmatprep.subr.bf16.mxu1 %v3666_v2 }
 0xa2b   :  { %v754_v60 = vpop.f32.mrf.mxu1 }
 0xa2c   :  { %v761_v62 = vadd.f32 %v754_v60, %v322_v56 }
 0xa2d   :  { %v756_v63 = vpop.f32.mrf.mxu1 }
 0xa2e   :  { %v762_v7 = vadd.f32 %v756_v63, %v324_v61  ;;  %v2870_v34 = vmul.f32 -1.442695, %v761_v62 }
 0xa2f   :  { %v758_v8 = vpop.f32.mrf.mxu1 }
 0xa30   :  { %3120 = vtanh.f32 %v762_v7  ;;  %v2871_v42 = vmul.f32 -1.442695, %v762_v7 }
 0xa31   :  { %v759_v9 = vpop.f32.mrf.mxu1  ;;  %3122 = vpow2.f32 %v2870_v34 }
 0xa3d   :  { %v3121_v33 = vpop.eup %3120 }
 0xa3e   :  { %778 = vrot.lane.b32.xlu0 %v3121_v33, %s3538_s4  ;;  %v3123_v35 = vpop.eup %3122 }
 0xa3f   :  { %v769_v36 = vadd.f32 1.0, %v3123_v35 }
 0xa41   :  { %3124 = vrcp.f32 %v769_v36 }
 0xa4e   :  { %v3125_v37 = vpop.eup %3124 }
 0xa4f   :  { %v776_v14 = vmul.f32 %v3125_v37, %v709_v50 }
 0xab0   :  { %v779_v38 = vpop.permute.xlu0 %778 }
 0xab1   :  { %v781_v13 = vmul.f32 %v3125_v37, %v779_v38 }
 0xab3   :  { %783 = vrot.lane.b32.xlu1 %v781_v13, %s3538_s4  ;;  %v334_v13 = vadd.f32 %v3836_v20, %v3721_v17 }
 0xb25   :  { %v784_v39 = vpop.permute.xlu1 %783 }
 0xb26   :  { %v786_v40 = vadd.f32 %v784_v39, %v776_v14  ;;  %v336_v39 = vadd.f32 %v3838_v22, %v3727_v21 }
 0xb28   :  { %3126 = vtanh.f32 %v786_v40 }
 0xb29   :  { %3128 = vpow2.f32 %v2871_v42 }
 0xb35   :  { %v3127_v41 = vpop.eup %3126 }
 0xb36   :  { %789 = vrot.lane.b32.xlu0 %v3127_v41, %s3538_s4  ;;  %v3129_v43 = vpop.eup %3128 }
 0xb37   :  { %v770_v44 = vadd.f32 1.0, %v3129_v43 }
 0xb39   :  { %3130 = vrcp.f32 %v770_v44 }
 0xb46   :  { %v3131_v45 = vpop.eup %3130 }
 0xba8   :  { %v790_v46 = vpop.permute.xlu0 %789 }
 0xba9   :  { %v3880_v47 = vmul.f32 %v3131_v45, %v790_v46 }
 0xbab   :  { %v793_v48 = vpack.c.bf16 %v3880_v47, %v3880_v47 }
 0xbad   :  { %2872 = vmatmul.mubr.msk.bf16.vlgmr.msra.gmra.mxu0 %vm408_vm2, %v793_v48 }
 0xbae   :  { %960 = vmatpush1.bf16.msra.mxu0 %v3668_v3  ;;  %983 = vmatprep.mubr.bf16.mxu0 %v3537_v1 }
 0xbaf   :  { %961 = vmatprep.subr.bf16.mxu0 %v3671_v4 }
 0xbb2   :  { %962 = vmatpush1.bf16.msra.mxu0 %v3674_v5 }
 0xbb3   :  { %963 = vmatprep.subr.bf16.mxu0 %v3676_v6 }
 0xbb6   :  { %964 = vmatpush1.bf16.msra.mxu0 %v3682_v10 }
 0xbb7   :  { %965 = vmatprep.subr.bf16.mxu0 %v3684_v11 }
 0xbba   :  { %966 = vmatpush1.bf16.msra.mxu0 %v3690_v12 }
 0xbbb   :  { %1113 = vmatprep.subr.bf16.mxu0 %v3666_v2 }
 0xc6d   :  { %v831_v50 = vpop.f32.mrf.mxu0 }
 0xc6e   :  { %v838_v52 = vadd.f32 %v831_v50, %v328_v49 }
 0xc6f   :  { %v833_v53 = vpop.f32.mrf.mxu0 }
 0xc70   :  { %v839_v54 = vadd.f32 %v833_v53, %v330_v51  ;;  %v2873_v59 = vmul.f32 -1.442695, %v838_v52 }
 0xc71   :  { %v835_v55 = vpop.f32.mrf.mxu0 }
 0xc72   :  { %3132 = vtanh.f32 %v839_v54  ;;  %v2874_v9 = vmul.f32 -1.442695, %v839_v54 }
 0xc73   :  { %v836_v57 = vpop.f32.mrf.mxu0  ;;  %3134 = vpow2.f32 %v2873_v59 }
 0xc7f   :  { %v3133_v58 = vpop.eup %3132 }
 0xc80   :  { %855 = vrot.lane.b32.xlu1 %v3133_v58, %s3538_s4  ;;  %v3135_v56 = vpop.eup %3134 }
 0xc81   :  { %v846_v60 = vadd.f32 1.0, %v3135_v56 }
 0xc83   :  { %3136 = vrcp.f32 %v846_v60 }
 0xc90   :  { %v3137_v61 = vpop.eup %3136 }
 0xc91   :  { %v853_v19 = vmul.f32 %v3137_v61, %v786_v40 }
 0xcf2   :  { %v856_v16 = vpop.permute.xlu1 %855 }
 0xcf3   :  { %v858_v62 = vmul.f32 %v3137_v61, %v856_v16  ;;  %v340_v16 = vadd.f32 %v3840_v23, %v3721_v17 }
 0xcf5   :  { %860 = vrot.lane.b32.xlu0 %v858_v62, %s3538_s4 }
 0xd67   :  { %v861_v63 = vpop.permute.xlu0 %860 }
 0xd68   :  { %v863_v7 = vadd.f32 %v861_v63, %v853_v19  ;;  %v342_v19 = vadd.f32 %v3842_v24, %v3727_v21 }
 0xd6a   :  { %3138 = vtanh.f32 %v863_v7 }
 0xd6b   :  { %3140 = vpow2.f32 %v2874_v9 }
 0xd77   :  { %v3139_v8 = vpop.eup %3138 }
 0xd78   :  { %866 = vrot.lane.b32.xlu1 %v3139_v8, %s3538_s4  ;;  %v3141_v33 = vpop.eup %3140 }
 0xd79   :  { %v847_v34 = vadd.f32 1.0, %v3141_v33 }
 0xd7b   :  { %3142 = vrcp.f32 %v847_v34 }
 0xd88   :  { %v3143_v35 = vpop.eup %3142 }
 0xdea   :  { %v867_v36 = vpop.permute.xlu1 %866 }
 0xdeb   :  { %v3901_v37 = vmul.f32 %v3143_v35, %v867_v36 }
 0xded   :  { %v870_v38 = vpack.c.bf16 %v3901_v37, %v3901_v37 }
 0xdef   :  { %2875 = vmatmul.mubr.msk.bf16.vlgmr.msra.gmra.mxu1 %vm408_vm2, %v870_v38 }
 0xdf0   :  { %1037 = vmatpush1.bf16.msra.mxu1 %v3668_v3  ;;  %1060 = vmatprep.mubr.bf16.mxu1 %v3537_v1 }
 0xdf1   :  { %1038 = vmatprep.subr.bf16.mxu1 %v3671_v4 }
 0xdf4   :  { %1039 = vmatpush1.bf16.msra.mxu1 %v3674_v5 }
 0xdf5   :  { %1040 = vmatprep.subr.bf16.mxu1 %v3676_v6 }
 0xdf8   :  { %1041 = vmatpush1.bf16.msra.mxu1 %v3682_v10 }
 0xdf9   :  { %1042 = vmatprep.subr.bf16.mxu1 %v3684_v11 }
 0xdfc   :  { %1043 = vmatpush1.bf16.msra.mxu1 %v3690_v12 }
 0xdfd   :  { %1190 = vmatprep.subr.bf16.mxu1 %v3666_v2 }
 0xeaf   :  { %v908_v14 = vpop.f32.mrf.mxu1 }
 0xeb0   :  { %v915_v40 = vadd.f32 %v908_v14, %v334_v13 }
 0xeb1   :  { %v910_v41 = vpop.f32.mrf.mxu1 }
 0xeb2   :  { %v916_v42 = vadd.f32 %v910_v41, %v336_v39  ;;  %v2876_v46 = vmul.f32 -1.442695, %v915_v40 }
 0xeb3   :  { %v912_v43 = vpop.f32.mrf.mxu1 }
 0xeb4   :  { %3144 = vtanh.f32 %v916_v42  ;;  %v2877_v55 = vmul.f32 -1.442695, %v916_v42 }
 0xeb5   :  { %v913_v44 = vpop.f32.mrf.mxu1  ;;  %3146 = vpow2.f32 %v2876_v46 }
 0xec1   :  { %v3145_v45 = vpop.eup %3144 }
 0xec2   :  { %932 = vrot.lane.b32.xlu0 %v3145_v45, %s3538_s4  ;;  %v3147_v48 = vpop.eup %3146 }
 0xec3   :  { %v923_v49 = vadd.f32 1.0, %v3147_v48 }
 0xec5   :  { %3148 = vrcp.f32 %v923_v49  ;;  %v346_v49 = vadd.f32 %v3844_v25, %v3721_v17 }
 0xed2   :  { %v3149_v50 = vpop.eup %3148 }
 0xed3   :  { %v930_v22 = vmul.f32 %v3149_v50, %v863_v7 }
 0xf34   :  { %v933_v20 = vpop.permute.xlu0 %932 }
 0xf35   :  { %v935_v51 = vmul.f32 %v3149_v50, %v933_v20 }
 0xf37   :  { %937 = vrot.lane.b32.xlu1 %v935_v51, %s3538_s4 }
 0xfa9   :  { %v938_v52 = vpop.permute.xlu1 %937 }
 0xfaa   :  { %v940_v53 = vadd.f32 %v938_v52, %v930_v22 }
 0xfac   :  { %3150 = vtanh.f32 %v940_v53 }
 0xfad   :  { %3152 = vpow2.f32 %v2877_v55 }
 0xfb9   :  { %v3151_v54 = vpop.eup %3150 }
 0xfba   :  { %943 = vrot.lane.b32.xlu0 %v3151_v54, %s3538_s4  ;;  %v3153_v57 = vpop.eup %3152 }
 0xfbb   :  { %v924_v58 = vadd.f32 1.0, %v3153_v57 }
 0xfbd   :  { %3154 = vrcp.f32 %v924_v58 }
 0xfca   :  { %v3155_v59 = vpop.eup %3154 }
0x102c   :  { %v944_v56 = vpop.permute.xlu0 %943 }
0x102d   :  { %v3922_v60 = vmul.f32 %v3155_v59, %v944_v56 }
0x102f   :  { %v947_v61 = vpack.c.bf16 %v3922_v60, %v3922_v60 }
0x1031   :  { %2878 = vmatmul.mubr.msk.bf16.vlgmr.msra.gmra.mxu0 %vm408_vm2, %v947_v61 }
0x1032   :  { %1114 = vmatpush1.bf16.msra.mxu0 %v3668_v3  ;;  %1137 = vmatprep.mubr.bf16.mxu0 %v3537_v1 }
0x1033   :  { %1115 = vmatprep.subr.bf16.mxu0 %v3671_v4 }
0x1036   :  { %1116 = vmatpush1.bf16.msra.mxu0 %v3674_v5 }
0x1037   :  { %1117 = vmatprep.subr.bf16.mxu0 %v3676_v6 }
0x103a   :  { %1118 = vmatpush1.bf16.msra.mxu0 %v3682_v10 }
0x103b   :  { %1119 = vmatprep.subr.bf16.mxu0 %v3684_v11 }
0x103e   :  { %1120 = vmatpush1.bf16.msra.mxu0 %v3690_v12 }
0x103f   :  { %1267 = vmatprep.subr.bf16.mxu0 %v3666_v2 }
0x10f1   :  { %v985_v62 = vpop.f32.mrf.mxu0 }
0x10f2   :  { %v992_v63 = vadd.f32 %v985_v62, %v340_v16 }
0x10f3   :  { %v987_v7 = vpop.f32.mrf.mxu0 }
0x10f4   :  { %v993_v8 = vadd.f32 %v987_v7, %v342_v19  ;;  %v2879_v35 = vmul.f32 -1.442695, %v992_v63  ;;  %v3348_v7 = vld [vmem:[#allocation5 + $0x30] ss:$8 sps:$4 sm:$0xff]  }
0x10f5   :  { %v989_v9 = vpop.f32.mrf.mxu0 }
0x10f6   :  { %3156 = vtanh.f32 %v993_v8  ;;  %v2880_v41 = vmul.f32 -1.442695, %v993_v8  ;;  %v3349_v8 = vld [vmem:[#allocation5 + $0x24] ss:$8 sps:$4 sm:$0xff]   ;;  %v3350_v9 = vld [vmem:[#allocation5 + $0x20] ss:$8 sps:$4 sm:$0xff]  }
0x10f7   :  { %v990_v33 = vpop.f32.mrf.mxu0  ;;  %3158 = vpow2.f32 %v2879_v35  ;;  %v3353_v35 = vld [vmem:[#allocation5 + $0x4] ss:$8 sps:$4 sm:$0xff]  }
0x10f8   :  { %v3351_v33 = vld [vmem:[#allocation5 + $0x14] ss:$8 sps:$4 sm:$0xff]  }
0x1103   :  { %v3157_v34 = vpop.eup %3156 }
0x1104   :  { %1009 = vrot.lane.b32.xlu1 %v3157_v34, %s3538_s4  ;;  %v3159_v36 = vpop.eup %3158  ;;  %v3352_v34 = vld [vmem:[#allocation5 + $0x10] ss:$8 sps:$4 sm:$0xff]  }
0x1105   :  { %v1000_v2 = vadd.f32 1.0, %v3159_v36  ;;  %v352_v36 = vadd.f32 %v3848_v27, %v3721_v17 }
0x1107   :  { %3160 = vrcp.f32 %v1000_v2 }
0x1114   :  { %v3161_v38 = vpop.eup %3160 }
0x1115   :  { %v1007_v24 = vmul.f32 %v3161_v38, %v940_v53 }
0x1176   :  { %v1010_v23 = vpop.permute.xlu1 %1009 }
0x1177   :  { %v1012_v13 = vmul.f32 %v3161_v38, %v1010_v23  ;;  %v354_v38 = vadd.f32 %v3850_v28, %v3727_v21 }
0x1179   :  { %1014 = vrot.lane.b32.xlu0 %v1012_v13, %s3538_s4 }
0x11eb   :  { %v1015_v14 = vpop.permute.xlu0 %1014 }
0x11ec   :  { %v1017_v39 = vadd.f32 %v1015_v14, %v1007_v24 }
0x11ee   :  { %3162 = vtanh.f32 %v1017_v39 }
0x11ef   :  { %3164 = vpow2.f32 %v2880_v41 }
0x11fb   :  { %v3163_v40 = vpop.eup %3162 }
0x11fc   :  { %1020 = vrot.lane.b32.xlu1 %v3163_v40, %s3538_s4  ;;  %v3165_v42 = vpop.eup %3164 }
0x11fd   :  { %v1001_v43 = vadd.f32 1.0, %v3165_v42 }
0x11ff   :  { %3166 = vrcp.f32 %v1001_v43 }
0x120c   :  { %v3167_v44 = vpop.eup %3166 }
0x126e   :  { %v1021_v45 = vpop.permute.xlu1 %1020 }
0x126f   :  { %v3943_v46 = vmul.f32 %v3167_v44, %v1021_v45 }
0x1271   :  { %v1024_v48 = vpack.c.bf16 %v3943_v46, %v3943_v46 }
0x1273   :  { %2881 = vmatmul.mubr.msk.bf16.vlgmr.msra.gmra.mxu1 %vm408_vm2, %v1024_v48 }
0x1274   :  { %1191 = vmatpush1.bf16.msra.mxu1 %v3668_v3  ;;  %1214 = vmatprep.mubr.bf16.mxu1 %v3537_v1  ;;  %v348_v3 = vadd.f32 %v3846_v26, %v3727_v21 }
0x1275   :  { %1192 = vmatprep.subr.bf16.mxu1 %v3671_v4 }
0x1278   :  { %1193 = vmatpush1.bf16.msra.mxu1 %v3674_v5 }
0x1279   :  { %1194 = vmatprep.subr.bf16.mxu1 %v3676_v6 }
0x127c   :  { %1195 = vmatpush1.bf16.msra.mxu1 %v3682_v10 }
0x127d   :  { %1196 = vmatprep.subr.bf16.mxu1 %v3684_v11 }
0x1280   :  { %1197 = vmatpush1.bf16.msra.mxu1 %v3690_v12 }
0x1333   :  { %v1062_v50 = vpop.f32.mrf.mxu1 }
0x1334   :  { %v1069_v20 = vadd.f32 %v1062_v50, %v346_v49  ;;  %v1347_v49 = vld [vmem:[%s4392_s5 + $0x78] sm:$0xff] }
0x1335   :  { %v1064_v51 = vpop.f32.mrf.mxu1  ;;  %1400 = vmatprep.subr.mxu1 %v1347_v49 }
0x1336   :  { %v1070_v4 = vadd.f32 %v1064_v51, %v348_v3  ;;  %v2882_v10 = vmul.f32 -1.442695, %v1069_v20 }
0x1337   :  { %v1066_v22 = vpop.f32.mrf.mxu1 }
0x1338   :  { %3168 = vtanh.f32 %v1070_v4  ;;  %v2883_v59 = vmul.f32 -1.442695, %v1070_v4 }
0x1339   :  { %v1067_v5 = vpop.f32.mrf.mxu1  ;;  %3170 = vpow2.f32 %v2882_v10  ;;  %v1346_v10 = vld [vmem:[%s4392_s5 + $0x70] sm:$0xff] }
0x1345   :  { %v3169_v6 = vpop.eup %3168 }
0x1346   :  { %1086 = vrot.lane.b32.xlu0 %v3169_v6, %s3538_s4  ;;  %v3171_v11 = vpop.eup %3170 }
0x1347   :  { %v1077_v52 = vadd.f32 1.0, %v3171_v11  ;;  %v1345_v11 = vld [vmem:[%s4392_s5 + $0x68] sm:$0xff] }
0x1349   :  { %3172 = vrcp.f32 %v1077_v52  ;;  %v1344_v52 = vld [vmem:[%s4392_s5 + $0x60] sm:$0xff] }
0x1356   :  { %v3173_v53 = vpop.eup %3172 }
0x1357   :  { %v1084_v26 = vmul.f32 %v3173_v53, %v1017_v39 }
0x13b8   :  { %v1087_v25 = vpop.permute.xlu0 %1086 }
0x13b9   :  { %v1089_v54 = vmul.f32 %v3173_v53, %v1087_v25  ;;  %v1343_v53 = vld [vmem:[%s4392_s5 + $0x58] sm:$0xff]  ;;  %v1342_v25 = vld [vmem:[%s4392_s5 + $0x50] sm:$0xff] }
0x13bb   :  { %1091 = vrot.lane.b32.xlu1 %v1089_v54, %s3538_s4  ;;  %v1341_v54 = vld [vmem:[%s4392_s5 + $0x48] sm:$0xff] }
0x142d   :  { %v1092_v55 = vpop.permute.xlu1 %1091 }
0x142e   :  { %v1094_v57 = vadd.f32 %v1092_v55, %v1084_v26  ;;  %v1340_v26 = vld [vmem:[%s4392_s5 + $0x40] sm:$0xff]  ;;  %v1339_v55 = vld [vmem:[%s4392_s5 + $0x38] sm:$0xff] }
0x1430   :  { %3174 = vtanh.f32 %v1094_v57 }
0x1431   :  { %3176 = vpow2.f32 %v2883_v59  ;;  %v1336_v59 = vld [vmem:[%s4392_s5 + $0x20] sm:$0xff] }
0x143d   :  { %v3175_v58 = vpop.eup %3174 }
0x143e   :  { %1097 = vrot.lane.b32.xlu0 %v3175_v58, %s3538_s4  ;;  %v3177_v56 = vpop.eup %3176  ;;  %v1337_v58 = vld [vmem:[%s4392_s5 + $0x28] sm:$0xff] }
0x143f   :  { %v1078_v61 = vadd.f32 1.0, %v3177_v56  ;;  %v1335_v56 = vld [vmem:[%s4392_s5 + $0x18] sm:$0xff] }
0x1441   :  { %3178 = vrcp.f32 %v1078_v61  ;;  %v1334_v61 = vld [vmem:[%s4392_s5 + $0x10] sm:$0xff] }
0x144e   :  { %v3179_v16 = vpop.eup %3178 }
0x14b0   :  { %v1098_v62 = vpop.permute.xlu0 %1097 }
0x14b1   :  { %v3963_v19 = vmul.f32 %v3179_v16, %v1098_v62  ;;  %v1333_v16 = vld [vmem:[%s4392_s5 + $0x8] sm:$0xff]  ;;  %v1332_v62 = vld [vmem:[%s4392_s5] sm:$0xff] }
0x14b3   :  { %v1101_v63 = vpack.c.bf16 %v3963_v19, %v3963_v19 }
0x14b5   :  { %2884 = vmatmul.mubr.msk.bf16.vlgmr.msra.gmra.mxu0 %vm408_vm2, %v1101_v63 }
0x14b6   :  { %1268 = vmatpush1.bf16.msra.mxu0 %v3348_v7  ;;  %1291 = vmatprep.mubr.bf16.mxu0 %v3537_v1 }
0x14b7   :  { %1269 = vmatprep.subr.bf16.mxu0 %v3349_v8 }
0x14ba   :  { %1270 = vmatpush1.bf16.msra.mxu0 %v3350_v9 }
0x14bb   :  { %1271 = vmatprep.subr.bf16.mxu0 %v3351_v33 }
0x14be   :  { %1272 = vmatpush1.bf16.msra.mxu0 %v3352_v34 }
0x14bf   :  { %1273 = vmatprep.subr.bf16.mxu0 %v3353_v35 }
0x14c2   :  { %1274 = vmatpush1.bf16.msra.mxu0 %v3690_v12 }
0x1575   :  { %v1139_v2 = vpop.f32.mrf.mxu0 }
0x1576   :  { %v1146_v23 = vadd.f32 %v1139_v2, %v352_v36 }
0x1577   :  { %v1141_v13 = vpop.f32.mrf.mxu0 }
0x1578   :  { %v1147_v24 = vadd.f32 %v1141_v13, %v354_v38  ;;  %v2885_v41 = vmul.f32 -1.442695, %v1146_v23  ;;  %v4057_v13 = vld [vmem:[#allocation7 + $0x34] ss:$8 sps:$4 sm:$0xff]  }
0x1579   :  { %v1143_v14 = vpop.f32.mrf.mxu0  ;;  %1545 = vmatprep.subr.bf16.mxu0 %v4057_v13 }
0x157a   :  { %3180 = vtanh.f32 %v1147_v24  ;;  %v2886_v3 = vmul.f32 -1.442695, %v1147_v24  ;;  %v4059_v24 = vld [vmem:[#allocation7 + $0x30] ss:$8 sps:$4 sm:$0xff]   ;;  %v4064_v14 = vld [vmem:[#allocation7 + $0x24] ss:$8 sps:$4 sm:$0xff]  }
0x157b   :  { %v1144_v39 = vpop.f32.mrf.mxu0  ;;  %3182 = vpow2.f32 %v2885_v41  ;;  %v4072_v41 = vld [vmem:[#allocation7 + $0x10] ss:$8 sps:$4 sm:$0xff]  }
0x157c   :  { %v4066_v39 = vld [vmem:[#allocation7 + $0x20] ss:$8 sps:$4 sm:$0xff]  }
0x1587   :  { %v3181_v40 = vpop.eup %3180 }
0x1588   :  { %1163 = vrot.lane.b32.xlu1 %v3181_v40, %s3538_s4  ;;  %v3183_v42 = vpop.eup %3182  ;;  %v4070_v40 = vld [vmem:[#allocation7 + $0x14] ss:$8 sps:$4 sm:$0xff]  }
0x1589   :  { %v1154_v12 = vadd.f32 1.0, %v3183_v42 }
0x158b   :  { %3184 = vrcp.f32 %v1154_v12  ;;  %v4077_v12 = vld [vmem:[#allocation7 + $0x4] ss:$8 sps:$4 sm:$0xff]  }
0x1598   :  { %v3185_v43 = vpop.eup %3184 }
0x1599   :  { %v1161_v28 = vmul.f32 %v3185_v43, %v1094_v57  ;;  %v1338_v57 = vld [vmem:[%s4392_s5 + $0x30] sm:$0xff] }
0x15fa   :  { %v1164_v27 = vpop.permute.xlu1 %1163 }
0x15fb   :  { %v1166_v44 = vmul.f32 %v3185_v43, %v1164_v27  ;;  %v4079_v43 = vld [vmem:[#allocation7] ss:$8 sps:$4 sm:$0xff]  }
0x15fd   :  { %1168 = vrot.lane.b32.xlu0 %v1166_v44, %s3538_s4 }
0x166f   :  { %v1169_v45 = vpop.permute.xlu0 %1168 }
0x1670   :  { %v3976_v48 = vadd.f32 %v1169_v45, %v1161_v28 }
0x1672   :  { %3186 = vtanh.f32 %v3976_v48 }
0x1673   :  { %3188 = vpow2.f32 %v2886_v3  ;;  %v364_v3 = vadd.f32 %v3856_v31, %v3721_v17 }
0x167f   :  { %v3187_v50 = vpop.eup %3186 }
0x1680   :  { %1174 = vrot.lane.b32.xlu1 %v3187_v50, %s3538_s4  ;;  %v3189_v20 = vpop.eup %3188 }
0x1681   :  { %v1155_v51 = vadd.f32 1.0, %v3189_v20 }
0x1683   :  { %3190 = vrcp.f32 %v1155_v51 }
0x1690   :  { %v3191_v4 = vpop.eup %3190 }
0x16f2   :  { %v1175_v22 = vpop.permute.xlu1 %1174 }
0x16f3   :  { %v1177_v5 = vmul.f32 %v3191_v4, %v1175_v22 }
0x16f5   :  { %v1178_v6 = vpack.c.bf16 %v1177_v5, %v1177_v5 }
0x16f7   :  { %2887 = vmatmul.mubr.msk.bf16.vlgmr.msra.gmra.mxu1 %vm408_vm2, %v1178_v6  ;;  %v1348_v6 = vld [vmem:[#allocation8] sm:$0x3] }
0x16f8   :  { %1401 = vmatpush1.msra.mxu1 %v1346_v10  ;;  %1448 = vmatprep.mubr.f32.mxu1 %v3536_v0  ;;  %v4109_v10 = vrot.slane %v1348_v6, %v3715_v15 }
0x16f9   :  { %1402 = vmatprep.subr.mxu1 %v1345_v11 }
0x16fa   :  { %1403 = vmatpush1.msra.mxu1 %v1344_v52 }
0x16fb   :  { %1404 = vmatprep.subr.mxu1 %v1343_v53  ;;  %v4113_v53 = vrot.slane %v1348_v6, %v3723_v18 }
0x16fc   :  { %1405 = vmatpush1.msra.mxu1 %v1342_v25 }
0x16fd   :  { %1406 = vmatprep.subr.mxu1 %v1341_v54 }
0x16fe   :  { %1407 = vmatpush1.msra.mxu1 %v1340_v26 }
0x16ff   :  { %1408 = vmatprep.subr.mxu1 %v1339_v55 }
0x1700   :  { %1409 = vmatpush1.msra.mxu1 %v1338_v57 }
0x1701   :  { %1410 = vmatprep.subr.mxu1 %v1337_v58 }
0x1702   :  { %1411 = vmatpush1.msra.mxu1 %v1336_v59 }
0x1703   :  { %1412 = vmatprep.subr.mxu1 %v1335_v56 }
0x1704   :  { %1413 = vmatpush1.msra.mxu1 %v1334_v61 }
0x1705   :  { %1414 = vmatprep.subr.mxu1 %v1333_v16 }
0x1706   :  { %1415 = vmatpush1.msra.mxu1 %v1332_v62  ;;  %v366_v62 = vadd.f32 %v3858_v32, %v3727_v21 }
0x1707   :  { %2893 = vmatmul.mubr.msk.f32.vlgmr.msra.gmra.mxu1 %vm408_vm2, %v3880_v47  ;;  %v358_v47 = vadd.f32 %v3852_v29, %v3721_v17  ;;  %1699 = vmatprep.subr.bf16.mxu1 %v4057_v13 }
0x1708   :  { %1454 = vmatprep.mubr.f32.mxu1 %v3536_v0  ;;  %1700 = vmatpush1.bf16.msra.mxu1 %v4059_v24 }
0x1709   :  { %1701 = vmatprep.subr.bf16.mxu1 %v4064_v14 }
0x170b   :  { %2894 = vmatmul.mubr.msk.f32.gmra.mxu1 %vm408_vm2, %v3901_v37 }
0x170c   :  { %1460 = vmatprep.mubr.f32.mxu1 %v3536_v0  ;;  %1702 = vmatpush1.bf16.msra.mxu1 %v4066_v39 }
0x170d   :  { %1703 = vmatprep.subr.bf16.mxu1 %v4070_v40 }
0x170f   :  { %2895 = vmatmul.mubr.msk.f32.gmra.mxu1 %vm408_vm2, %v3922_v60  ;;  %v360_v60 = vadd.f32 %v3854_v30, %v3727_v21 }
0x1710   :  { %1466 = vmatprep.mubr.f32.mxu1 %v3536_v0  ;;  %1704 = vmatpush1.bf16.msra.mxu1 %v4072_v41 }
0x1711   :  { %1705 = vmatprep.subr.bf16.mxu1 %v4077_v12 }
0x1713   :  { %2896 = vmatmul.mubr.msk.f32.gmra.mxu1 %vm408_vm2, %v3943_v46 }
0x1714   :  { %1472 = vmatprep.mubr.f32.mxu1 %v3536_v0  ;;  %1706 = vmatpush1.bf16.msra.mxu1 %v4079_v43 }
0x1715   :  { %1853 = vmatprep.subr.bf16.mxu1 %v4057_v13 }
0x1717   :  { %2897 = vmatmul.mubr.msk.f32.gmra.mxu1 %vm408_vm2, %v3963_v19 }
0x1718   :  { %1478 = vmatprep.mubr.f32.mxu1 %v3536_v0 }
0x171b   :  { %2898 = vmatmul.mubr.msk.f32.gmra.mxu1 %vm408_vm2, %v1177_v5 }
0x171c   :  { %1484 = vmatprep.mubr.f32.mxu1 %v3536_v0 }
0x17b7   :  { %v1216_v37 = vpop.f32.mrf.mxu1 }
0x17b8   :  { %v1223_v63 = vadd.f32 %v1216_v37, %v358_v47 }
0x17b9   :  { %v1218_v46 = vpop.f32.mrf.mxu1 }
0x17ba   :  { %v1224_v7 = vadd.f32 %v1218_v46, %v360_v60  ;;  %v2888_v33 = vmul.f32 -1.442695, %v1223_v63 }
0x17bb   :  { %v1220_v8 = vpop.f32.mrf.mxu1 }
0x17bc   :  { %3192 = vtanh.f32 %v1224_v7  ;;  %v2889_v27 = vmul.f32 -1.442695, %v1224_v7 }
0x17bd   :  { %v1221_v9 = vpop.f32.mrf.mxu1  ;;  %3194 = vpow2.f32 %v2888_v33 }
0x17c7   :  { %v1450_v11 = vpop.f32.mrf.mxu1 }
0x17c8   :  { %v1451_v52 = vadd.f32 %v1450_v11, %v4109_v10 }
0x17c9   :  { %v3193_v19 = vpop.eup %3192  ;;  %v1452_v25 = vpop.f32.mrf.mxu1 }
0x17ca   :  { %1240 = vrot.lane.b32.xlu0 %v3193_v19, %s3538_s4  ;;  %v3195_v34 = vpop.eup %3194  ;;  %v1453_v17 = vadd.f32 %v1452_v25, %v4113_v53 }
0x17cb   :  { %v1231_v35 = vadd.f32 1.0, %v3195_v34 }
0x17cd   :  { %3196 = vrcp.f32 %v1231_v35 }
0x17da   :  { %v3197_v36 = vpop.eup %3196 }
0x17db   :  { %v1238_v30 = vmul.f32 %v3197_v36, %v3976_v48 }
0x183c   :  { %v1241_v29 = vpop.permute.xlu0 %1240 }
0x183d   :  { %v1243_v2 = vmul.f32 %v3197_v36, %v1241_v29 }
0x183f   :  { %1245 = vrot.lane.b32.xlu1 %v1243_v2, %s3538_s4 }
0x18b1   :  { %v1246_v38 = vpop.permute.xlu1 %1245 }
0x18b2   :  { %v4054_v23 = vadd.f32 %v1246_v38, %v1238_v30 }
0x18b4   :  { %3198 = vtanh.f32 %v4054_v23 }
0x18b5   :  { %3200 = vpow2.f32 %v2889_v27 }
0x18c1   :  { %v3199_v42 = vpop.eup %3198 }
0x18c2   :  { %1251 = vrot.lane.b32.xlu0 %v3199_v42, %s3538_s4  ;;  %v3201_v44 = vpop.eup %3200 }
0x18c3   :  { %v1232_v28 = vadd.f32 1.0, %v3201_v44 }
0x18c5   :  { %3202 = vrcp.f32 %v1232_v28 }
0x18d2   :  { %v3203_v45 = vpop.eup %3202 }
0x1934   :  { %v1252_v48 = vpop.permute.xlu0 %1251 }
0x1935   :  { %v1254_v49 = vmul.f32 %v3203_v45, %v1252_v48 }
0x1937   :  { %v1255_v50 = vpack.c.bf16 %v1254_v49, %v1254_v49  ;;  %2899 = vmatmul.mubr.msk.f32.gmra.mxu1 %vm408_vm2, %v1254_v49 }
0x1938   :  { %1490 = vmatprep.mubr.f32.mxu1 %v3536_v0 }
0x1939   :  { %2890 = vmatmul.mubr.msk.bf16.vlgmr.msra.gmra.mxu0 %vm408_vm2, %v1255_v50 }
0x193a   :  { %1546 = vmatpush1.bf16.msra.mxu0 %v4059_v24  ;;  %1569 = vmatprep.mubr.bf16.mxu0 %v3537_v1 }
0x193b   :  { %1547 = vmatprep.subr.bf16.mxu0 %v4064_v14 }
0x193e   :  { %1548 = vmatpush1.bf16.msra.mxu0 %v4066_v39 }
0x193f   :  { %1549 = vmatprep.subr.bf16.mxu0 %v4070_v40 }
0x1942   :  { %1550 = vmatpush1.bf16.msra.mxu0 %v4072_v41 }
0x1943   :  { %1551 = vmatprep.subr.bf16.mxu0 %v4077_v12 }
0x1946   :  { %1552 = vmatpush1.bf16.msra.mxu0 %v4079_v43 }
0x1947   :  { %1622 = vmatprep.subr.bf16.mxu0 %v4057_v13 }
0x1949   :  { %1570 = vmatmul.mubr.bf16.vlgmr.msra.gmra.mxu0 %v3537_v1 }
0x194a   :  { %1623 = vmatpush1.bf16.msra.mxu0 %v4059_v24  ;;  %1646 = vmatprep.mubr.bf16.mxu0 %v3537_v1 }
0x194b   :  { %1624 = vmatprep.subr.bf16.mxu0 %v4064_v14 }
0x194e   :  { %1625 = vmatpush1.bf16.msra.mxu0 %v4066_v39 }
0x194f   :  { %1626 = vmatprep.subr.bf16.mxu0 %v4070_v40 }
0x1952   :  { %1627 = vmatpush1.bf16.msra.mxu0 %v4072_v41 }
0x1953   :  { %1628 = vmatprep.subr.bf16.mxu0 %v4077_v12 }
0x1956   :  { %1629 = vmatpush1.bf16.msra.mxu0 %v4079_v43 }
0x1957   :  { %1776 = vmatprep.subr.bf16.mxu0 %v4057_v13 }
0x19f9   :  { %v1293_v20 = vpop.f32.mrf.mxu0 }
0x19fa   :  { %v1300_v51 = vadd.f32 %v1293_v20, %v364_v3 }
0x19fb   :  { %v1295_v4 = vpop.f32.mrf.mxu0 }
0x19fc   :  { %v1301_v47 = vadd.f32 %v1295_v4, %v366_v62  ;;  %v2891_v7 = vmul.f32 -1.442695, %v1300_v51 }
0x19fd   :  { %v1297_v22 = vpop.f32.mrf.mxu0 }
0x19fe   :  { %v1456_v22 = vpop.f32.mrf.mxu1 }
0x19ff   :  { %v1298_v5 = vpop.f32.mrf.mxu0  ;;  %v1457_v6 = vadd.f32 %v1456_v22, %v4109_v10 }
0x1a00   :  { %v1458_v5 = vpop.f32.mrf.mxu1 }
0x1a09   :  { %v1571_v54 = vpop.f32.mrf.mxu0 }
0x1a0a   :  { %v1578_v26 = vadd.f32 %v1571_v54, %v1451_v52  ;;  %v1459_v52 = vadd.f32 %v1458_v5, %v4113_v53 }
0x1a0b   :  { %v1573_v55 = vpop.f32.mrf.mxu0 }
0x1a0c   :  { %v1579_v57 = vadd.f32 %v1573_v55, %v1453_v17  ;;  %v2909_v56 = vmul.f32 -1.442695, %v1578_v26 }
0x1a0d   :  { %v1575_v31 = vpop.f32.mrf.mxu0 }
0x1a0e   :  { %3204 = vtanh.f32 %v1579_v57  ;;  %v2910_v29 = vmul.f32 -1.442695, %v1579_v57 }
0x1a0f   :  { %v1576_v58 = vpop.f32.mrf.mxu0  ;;  %3206 = vpow2.f32 %v2909_v56 }
0x1a1b   :  { %v3205_v59 = vpop.eup %3204 }
0x1a1c   :  { %1595 = vrot.lane.b32.xlu1 %v3205_v59, %s3538_s4  ;;  %v3207_v61 = vpop.eup %3206 }
0x1a1d   :  { %v1586_v16 = vadd.f32 1.0, %v3207_v61 }
0x1a1f   :  { %3208 = vrcp.f32 %v1586_v16 }
0x1a20   :  { %3210 = vtanh.f32 %v1301_v47 }
0x1a21   :  { %3212 = vpow2.f32 %v2891_v7 }
0x1a2c   :  { %v3209_v37 = vpop.eup %3208 }
0x1a2d   :  { %v3211_v46 = vpop.eup %3210  ;;  %v1593_v19 = vmul.f32 0.0, %v3209_v37 }
0x1a2e   :  { %v3213_v8 = vpop.eup %3212 }
0x1a2f   :  { %v1308_v9 = vadd.f32 1.0, %v3213_v8 }
0x1a31   :  { %3214 = vrcp.f32 %v1308_v9 }
0x1a3e   :  { %v3215_v21 = vpop.eup %3214 }
0x1a3f   :  { %v1315_v38 = vmul.f32 %v3215_v21, %v4054_v23  ;;  %v2892_v23 = vmul.f32 -1.442695, %v1301_v47 }
0x1a8e   :  { %v1596_v60 = vpop.permute.xlu1 %1595 }
0x1a8f   :  { %v1598_v63 = vmul.f32 %v3209_v37, %v1596_v60 }
0x1a91   :  { %1600 = vrot.lane.b32.xlu0 %v1598_v63, %s3538_s4 }
0x1a95   :  { %1317 = vrot.lane.b32.xlu0 %v3211_v46, %s3538_s4 }
0x1b03   :  { %v1601_v33 = vpop.permute.xlu0 %1600 }
0x1b04   :  { %v4121_v34 = vadd.f32 %v1601_v33, %v1593_v19 }
0x1b06   :  { %3216 = vtanh.f32 %v4121_v34 }
0x1b07   :  { %v1318_v32 = vpop.permute.xlu0 %1317  ;;  %3218 = vpow2.f32 %v2910_v29 }
0x1b08   :  { %v1320_v35 = vmul.f32 %v3215_v21, %v1318_v32 }
0x1b0a   :  { %1322 = vrot.lane.b32.xlu0 %v1320_v35, %s3538_s4 }
0x1b13   :  { %v3217_v36 = vpop.eup %3216 }
0x1b14   :  { %1606 = vrot.lane.b32.xlu1 %v3217_v36, %s3538_s4  ;;  %v3219_v2 = vpop.eup %3218 }
0x1b15   :  { %v1587_v30 = vadd.f32 1.0, %v3219_v2 }
0x1b17   :  { %3220 = vrcp.f32 %v1587_v30 }
0x1b24   :  { %v3221_v44 = vpop.eup %3220 }
0x1b7c   :  { %v1323_v42 = vpop.permute.xlu0 %1322 }
0x1b7d   :  { %v1325_v27 = vadd.f32 %v1323_v42, %v1315_v38 }
0x1b7f   :  { %3222 = vtanh.f32 %v1325_v27 }
0x1b80   :  { %3224 = vpow2.f32 %v2892_v23 }
0x1b86   :  { %v1607_v28 = vpop.permute.xlu1 %1606 }
0x1b87   :  { %v1609_v45 = vmul.f32 %v3221_v44, %v1607_v28 }
0x1b89   :  { %v1610_v48 = vpack.c.bf16 %v1609_v45, %v1609_v45 }
0x1b8b   :  { %2911 = vmatmul.mubr.msk.bf16.vlgmr.msra.gmra.mxu0 %vm408_vm2, %v1610_v48 }
0x1b8c   :  { %v3223_v49 = vpop.eup %3222  ;;  %1777 = vmatpush1.bf16.msra.mxu0 %v4059_v24  ;;  %1800 = vmatprep.mubr.bf16.mxu0 %v3537_v1 }
0x1b8d   :  { %1328 = vrot.lane.b32.xlu0 %v3223_v49, %s3538_s4  ;;  %1778 = vmatprep.subr.bf16.mxu0 %v4064_v14  ;;  %v3225_v50 = vpop.eup %3224 }
0x1b8e   :  { %v1309_v3 = vadd.f32 1.0, %v3225_v50 }
0x1b90   :  { %1779 = vmatpush1.bf16.msra.mxu0 %v4066_v39  ;;  %3226 = vrcp.f32 %v1309_v3 }
0x1b91   :  { %1780 = vmatprep.subr.bf16.mxu0 %v4070_v40 }
0x1b94   :  { %1781 = vmatpush1.bf16.msra.mxu0 %v4072_v41 }
0x1b95   :  { %1782 = vmatprep.subr.bf16.mxu0 %v4077_v12 }
0x1b98   :  { %1783 = vmatpush1.bf16.msra.mxu0 %v4079_v43 }
0x1b99   :  { %1930 = vmatprep.subr.bf16.mxu0 %v4057_v13 }
0x1b9d   :  { %v3227_v20 = vpop.eup %3226 }
0x1bff   :  { %v1329_v51 = vpop.permute.xlu0 %1328 }
0x1c00   :  { %v1331_v4 = vmul.f32 %v3227_v20, %v1329_v51 }
0x1c02   :  { %2900 = vmatmul.mubr.msk.f32.gmra.mxu1 %vm408_vm2, %v1331_v4 }
0x1c03   :  { %1723 = vmatprep.mubr.bf16.mxu1 %v3537_v1 }
0x1c4b   :  { %v1648_v11 = vpop.f32.mrf.mxu0 }
0x1c4c   :  { %v1655_v25 = vadd.f32 %v1648_v11, %v1457_v6 }
0x1c4d   :  { %v1650_v54 = vpop.f32.mrf.mxu0 }
0x1c4e   :  { %v1656_v26 = vadd.f32 %v1650_v54, %v1459_v52  ;;  %v2912_v57 = vmul.f32 -1.442695, %v1655_v25 }
0x1c4f   :  { %v1652_v55 = vpop.f32.mrf.mxu0 }
0x1c50   :  { %3228 = vtanh.f32 %v1656_v26  ;;  %v2913_v63 = vmul.f32 -1.442695, %v1656_v26 }
0x1c51   :  { %v1653_v17 = vpop.f32.mrf.mxu0  ;;  %3230 = vpow2.f32 %v2912_v57 }
0x1c5d   :  { %v3229_v31 = vpop.eup %3228 }
0x1c5e   :  { %1672 = vrot.lane.b32.xlu1 %v3229_v31, %s3538_s4  ;;  %v3231_v58 = vpop.eup %3230 }
0x1c5f   :  { %v1663_v59 = vadd.f32 1.0, %v3231_v58 }
0x1c61   :  { %3232 = vrcp.f32 %v1663_v59 }
0x1c6e   :  { %v3233_v56 = vpop.eup %3232 }
0x1c6f   :  { %v1670_v62 = vmul.f32 %v3233_v56, %v4121_v34  ;;  %v1462_v34 = vpop.f32.mrf.mxu1 }
0x1c70   :  { %v1463_v28 = vadd.f32 %v1462_v34, %v4109_v10 }
0x1c71   :  { %v1464_v21 = vpop.f32.mrf.mxu1 }
0x1c72   :  { %v1465_v48 = vadd.f32 %v1464_v21, %v4113_v53 }
0x1c73   :  { %v1468_v32 = vpop.f32.mrf.mxu1 }
0x1c75   :  { %v1470_v35 = vpop.f32.mrf.mxu1 }
0x1c77   :  { %v4156_v36 = vpop.f32.mrf.mxu1 }
0x1c79   :  { %v4158_v29 = vpop.f32.mrf.mxu1 }
0x1c7b   :  { %v4160_v2 = vpop.f32.mrf.mxu1 }
0x1c7d   :  { %v4162_v30 = vpop.f32.mrf.mxu1 }
0x1c7f   :  { %v4164_v38 = vpop.f32.mrf.mxu1 }
0x1c81   :  { %v4166_v42 = vpop.f32.mrf.mxu1 }
0x1cc2   :  { %v4168_v27 = vpop.f32.mrf.mxu1 }
0x1cc4   :  { %v4170_v44 = vpop.f32.mrf.mxu1 }
0x1cd0   :  { %v1673_v61 = vpop.permute.xlu1 %1672 }
0x1cd1   :  { %v1675_v16 = vmul.f32 %v3233_v56, %v1673_v61 }
0x1cd3   :  { %1677 = vrot.lane.b32.xlu1 %v1675_v16, %s3538_s4  ;;  %v1469_v16 = vadd.f32 %v1468_v32, %v4109_v10 }
0x1d45   :  { %v1678_v47 = vpop.permute.xlu1 %1677 }
0x1d46   :  { %v1680_v37 = vadd.f32 %v1678_v47, %v1670_v62  ;;  %v1471_v47 = vadd.f32 %v1470_v35, %v4113_v53 }
0x1d48   :  { %3234 = vtanh.f32 %v1680_v37 }
0x1d49   :  { %3236 = vpow2.f32 %v2913_v63 }
0x1d55   :  { %v3235_v60 = vpop.eup %3234 }
0x1d56   :  { %1683 = vrot.lane.b32.xlu1 %v3235_v60, %s3538_s4  ;;  %v3237_v46 = vpop.eup %3236 }
0x1d57   :  { %v1664_v7 = vadd.f32 1.0, %v3237_v46 }
0x1d59   :  { %3238 = vrcp.f32 %v1664_v7 }
0x1d66   :  { %v3239_v8 = vpop.eup %3238 }
0x1dc8   :  { %v1684_v9 = vpop.permute.xlu1 %1683 }
0x1dc9   :  { %v1686_v19 = vmul.f32 %v3239_v8, %v1684_v9 }
0x1dcb   :  { %v1687_v33 = vpack.c.bf16 %v1686_v19, %v1686_v19 }
0x1dcd   :  { %2914 = vmatmul.mubr.msk.bf16.vlgmr.msra.gmra.mxu1 %vm408_vm2, %v1687_v33 }
0x1dce   :  { %1854 = vmatpush1.bf16.msra.mxu1 %v4059_v24  ;;  %1877 = vmatprep.mubr.bf16.mxu1 %v3537_v1 }
0x1dcf   :  { %1855 = vmatprep.subr.bf16.mxu1 %v4064_v14 }
0x1dd2   :  { %1856 = vmatpush1.bf16.msra.mxu1 %v4066_v39 }
0x1dd3   :  { %1857 = vmatprep.subr.bf16.mxu1 %v4070_v40 }
0x1dd6   :  { %1858 = vmatpush1.bf16.msra.mxu1 %v4072_v41 }
0x1dd7   :  { %1859 = vmatprep.subr.bf16.mxu1 %v4077_v12 }
0x1dda   :  { %1860 = vmatpush1.bf16.msra.mxu1 %v4079_v43 }
0x1ddb   :  { %2007 = vmatprep.subr.bf16.mxu1 %v4057_v13 }
0x1e8d   :  { %v1725_v45 = vpop.f32.mrf.mxu1 }
0x1e8e   :  { %v1732_v49 = vadd.f32 %v1725_v45, %v1463_v28 }
0x1e8f   :  { %v1727_v23 = vpop.f32.mrf.mxu1 }
0x1e90   :  { %v1733_v50 = vadd.f32 %v1727_v23, %v1465_v48  ;;  %v2915_v4 = vmul.f32 -1.442695, %v1732_v49 }
0x1e91   :  { %v1729_v3 = vpop.f32.mrf.mxu1 }
0x1e92   :  { %3240 = vtanh.f32 %v1733_v50  ;;  %v2916_v17 = vmul.f32 -1.442695, %v1733_v50 }
0x1e93   :  { %v1730_v20 = vpop.f32.mrf.mxu1  ;;  %3242 = vpow2.f32 %v2915_v4  ;;  %v1475_v4 = vadd.f32 %v4156_v36, %v4109_v10 }
0x1e9f   :  { %v3241_v51 = vpop.eup %3240 }
0x1ea0   :  { %1749 = vrot.lane.b32.xlu0 %v3241_v51, %s3538_s4  ;;  %v3243_v22 = vpop.eup %3242 }
0x1ea1   :  { %v1740_v5 = vadd.f32 1.0, %v3243_v22 }
0x1ea3   :  { %3244 = vrcp.f32 %v1740_v5  ;;  %v1477_v5 = vadd.f32 %v4158_v29, %v4113_v53 }
0x1eb0   :  { %v3245_v6 = vpop.eup %3244 }
0x1eb1   :  { %v1747_v25 = vmul.f32 %v3245_v6, %v1680_v37 }
0x1f12   :  { %v1750_v11 = vpop.permute.xlu0 %1749 }
0x1f13   :  { %v1752_v52 = vmul.f32 %v3245_v6, %v1750_v11 }
0x1f15   :  { %1754 = vrot.lane.b32.xlu1 %v1752_v52, %s3538_s4 }
0x1f87   :  { %v1755_v54 = vpop.permute.xlu1 %1754 }
0x1f88   :  { %v1757_v26 = vadd.f32 %v1755_v54, %v1747_v25 }
0x1f8a   :  { %3246 = vtanh.f32 %v1757_v26 }
0x1f8b   :  { %3248 = vpow2.f32 %v2916_v17 }
0x1f97   :  { %v3247_v55 = vpop.eup %3246 }
0x1f98   :  { %1760 = vrot.lane.b32.xlu0 %v3247_v55, %s3538_s4  ;;  %v3249_v31 = vpop.eup %3248 }
0x1f99   :  { %v1741_v57 = vadd.f32 1.0, %v3249_v31 }
0x1f9b   :  { %3250 = vrcp.f32 %v1741_v57 }
0x1fa8   :  { %v3251_v58 = vpop.eup %3250 }
0x200a   :  { %v1761_v59 = vpop.permute.xlu0 %1760 }
0x200b   :  { %v1763_v56 = vmul.f32 %v3251_v58, %v1761_v59 }
0x200d   :  { %v1764_v61 = vpack.c.bf16 %v1763_v56, %v1763_v56 }
0x200f   :  { %2917 = vmatmul.mubr.msk.bf16.vlgmr.msra.gmra.mxu0 %vm408_vm2, %v1764_v61 }
0x2010   :  { %1931 = vmatpush1.bf16.msra.mxu0 %v4059_v24  ;;  %1954 = vmatprep.mubr.bf16.mxu0 %v3537_v1 }
0x2011   :  { %1932 = vmatprep.subr.bf16.mxu0 %v4064_v14 }
0x2014   :  { %1933 = vmatpush1.bf16.msra.mxu0 %v4066_v39 }
0x2015   :  { %1934 = vmatprep.subr.bf16.mxu0 %v4070_v40 }
0x2018   :  { %1935 = vmatpush1.bf16.msra.mxu0 %v4072_v41 }
0x2019   :  { %1936 = vmatprep.subr.bf16.mxu0 %v4077_v12 }
0x201c   :  { %1937 = vmatpush1.bf16.msra.mxu0 %v4079_v43 }
0x201d   :  { %2084 = vmatprep.subr.bf16.mxu0 %v4057_v13 }
0x20cf   :  { %v1802_v62 = vpop.f32.mrf.mxu0 }
0x20d0   :  { %v1809_v37 = vadd.f32 %v1802_v62, %v1469_v16 }
0x20d1   :  { %v1804_v60 = vpop.f32.mrf.mxu0 }
0x20d2   :  { %v1810_v63 = vadd.f32 %v1804_v60, %v1471_v47  ;;  %v2918_v9 = vmul.f32 -1.442695, %v1809_v37 }
0x20d3   :  { %v1806_v46 = vpop.f32.mrf.mxu0 }
0x20d4   :  { %3252 = vtanh.f32 %v1810_v63  ;;  %v2919_v48 = vmul.f32 -1.442695, %v1810_v63 }
0x20d5   :  { %v1807_v7 = vpop.f32.mrf.mxu0  ;;  %3254 = vpow2.f32 %v2918_v9 }
0x20d6   :  { %v1481_v7 = vadd.f32 %v4160_v2, %v4109_v10 }
0x20e1   :  { %v3253_v8 = vpop.eup %3252 }
0x20e2   :  { %1826 = vrot.lane.b32.xlu1 %v3253_v8, %s3538_s4  ;;  %v3255_v19 = vpop.eup %3254 }
0x20e3   :  { %v1817_v33 = vadd.f32 1.0, %v3255_v19 }
0x20e5   :  { %3256 = vrcp.f32 %v1817_v33 }
0x20f2   :  { %v3257_v13 = vpop.eup %3256 }
0x20f3   :  { %v1824_v32 = vmul.f32 %v3257_v13, %v1757_v26 }
0x2154   :  { %v1827_v34 = vpop.permute.xlu1 %1826 }
0x2155   :  { %v1829_v21 = vmul.f32 %v3257_v13, %v1827_v34 }
0x2157   :  { %1831 = vrot.lane.b32.xlu0 %v1829_v21, %s3538_s4 }
0x21c9   :  { %v1832_v35 = vpop.permute.xlu0 %1831 }
0x21ca   :  { %v1834_v28 = vadd.f32 %v1832_v35, %v1824_v32  ;;  %v2164_v35 = vld [vmem:[#allocation10 + $0x78] sm:$0xff] }
0x21cc   :  { %3258 = vtanh.f32 %v1834_v28 }
0x21cd   :  { %3260 = vpow2.f32 %v2919_v48 }
0x21d9   :  { %v3259_v45 = vpop.eup %3258 }
0x21da   :  { %1837 = vrot.lane.b32.xlu1 %v3259_v45, %s3538_s4  ;;  %v3261_v49 = vpop.eup %3260 }
0x21db   :  { %v1818_v23 = vadd.f32 1.0, %v3261_v49 }
0x21dd   :  { %3262 = vrcp.f32 %v1818_v23 }
0x21ea   :  { %v3263_v50 = vpop.eup %3262 }
0x224c   :  { %v1838_v3 = vpop.permute.xlu1 %1837 }
0x224d   :  { %v1840_v20 = vmul.f32 %v3263_v50, %v1838_v3 }
0x224f   :  { %v1841_v51 = vpack.c.bf16 %v1840_v20, %v1840_v20 }
0x2251   :  { %2920 = vmatmul.mubr.msk.bf16.vlgmr.msra.gmra.mxu1 %vm408_vm2, %v1841_v51  ;;  %v2163_v51 = vld [vmem:[#allocation10 + $0x70] sm:$0xff] }
0x2252   :  { %2008 = vmatpush1.bf16.msra.mxu1 %v4059_v24  ;;  %2031 = vmatprep.mubr.bf16.mxu1 %v3537_v1 }
0x2253   :  { %2009 = vmatprep.subr.bf16.mxu1 %v4064_v14 }
0x2256   :  { %2010 = vmatpush1.bf16.msra.mxu1 %v4066_v39 }
0x2257   :  { %2011 = vmatprep.subr.bf16.mxu1 %v4070_v40 }
0x225a   :  { %2012 = vmatpush1.bf16.msra.mxu1 %v4072_v41 }
0x225b   :  { %2013 = vmatprep.subr.bf16.mxu1 %v4077_v12 }
0x225e   :  { %2014 = vmatpush1.bf16.msra.mxu1 %v4079_v43 }
0x225f   :  { %2202 = vmatprep.subr.mxu1 %v2164_v35 }
0x2311   :  { %v1879_v22 = vpop.f32.mrf.mxu1 }
0x2312   :  { %v1886_v6 = vadd.f32 %v1879_v22, %v1475_v4  ;;  %v2162_v4 = vld [vmem:[#allocation10 + $0x68] sm:$0xff]  ;;  %v2161_v22 = vld [vmem:[#allocation10 + $0x60] sm:$0xff] }
0x2313   :  { %v1881_v11 = vpop.f32.mrf.mxu1 }
0x2314   :  { %v1887_v52 = vadd.f32 %v1881_v11, %v1477_v5  ;;  %v2921_v55 = vmul.f32 -1.442695, %v1886_v6  ;;  %v2160_v5 = vld [vmem:[#allocation10 + $0x58] sm:$0xff]  ;;  %v2159_v6 = vld [vmem:[#allocation10 + $0x50] sm:$0xff]  ;;  %v2158_v11 = vld [vmem:[#allocation10 + $0x48] sm:$0xff] }
0x2315   :  { %v1883_v25 = vpop.f32.mrf.mxu1 }
0x2316   :  { %3264 = vtanh.f32 %v1887_v52  ;;  %v2922_v16 = vmul.f32 -1.442695, %v1887_v52  ;;  %v2157_v52 = vld [vmem:[#allocation10 + $0x40] sm:$0xff]  ;;  %v2156_v25 = vld [vmem:[#allocation10 + $0x38] sm:$0xff] }
0x2317   :  { %v1884_v54 = vpop.f32.mrf.mxu1  ;;  %3266 = vpow2.f32 %v2921_v55  ;;  %v2153_v55 = vld [vmem:[#allocation10 + $0x20] sm:$0xff] }
0x2318   :  { %v2155_v54 = vld [vmem:[#allocation10 + $0x30] sm:$0xff] }
0x2323   :  { %v3265_v26 = vpop.eup %3264 }
0x2324   :  { %1903 = vrot.lane.b32.xlu0 %v3265_v26, %s3538_s4  ;;  %v3267_v17 = vpop.eup %3266  ;;  %v2154_v26 = vld [vmem:[#allocation10 + $0x28] sm:$0xff] }
0x2325   :  { %v1894_v31 = vadd.f32 1.0, %v3267_v17  ;;  %v2152_v17 = vld [vmem:[#allocation10 + $0x18] sm:$0xff] }
0x2327   :  { %3268 = vrcp.f32 %v1894_v31  ;;  %v2151_v31 = vld [vmem:[#allocation10 + $0x10] sm:$0xff] }
0x2334   :  { %v3269_v57 = vpop.eup %3268 }
0x2335   :  { %v1901_v29 = vmul.f32 %v3269_v57, %v1834_v28 }
0x2396   :  { %v1904_v36 = vpop.permute.xlu0 %1903 }
0x2397   :  { %v1906_v58 = vmul.f32 %v3269_v57, %v1904_v36  ;;  %v2150_v57 = vld [vmem:[#allocation10 + $0x8] sm:$0xff]  ;;  %v2149_v36 = vld [vmem:[#allocation10] sm:$0xff] }
0x2399   :  { %1908 = vrot.lane.b32.xlu1 %v1906_v58, %s3538_s4  ;;  %v1487_v58 = vadd.f32 %v4164_v38, %v4109_v10 }
0x240b   :  { %v1909_v59 = vpop.permute.xlu1 %1908 }
0x240c   :  { %v1911_v56 = vadd.f32 %v1909_v59, %v1901_v29  ;;  %v1489_v59 = vadd.f32 %v4166_v42, %v4113_v53 }
0x240e   :  { %3270 = vtanh.f32 %v1911_v56 }
0x240f   :  { %3272 = vpow2.f32 %v2922_v16 }
0x241b   :  { %v3271_v61 = vpop.eup %3270 }
0x241c   :  { %1914 = vrot.lane.b32.xlu0 %v3271_v61, %s3538_s4  ;;  %v3273_v62 = vpop.eup %3272 }
0x241d   :  { %v1895_v47 = vadd.f32 1.0, %v3273_v62 }
0x241f   :  { %3274 = vrcp.f32 %v1895_v47 }
0x242c   :  { %v3275_v37 = vpop.eup %3274 }
0x248e   :  { %v1915_v60 = vpop.permute.xlu0 %1914 }
0x248f   :  { %v1917_v63 = vmul.f32 %v3275_v37, %v1915_v60 }
0x2491   :  { %v1918_v46 = vpack.c.bf16 %v1917_v63, %v1917_v63 }
0x2493   :  { %2923 = vmatmul.mubr.msk.bf16.vlgmr.msra.gmra.mxu0 %vm408_vm2, %v1918_v46 }
0x2494   :  { %2085 = vmatpush1.bf16.msra.mxu0 %v4059_v24  ;;  %2108 = vmatprep.mubr.bf16.mxu0 %v3537_v1  ;;  %v1483_v24 = vadd.f32 %v4162_v30, %v4113_v53 }
0x2495   :  { %2086 = vmatprep.subr.bf16.mxu0 %v4064_v14 }
0x2498   :  { %2087 = vmatpush1.bf16.msra.mxu0 %v4066_v39 }
0x2499   :  { %2088 = vmatprep.subr.bf16.mxu0 %v4070_v40 }
0x249c   :  { %2089 = vmatpush1.bf16.msra.mxu0 %v4072_v41 }
0x249d   :  { %2090 = vmatprep.subr.bf16.mxu0 %v4077_v12 }
0x24a0   :  { %2091 = vmatpush1.bf16.msra.mxu0 %v4079_v43 }
0x2553   :  { %v1956_v8 = vpop.f32.mrf.mxu0 }
0x2554   :  { %v1963_v9 = vadd.f32 %v1956_v8, %v1481_v7 }
0x2555   :  { %v1958_v19 = vpop.f32.mrf.mxu0 }
0x2556   :  { %v1964_v14 = vadd.f32 %v1958_v19, %v1483_v24  ;;  %v2924_v41 = vmul.f32 -1.442695, %v1963_v9  ;;  %v3062_v19 = vld [vmem:[%s4396_s9 + $0x34] ss:$8 sps:$4 sm:$0xff]  }
0x2557   :  { %v1960_v33 = vpop.f32.mrf.mxu0  ;;  %2317 = vmatprep.subr.bf16.mxu0 %v3062_v19 }
0x2558   :  { %3276 = vtanh.f32 %v1964_v14  ;;  %v2925_v45 = vmul.f32 -1.442695, %v1964_v14  ;;  %v3060_v14 = vld [vmem:[%s4396_s9 + $0x30] ss:$8 sps:$4 sm:$0xff]   ;;  %v3065_v33 = vld [vmem:[%s4396_s9 + $0x24] ss:$8 sps:$4 sm:$0xff]  }
0x2559   :  { %v1961_v39 = vpop.f32.mrf.mxu0  ;;  %3278 = vpow2.f32 %v2924_v41  ;;  %v3066_v41 = vld [vmem:[%s4396_s9 + $0x10] ss:$8 sps:$4 sm:$0xff]  }
0x255a   :  { %v3063_v39 = vld [vmem:[%s4396_s9 + $0x20] ss:$8 sps:$4 sm:$0xff]  }
0x2565   :  { %v3277_v40 = vpop.eup %3276 }
0x2566   :  { %1980 = vrot.lane.b32.xlu1 %v3277_v40, %s3538_s4  ;;  %v3279_v12 = vpop.eup %3278  ;;  %v3068_v40 = vld [vmem:[%s4396_s9 + $0x14] ss:$8 sps:$4 sm:$0xff]  }
0x2567   :  { %v1971_v43 = vadd.f32 1.0, %v3279_v12 }
0x2569   :  { %3280 = vrcp.f32 %v1971_v43  ;;  %v3071_v43 = vld [vmem:[%s4396_s9 + $0x4] ss:$8 sps:$4 sm:$0xff]  }
0x2576   :  { %v3281_v13 = vpop.eup %3280 }
0x2577   :  { %v1978_v30 = vmul.f32 %v3281_v13, %v1911_v56 }
0x25d8   :  { %v1981_v2 = vpop.permute.xlu1 %1980 }
0x25d9   :  { %v1983_v34 = vmul.f32 %v3281_v13, %v1981_v2  ;;  %v3069_v13 = vld [vmem:[%s4396_s9] ss:$8 sps:$4 sm:$0xff]   ;;  %s3540_s9 = smov [#allocation13]  }
0x25da   :  { %s2808_s26 = sshll.u32 %s3540_s9, 4  ;;  %s2809_s26 = int_to_ptr.vmem [resolvable:$true] %s2808_s26 }
0x25db   :  { %1985 = vrot.lane.b32.xlu0 %v1983_v34, %s3538_s4  ;;  %p3479_p3 = scmp.lt.s32.totalorder %s2809_s26, %s2809_s26 }
0x264d   :  { %v1986_v21 = vpop.permute.xlu0 %1985 }
0x264e   :  { %v4223_v32 = vadd.f32 %v1986_v21, %v1978_v30 }
0x2650   :  { %3282 = vtanh.f32 %v4223_v32 }
0x2651   :  { %3284 = vpow2.f32 %v2925_v45  ;;  %v1493_v45 = vadd.f32 %v4168_v27, %v4109_v10 }
0x265d   :  { %v3283_v28 = vpop.eup %3282 }
0x265e   :  { %1991 = vrot.lane.b32.xlu1 %v3283_v28, %s3538_s4  ;;  %v3285_v48 = vpop.eup %3284 }
0x265f   :  { %v1972_v49 = vadd.f32 1.0, %v3285_v48 }
0x2661   :  { %3286 = vrcp.f32 %v1972_v49  ;;  %v1495_v49 = vadd.f32 %v4170_v44, %v4113_v53 }
0x266e   :  { %v3287_v23 = vpop.eup %3286 }
0x26d0   :  { %v1992_v50 = vpop.permute.xlu1 %1991 }
0x26d1   :  { %v1994_v3 = vmul.f32 %v3287_v23, %v1992_v50 }
0x26d3   :  { %v1995_v20 = vpack.c.bf16 %v1994_v3, %v1994_v3 }
0x26d5   :  { %2926 = vmatmul.mubr.msk.bf16.vlgmr.msra.gmra.mxu1 %vm408_vm2, %v1995_v20 }
0x26d6   :  { %2203 = vmatpush1.msra.mxu1 %v2163_v51  ;;  %2250 = vmatprep.mubr.f32.mxu1 %v3536_v0 }
0x26d7   :  { %2204 = vmatprep.subr.mxu1 %v2162_v4  ;;  %v2165_v4 = vld [vmem:[%s4397_s10] sm:$0x3]  ;;  %s3541_s10 = smov [#allocation14]  }
0x26d8   :  { %2205 = vmatpush1.msra.mxu1 %v2161_v22  ;;  %v4282_v22 = vrot.slane %v2165_v4, %v3715_v15  ;;  %v4286_v27 = vrot.slane %v2165_v4, %v3723_v18  ;;  %s2818_s3 = sshll.u32 %s3541_s10, 4  ;;  %s2819_s3 = int_to_ptr.vmem [resolvable:$true] %s2818_s3 }
0x26d9   :  { %2206 = vmatprep.subr.mxu1 %v2160_v5 }
0x26da   :  { %2207 = vmatpush1.msra.mxu1 %v2159_v6 }
0x26db   :  { %2208 = vmatprep.subr.mxu1 %v2158_v11 }
0x26dc   :  { %2209 = vmatpush1.msra.mxu1 %v2157_v52 }
0x26dd   :  { %2210 = vmatprep.subr.mxu1 %v2156_v25 }
0x26de   :  { %2211 = vmatpush1.msra.mxu1 %v2155_v54 }
0x26df   :  { %2212 = vmatprep.subr.mxu1 %v2154_v26 }
0x26e0   :  { %2213 = vmatpush1.msra.mxu1 %v2153_v55 }
0x26e1   :  { %2214 = vmatprep.subr.mxu1 %v2152_v17 }
0x26e2   :  { %2215 = vmatpush1.msra.mxu1 %v2151_v31 }
0x26e3   :  { %2216 = vmatprep.subr.mxu1 %v2150_v57 }
0x26e4   :  { %2217 = vmatpush1.msra.mxu1 %v2149_v36 }
0x26e5   :  { %2932 = vmatmul.mubr.msk.f32.vlgmr.msra.gmra.mxu1 %vm408_vm2, %v1994_v3  ;;  %2394 = vmatprep.subr.bf16.mxu1 %v3062_v19 }
0x26e6   :  { %2256 = vmatprep.mubr.f32.mxu1 %v3536_v0  ;;  %2395 = vmatpush1.bf16.msra.mxu1 %v3060_v14 }
0x26e7   :  { %2396 = vmatprep.subr.bf16.mxu1 %v3065_v33 }
0x26ea   :  { %2397 = vmatpush1.bf16.msra.mxu1 %v3063_v39 }
0x26eb   :  { %2398 = vmatprep.subr.bf16.mxu1 %v3068_v40 }
0x26ee   :  { %2399 = vmatpush1.bf16.msra.mxu1 %v3066_v41 }
0x26ef   :  { %2400 = vmatprep.subr.bf16.mxu1 %v3071_v43 }
0x26f2   :  { %2401 = vmatpush1.bf16.msra.mxu1 %v3069_v13 }
0x26f3   :  { %2977 = vmatprep.subr.mxu1 %v3536_v0 }
0x2795   :  { %v2033_v29 = vpop.f32.mrf.mxu1 }
0x2796   :  { %v2040_v56 = vadd.f32 %v2033_v29, %v1487_v58 }
0x2797   :  { %v2035_v61 = vpop.f32.mrf.mxu1 }
0x2798   :  { %v2041_v16 = vadd.f32 %v2035_v61, %v1489_v59  ;;  %v2927_v60 = vmul.f32 -1.442695, %v2040_v56 }
0x2799   :  { %v2037_v62 = vpop.f32.mrf.mxu1 }
0x279a   :  { %3288 = vtanh.f32 %v2041_v16  ;;  %v2928_v2 = vmul.f32 -1.442695, %v2041_v16 }
0x279b   :  { %v2038_v47 = vpop.f32.mrf.mxu1  ;;  %3290 = vpow2.f32 %v2927_v60 }
0x27a5   :  { %v2252_v5 = vpop.f32.mrf.mxu1 }
0x27a6   :  { %v2253_v10 = vadd.f32 %v2252_v5, %v4282_v22 }
0x27a7   :  { %v3289_v37 = vpop.eup %3288  ;;  %v2254_v53 = vpop.f32.mrf.mxu1 }
0x27a8   :  { %2057 = vrot.lane.b32.xlu0 %v3289_v37, %s3538_s4  ;;  %v3291_v63 = vpop.eup %3290  ;;  %v2255_v25 = vadd.f32 %v2254_v53, %v4286_v27 }
0x27a9   :  { %v2048_v46 = vadd.f32 1.0, %v3291_v63 }
0x27ab   :  { %3292 = vrcp.f32 %v2048_v46 }
0x27b8   :  { %v3293_v7 = vpop.eup %3292 }
0x27b9   :  { %v2055_v42 = vmul.f32 %v3293_v7, %v4223_v32 }
0x281a   :  { %v2058_v38 = vpop.permute.xlu0 %2057 }
0x281b   :  { %v2060_v8 = vmul.f32 %v3293_v7, %v2058_v38 }
0x281d   :  { %2062 = vrot.lane.b32.xlu1 %v2060_v8, %s3538_s4 }
0x288f   :  { %v2063_v24 = vpop.permute.xlu1 %2062 }
0x2890   :  { %v4238_v9 = vadd.f32 %v2063_v24, %v2055_v42 }
0x2892   :  { %3294 = vtanh.f32 %v4238_v9 }
0x2893   :  { %3296 = vpow2.f32 %v2928_v2 }
0x289f   :  { %v3295_v12 = vpop.eup %3294 }
0x28a0   :  { %2068 = vrot.lane.b32.xlu0 %v3295_v12, %s3538_s4  ;;  %v3297_v34 = vpop.eup %3296 }
0x28a1   :  { %v2049_v30 = vadd.f32 1.0, %v3297_v34 }
0x28a3   :  { %3298 = vrcp.f32 %v2049_v30 }
0x28b0   :  { %v3299_v21 = vpop.eup %3298 }
0x2912   :  { %v2069_v32 = vpop.permute.xlu0 %2068 }
0x2913   :  { %v2071_v35 = vmul.f32 %v3299_v21, %v2069_v32 }
0x2915   :  { %v2072_v28 = vpack.c.bf16 %v2071_v35, %v2071_v35  ;;  %2933 = vmatmul.mubr.msk.f32.gmra.mxu1 %vm408_vm2, %v2071_v35 }
0x2916   :  { %2262 = vmatprep.mubr.f32.mxu1 %v3536_v0 }
0x2917   :  { %2929 = vmatmul.mubr.msk.bf16.vlgmr.msra.gmra.mxu0 %vm408_vm2, %v2072_v28 }
0x2918   :  { %2318 = vmatpush1.bf16.msra.mxu0 %v3060_v14  ;;  %2341 = vmatprep.mubr.bf16.mxu0 %v3537_v1 }
0x2919   :  { %2319 = vmatprep.subr.bf16.mxu0 %v3065_v33 }
0x291c   :  { %2320 = vmatpush1.bf16.msra.mxu0 %v3063_v39 }
0x291d   :  { %2321 = vmatprep.subr.bf16.mxu0 %v3068_v40 }
0x2920   :  { %2322 = vmatpush1.bf16.msra.mxu0 %v3066_v41 }
0x2921   :  { %2323 = vmatprep.subr.bf16.mxu0 %v3071_v43 }
0x2924   :  { %2324 = vmatpush1.bf16.msra.mxu0 %v3069_v13 }
0x2925   :  { %2471 = vmatprep.subr.bf16.mxu0 %v3062_v19 }
0x2927   :  { %2342 = vmatmul.mubr.bf16.vlgmr.msra.gmra.mxu0 %v3537_v1 }
0x2928   :  { %2472 = vmatpush1.bf16.msra.mxu0 %v3060_v14  ;;  %2495 = vmatprep.mubr.bf16.mxu0 %v3537_v1 }
0x2929   :  { %2473 = vmatprep.subr.bf16.mxu0 %v3065_v33 }
0x292c   :  { %2474 = vmatpush1.bf16.msra.mxu0 %v3063_v39 }
0x292d   :  { %2475 = vmatprep.subr.bf16.mxu0 %v3068_v40 }
0x2930   :  { %2476 = vmatpush1.bf16.msra.mxu0 %v3066_v41 }
0x2931   :  { %2477 = vmatprep.subr.bf16.mxu0 %v3071_v43 }
0x2934   :  { %2478 = vmatpush1.bf16.msra.mxu0 %v3069_v13 }
0x2935   :  { %2982 = vmatprep.subr.mxu0 %v3536_v0 }
0x29d5   :  { %v2258_v34 = vpop.f32.mrf.mxu1 }
0x29d6   :  { %v2259_v35 = vadd.f32 %v2258_v34, %v4282_v22  ;;  %v2714_v34 = vld [vmem:[%s4401_s14 + $0x18] sm:$0xff] }
0x29d7   :  { %v2110_v48 = vpop.f32.mrf.mxu0  ;;  %v2260_v30 = vpop.f32.mrf.mxu1 }
0x29d8   :  { %v2117_v23 = vadd.f32 %v2110_v48, %v1493_v45  ;;  %v2261_v45 = vadd.f32 %v2260_v30, %v4286_v27 }
0x29d9   :  { %v2112_v50 = vpop.f32.mrf.mxu0 }
0x29da   :  { %v2118_v3 = vadd.f32 %v2112_v50, %v1495_v49  ;;  %v2930_v17 = vmul.f32 -1.442695, %v2117_v23 }
0x29db   :  { %v2114_v20 = vpop.f32.mrf.mxu0 }
0x29dc   :  { %3300 = vtanh.f32 %v2118_v3  ;;  %v2931_v42 = vmul.f32 -1.442695, %v2118_v3 }
0x29dd   :  { %v2115_v51 = vpop.f32.mrf.mxu0 }
0x29e7   :  { %v2343_v44 = vpop.f32.mrf.mxu0 }
0x29e8   :  { %v2350_v6 = vadd.f32 %v2343_v44, %v2253_v10 }
0x29e9   :  { %v2345_v11 = vpop.f32.mrf.mxu0  ;;  %v3301_v52 = vpop.eup %3300 }
0x29ea   :  { %2134 = vrot.lane.b32.xlu1 %v3301_v52, %s3538_s4  ;;  %v2351_v26 = vadd.f32 %v2345_v11, %v2255_v25  ;;  %v2943_v31 = vmul.f32 -1.442695, %v2350_v6 }
0x29eb   :  { %v2347_v54 = vpop.f32.mrf.mxu0 }
0x29ec   :  { %3302 = vtanh.f32 %v2351_v26  ;;  %v2944_v19 = vmul.f32 -1.442695, %v2351_v26 }
0x29ed   :  { %v2348_v55 = vpop.f32.mrf.mxu0  ;;  %3304 = vpow2.f32 %v2930_v17 }
0x29ee   :  { %3306 = vpow2.f32 %v2943_v31 }
0x29f9   :  { %v3303_v15 = vpop.eup %3302 }
0x29fa   :  { %2367 = vrot.lane.b32.xlu0 %v3303_v15, %s3538_s4  ;;  %v3305_v18 = vpop.eup %3304 }
0x29fb   :  { %v2125_v57 = vadd.f32 1.0, %v3305_v18  ;;  %v3307_v36 = vpop.eup %3306 }
0x29fc   :  { %v2358_v56 = vadd.f32 1.0, %v3307_v36 }
0x29fd   :  { %3308 = vrcp.f32 %v2125_v57 }
0x29fe   :  { %3310 = vrcp.f32 %v2358_v56 }
0x2a0a   :  { %v3309_v58 = vpop.eup %3308 }
0x2a0b   :  { %v3311_v61 = vpop.eup %3310  ;;  %v2132_v47 = vmul.f32 %v3309_v58, %v4238_v9 }
0x2a0c   :  { %v2365_v46 = vmul.f32 0.0, %v3311_v61 }
0x2a5c   :  { %v2135_v29 = vpop.permute.xlu1 %2134 }
0x2a5d   :  { %v2137_v59 = vmul.f32 %v3309_v58, %v2135_v29 }
0x2a5f   :  { %2139 = vrot.lane.b32.xlu1 %v2137_v59, %s3538_s4 }
0x2a6c   :  { %v2368_v16 = vpop.permute.xlu0 %2367 }
0x2a6d   :  { %v2370_v62 = vmul.f32 %v3311_v61, %v2368_v16 }
0x2a6f   :  { %2372 = vrot.lane.b32.xlu0 %v2370_v62, %s3538_s4 }
0x2ad1   :  { %v2140_v37 = vpop.permute.xlu1 %2139 }
0x2ad2   :  { %v2142_v60 = vadd.f32 %v2140_v37, %v2132_v47 }
0x2ad4   :  { %3312 = vtanh.f32 %v2142_v60 }
0x2ae1   :  { %v3313_v63 = vpop.eup %3312  ;;  %v2373_v7 = vpop.permute.xlu0 %2372 }
0x2ae2   :  { %2145 = vrot.lane.b32.xlu1 %v3313_v63, %s3538_s4  ;;  %v2375_v38 = vadd.f32 %v2373_v7, %v2365_v46  ;;  %v2548_v46 = vld [vmem:[#allocation11 + $0x30] sm:$0xff]  ;;  %v2551_v7 = vld [vmem:[%s4399_s12] sm:$0x3]  ;;  %s3474_s12 = scalar_lea.vmem %s2809_s26, 128 }
0x2ae3   :  { %p3475_p2 = scmp.ne.s32.totalorder %s2809_s26, %s3474_s12  ;;  %p3480_p4 = scmp.lt.s32.totalorder %s3474_s12, %s3474_s12 }
0x2ae4   :  { %3314 = vtanh.f32 %v2375_v38 }
0x2ae5   :  { %3316 = vpow2.f32 %v2931_v42  ;;  %v2545_v42 = vld [vmem:[#allocation11 + $0x18] sm:$0xff]  ;;  %p3481_p5 = por %p3480_p4, %p3479_p3 }
0x2ae6   :  { %3318 = vpow2.f32 %v2944_v19 }
0x2ae7   :  { %p3482_p6 = pnand %p3481_p5, %p3475_p2 }
0x2af1   :  { %v3315_v8 = vpop.eup %3314 }
0x2af2   :  { %2378 = vrot.lane.b32.xlu0 %v3315_v8, %s3538_s4  ;;  %v3317_v24 = vpop.eup %3316  ;;  %v2546_v8 = vld [vmem:[#allocation11 + $0x20] sm:$0xff] }
0x2af3   :  { %v2126_v14 = vadd.f32 1.0, %v3317_v24  ;;  %v3319_v9 = vpop.eup %3318  ;;  %v2544_v24 = vld [vmem:[#allocation11 + $0x10] sm:$0xff] }
0x2af4   :  { %v2359_v41 = vadd.f32 1.0, %v3319_v9  ;;  %v2543_v9 = vld [vmem:[#allocation11 + $0x8] sm:$0xff] }
0x2af5   :  { %3320 = vrcp.f32 %v2126_v14 }
0x2af6   :  { %3322 = vrcp.f32 %v2359_v41  ;;  %v2718_v41 = vld [vmem:[%s4401_s14 + $0x38] sm:$0xff] }
0x2b02   :  { %v3321_v33 = vpop.eup %3320 }
0x2b03   :  { %v3323_v12 = vpop.eup %3322 }
0x2b54   :  { %v2146_v39 = vpop.permute.xlu1 %2145 }
0x2b55   :  { %v2148_v40 = vmul.f32 %v3321_v33, %v2146_v39  ;;  %v2550_v39 = vld [vmem:[%s4412_s28] sm:$0xff] }
0x2b57   :  { %2934 = vmatmul.mubr.msk.f32.gmra.mxu1 %vm408_vm2, %v2148_v40  ;;  %v2542_v40 = vld [vmem:[#allocation11] sm:$0xff] }
0x2b58   :  { %2418 = vmatprep.mubr.bf16.mxu1 %v3537_v1 }
0x2b64   :  { %v2379_v43 = vpop.permute.xlu0 %2378 }
0x2b65   :  { %v2381_v13 = vmul.f32 %v3323_v12, %v2379_v43  ;;  %v2717_v12 = vld [vmem:[%s4401_s14 + $0x30] sm:$0xff]  ;;  %v2716_v43 = vld [vmem:[%s4401_s14 + $0x28] sm:$0xff] }
0x2b67   :  { %v2382_v2 = vpack.c.bf16 %v2381_v13, %v2381_v13  ;;  %v2715_v13 = vld [vmem:[%s4401_s14 + $0x20] sm:$0xff] }
0x2b69   :  { %2945 = vmatmul.mubr.msk.bf16.vlgmr.msra.gmra.mxu1 %vm408_vm2, %v2382_v2 }
0x2b6a   :  { %2979 = vmatprep.mubr.msk.f32.mxu1 %vm3539_vm4, %v3536_v0  ;;  %2978 = vmatpush3.msk.msra.mxu1 %vm2556_vm3, %v2551_v7 }
0x2b6b   :  { %3001 = vmatprep.subr.mxu1 %v3536_v0 }
0x2b71   :  { %2980 = vmatmul.mubr.msk.f32.vlgmr.msra.gmra.mxu1 %vm2552_vm5, %v2550_v39 }
0x2b72   :  { %3017 = vmatprep.mubr.msk.f32.mxu1 %vm3539_vm4, %v3536_v0  ;;  %3002 = vmatpush3.msra.mxu1 %v2718_v41 }
0x2b73   :  { %3003 = vmatprep.subr.mxu1 %v3536_v0 }
0x2b74   :  { %3004 = vmatpush3.msra.mxu1 %v2717_v12 }
0x2b75   :  { %3005 = vmatprep.subr.mxu1 %v3536_v0 }
0x2b76   :  { %3006 = vmatpush3.msra.mxu1 %v2716_v43 }
0x2b77   :  { %3007 = vmatprep.subr.mxu1 %v3536_v0 }
0x2b78   :  { %3008 = vmatpush3.msra.mxu1 %v2715_v13 }
0x2b79   :  { %3009 = vmatprep.subr.mxu1 %v3536_v0 }
0x2b7a   :  { %3010 = vmatpush3.msra.mxu1 %v2714_v34 }
0x2b7b   :  { %3011 = vmatprep.subr.mxu1 %v3536_v0 }
0x2c17   :  { %v2264_v21 = vpop.f32.mrf.mxu1 }
0x2c18   :  { %v2265_v31 = vadd.f32 %v2264_v21, %v4282_v22 }
0x2c19   :  { %v2266_v32 = vpop.f32.mrf.mxu1 }
0x2c1a   :  { %v2267_v36 = vadd.f32 %v2266_v32, %v4286_v27  ;;  %v2549_v27 = vld [vmem:[#allocation11 + $0x38] sm:$0xff] }
0x2c29   :  { %v2420_v28 = vpop.f32.mrf.mxu1 }
0x2c2a   :  { %v2427_v48 = vadd.f32 %v2420_v28, %v2259_v35 }
0x2c2b   :  { %v2422_v49 = vpop.f32.mrf.mxu1 }
0x2c2c   :  { %v2428_v23 = vadd.f32 %v2422_v49, %v2261_v45  ;;  %v2946_v20 = vmul.f32 -1.442695, %v2427_v48 }
0x2c2d   :  { %v2424_v1 = vpop.f32.mrf.mxu1 }
0x2c2e   :  { %3324 = vtanh.f32 %v2428_v23  ;;  %v2947_v25 = vmul.f32 -1.442695, %v2428_v23  ;;  %v2713_v23 = vld [vmem:[%s4401_s14 + $0x10] sm:$0xff] }
0x2c2f   :  { %v2425_v50 = vpop.f32.mrf.mxu1  ;;  %3326 = vpow2.f32 %v2946_v20  ;;  %3012 = vmatpush3.msra.mxu1 %v2713_v23 }
0x2c30   :  { %3013 = vmatprep.subr.mxu1 %v3536_v0  ;;  %v2712_v50 = vld [vmem:[%s4401_s14 + $0x8] sm:$0xff] }
0x2c31   :  { %v2626_v49 = vpop.f32.mrf.mxu1  ;;  %3014 = vmatpush3.msra.mxu1 %v2712_v50 }
0x2c32   :  { %3015 = vmatprep.subr.mxu1 %v3536_v0 }
0x2c33   :  { %v2981_v1 = vpop.f32.mrf.mxu1 }
0x2c3b   :  { %v3325_v3 = vpop.eup %3324 }
0x2c3c   :  { %2444 = vrot.lane.b32.xlu1 %v3325_v3, %s3538_s4  ;;  %v3327_v51 = vpop.eup %3326  ;;  %v2711_v3 = vld [vmem:[%s4401_s14] sm:$0xff] }
0x2c3d   :  { %v2435_v4 = vadd.f32 1.0, %v3327_v51  ;;  %3016 = vmatpush3.msra.mxu1 %v2711_v3  ;;  %v2954_v51 = vld [vmem:[%s4400_s13] ss:$0 sm:$0xff] }
0x2c3f   :  { %3328 = vrcp.f32 %v2435_v4 }
0x2c4c   :  { %v3329_v5 = vpop.eup %3328 }
0x2c4d   :  { %v2442_v44 = vmul.f32 %v3329_v5, %v2375_v38  ;;  %v2547_v38 = vld [vmem:[#allocation11 + $0x28] sm:$0xff] }
0x2cae   :  { %v2445_v10 = vpop.permute.xlu1 %2444 }
0x2caf   :  { %v2447_v53 = vmul.f32 %v3329_v5, %v2445_v10 }
0x2cb1   :  { %2449 = vrot.lane.b32.xlu0 %v2447_v53, %s3538_s4 }
0x2d23   :  { %v2450_v6 = vpop.permute.xlu0 %2449 }
0x2d24   :  { %v2452_v11 = vadd.f32 %v2450_v6, %v2442_v44 }
0x2d26   :  { %3330 = vtanh.f32 %v2452_v11 }
0x2d27   :  { %3332 = vpow2.f32 %v2947_v25 }
0x2d33   :  { %v3331_v52 = vpop.eup %3330 }
0x2d34   :  { %2455 = vrot.lane.b32.xlu1 %v3331_v52, %s3538_s4  ;;  %v3333_v54 = vpop.eup %3332 }
0x2d35   :  { %v2436_v26 = vadd.f32 1.0, %v3333_v54 }
0x2d37   :  { %3334 = vrcp.f32 %v2436_v26 }
0x2d44   :  { %v3335_v55 = vpop.eup %3334 }
0x2da6   :  { %v2456_v15 = vpop.permute.xlu1 %2455 }
0x2da7   :  { %v2458_v17 = vmul.f32 %v3335_v55, %v2456_v15 }
0x2da9   :  { %v2459_v18 = vpack.c.bf16 %v2458_v17, %v2458_v17 }
0x2dab   :  { %2948 = vmatmul.mubr.msk.bf16.vlgmr.msra.gmra.mxu0 %vm408_vm2, %v2459_v18 }
0x2dac   :  { %2983 = vmatpush3.msra.mxu0 %v2549_v27  ;;  %2998 = vmatprep.mubr.msk.f32.mxu0 %vm3539_vm4, %v3536_v0 }
0x2dad   :  { %2984 = vmatprep.subr.mxu0 %v3536_v0 }
0x2dae   :  { %2985 = vmatpush3.msra.mxu0 %v2548_v46 }
0x2daf   :  { %2986 = vmatprep.subr.mxu0 %v3536_v0 }
0x2db0   :  { %2987 = vmatpush3.msra.mxu0 %v2547_v38 }
0x2db1   :  { %2988 = vmatprep.subr.mxu0 %v3536_v0 }
0x2db2   :  { %2989 = vmatpush3.msra.mxu0 %v2546_v8 }
0x2db3   :  { %2990 = vmatprep.subr.mxu0 %v3536_v0 }
0x2db4   :  { %2991 = vmatpush3.msra.mxu0 %v2545_v42 }
0x2db5   :  { %2992 = vmatprep.subr.mxu0 %v3536_v0 }
0x2db6   :  { %2993 = vmatpush3.msra.mxu0 %v2544_v24 }
0x2db7   :  { %2994 = vmatprep.subr.mxu0 %v3536_v0 }
0x2db8   :  { %2995 = vmatpush3.msra.mxu0 %v2543_v9 }
0x2db9   :  { %2996 = vmatprep.subr.mxu0 %v3536_v0 }
0x2dba   :  { %2997 = vmatpush3.msra.mxu0 %v2542_v40 }
0x2e6b   :  { %v2497_v57 = vpop.f32.mrf.mxu0 }
0x2e6c   :  { %v2504_v58 = vadd.f32 %v2497_v57, %v2265_v31 }
0x2e6d   :  { %v2499_v29 = vpop.f32.mrf.mxu0 }
0x2e6e   :  { %v4307_v59 = vadd.f32 %v2499_v29, %v2267_v36  ;;  %v2949_v62 = vmul.f32 -1.442695, %v2504_v58 }
0x2e6f   :  { %v2501_v56 = vpop.f32.mrf.mxu0 }
0x2e70   :  { %3336 = vtanh.f32 %v4307_v59  ;;  %v2950_v30 = vmul.f32 -1.442695, %v4307_v59 }
0x2e71   :  { %v2502_v61 = vpop.f32.mrf.mxu0  ;;  %3338 = vpow2.f32 %v2949_v62 }
0x2e7d   :  { %v3337_v16 = vpop.eup %3336 }
0x2e7e   :  { %2521 = vrot.lane.b32.xlu0 %v3337_v16, %s3538_s4  ;;  %v3339_v47 = vpop.eup %3338 }
0x2e7f   :  { %v2512_v37 = vadd.f32 1.0, %v3339_v47 }
0x2e81   :  { %3340 = vrcp.f32 %v2512_v37 }
0x2e8e   :  { %v3341_v22 = vpop.eup %3340 }
0x2e8f   :  { %v2519_v19 = vmul.f32 %v3341_v22, %v2452_v11 }
0x2ef0   :  { %v2522_v60 = vpop.permute.xlu0 %2521 }
0x2ef1   :  { %v2524_v63 = vmul.f32 %v3341_v22, %v2522_v60 }
0x2ef3   :  { %2526 = vrot.lane.b32.xlu1 %v2524_v63, %s3538_s4 }
0x2f65   :  { %v2527_v14 = vpop.permute.xlu1 %2526 }
0x2f66   :  { %v2529_v33 = vadd.f32 %v2527_v14, %v2519_v19 }
0x2f68   :  { %3342 = vtanh.f32 %v2529_v33  ;;  %2538 = vrot.lane.b32.xlu1 %v2529_v33, %s3538_s4 }
0x2f69   :  { %3344 = vpow2.f32 %v2950_v30 }
0x2f75   :  { %v3343_v2 = vpop.eup %3342 }
0x2f76   :  { %2532 = vrot.lane.b32.xlu0 %v3343_v2, %s3538_s4  ;;  %v3345_v21 = vpop.eup %3344 }
0x2f77   :  { %v2513_v32 = vadd.f32 1.0, %v3345_v21 }
0x2f79   :  { %3346 = vrcp.f32 %v2513_v32 }
0x2f86   :  { %v3347_v28 = vpop.eup %3346 }
0x2fda   :  { %v2539_v35 = vpop.permute.xlu1 %2538 }
0x2fdb   :  { %2541 = vst.msk [vmem:[#allocation14] sm:$0xff] %vm408_vm2, %v2539_v35 }
0x2fe8   :  { %v2533_v45 = vpop.permute.xlu0 %2532 }
0x2fe9   :  { %v2535_v48 = vmul.f32 %v3347_v28, %v2533_v45 }
0x2feb   :  { %2536 = vst.msk [vmem:[#allocation13] sm:$0xff] %vm408_vm2, %v2535_v48  ;;  %2999 = vmatmul.mubr.msk.f32.vlgmr.msra.gmra.mxu0 %vm408_vm2, %v2535_v48 }
0x30ab   :  { %v2699_v20 = vpop.f32.mrf.mxu0 }
0x30ac   :  { %v2700_v4 = vadd.f32 %v2699_v20, %v2626_v49 }
0x30ad   :  { %v3000_v5 = vpop.f32.mrf.mxu0 }
0x30ae   :  { %v2710_v10 = vadd.f32 %v2954_v51, %v2700_v4 }
0x30b0   :  { %3018 = vmatmul.mubr.msk.f32.vlgmr.msra.gmra.mxu1 %vm408_vm2, %v2710_v10 }
0x30b1   :  { %3485 = shalt.err (!%p3482_p6)
}
0x30b2   :  { %2811 = dma.vmem_to_hbm [thread:$0]  %s2809_s26, 128, %s4404_s17, [#allocation4]  }
0x30b3   :  { %s3494_s27 = scalar_lea.vmem %s2819_s3, 128  ;;  %p3499_p8 = scmp.lt.s32.totalorder %s2819_s3, %s2819_s3 }
0x30b4   :  { %p3495_p7 = scmp.ne.s32.totalorder %s2819_s3, %s3494_s27  ;;  %p3500_p9 = scmp.lt.s32.totalorder %s3494_s27, %s3494_s27 }
0x30b6   :  { %p3501_p10 = por %p3500_p9, %p3499_p8 }
0x30b8   :  { %p3502_p11 = pnand %p3501_p10, %p3495_p7 }
0x30ba   :  { %3505 = shalt.err (!%p3502_p11)
}
0x30bb   :  { %2821 = dma.vmem_to_hbm [thread:$0]  %s2819_s3, 128, %s4405_s18, [#allocation15]   ;;  %v2955_v0 = vld [vmem:[%s4402_s15] ss:$0 sm:$0xff] }
0x3170   :  { %v2795_v53 = vpop.f32.mrf.mxu1 }
0x3171   :  { %v2796_v44 = vadd.f32 %v2955_v0, %v2795_v53 }
0x3172   :  { %v3019_v6 = vpop.f32.mrf.mxu1 }
0x3173   :  { %2799 = vst.msk [vmem:[%s4403_s16] sm:$0xff] %vm2552_vm5, %v2796_v44 }
0x3174   :  { %3522 = dma.done.wait [#allocation4], 128  }
0x3175   :  { %3523 = vsyncadd [#allocation4], 4294967168 }
0x3176   :  { %3524 = dma.done.wait [#allocation15], 128  }
0x3177   :  { %3525 = vsyncadd [#allocation15], 4294967168 }
0x3178   :  { %2830 = vsyncpa [#allocation3], 1 }
0x3179   :  { %2831 = vsyncpa [#allocation6], 1 }
0x317a   :  { %2832 = vsyncpa [#allocation9], 1 }
0x317b   :  { %2833 = vsyncpa [#allocation12], 1 }
0x317c   :  { %2834 = vsyncpa [#allocation4], 1 }
0x317d   :  { %2835 = vsyncpa [#allocation15], 1 }

</bundles_post_ra>
